<compile_context>
chip_gen: v7x
topology: tpu7x:2x2x1
jax: 0.10.0
libtpu: 0.0.40
codegen_flags: <defaults>
</compile_context>

<pallas_src>
import jax
import jax.numpy as jnp
from jax.experimental import pallas as pl
from jax.experimental.pallas import tpu as pltpu

H = W = 28
HW = H * W                   # 784
HWP = 896                    # 7 * 128 : lane-padded spatial size
PADL = 128                   # left zero pad; absorbs every causal shift (max 87)

# Active taps of the masked convolutions, as (di, dj) spatial offsets.
# Type 'A' 7x7: rows above center fully + center row strictly left of center.
TAPS_7A = tuple((ki - 3, kj - 3) for ki in range(7) for kj in range(7)
                if ki < 3 or (ki == 3 and kj < 3))          # 24 taps
# Type 'B' 3x3: rows above center fully + center row up to & incl. center.
TAPS_3B = tuple((ki - 1, kj - 1) for ki in range(3) for kj in range(3)
                if ki < 1 or (ki == 1 and kj <= 1))         # 5 taps
NT1 = len(TAPS_7A)           # 24
NT2 = len(TAPS_3B)           # 5


# ----------------------------------------------------------------------------
# Fused Pallas kernel: whole PixelCNN forward for one image per grid step
# ----------------------------------------------------------------------------
def _fused_pixelcnn_kernel(x_ref, w1_ref, bias1_ref, w2_ref, b2_ref,
                           w3_ref, b3_ref, o_ref,
                           xpad_ref, p1_ref, h1pad_ref, p2_ref):
    f32 = jnp.float32
    C = w1_ref.shape[0]

    # Column index of each (lane-padded) flat pixel position; lanes >= 784
    # only ever influence padded output lanes, which the wrapper slices off.
    col = jax.lax.broadcasted_iota(jnp.int32, (1, HWP), 1) % W

    def col_masked(s, dj):
        if dj < 0:
            return jnp.where(col >= -dj, s, 0.0)
        if dj > 0:
            return jnp.where(col < W - dj, s, 0.0)
        return s

    # ---- stage the raw image into a left-zero-padded VMEM scratch ---------
    xpad_ref[:, pl.ds(0, PADL)] = jnp.zeros((1, PADL), f32)
    xpad_ref[:, pl.ds(PADL, HWP)] = x_ref[...]          # lane-aligned store

    # ---- in-kernel im2col for the 7x7 type-'A' masked conv ---------------
    # Row validity is handled by the zero left pad; column validity by masks.
    for t, (di, dj) in enumerate(TAPS_7A):
        s = xpad_ref[:, pl.ds(PADL + di * W + dj, HWP)]  # (1, HWP)
        p1_ref[pl.ds(t, 1), :] = col_masked(s, dj)

    # ---- layer 1: (C, 24) @ (24, HWP) + per-image z-conditioned bias ------
    # (MXU default precision; pass precision=jax.lax.Precision.HIGHEST here
    #  if exact f32 parity with the PyTorch conv is required.)
    h1 = jnp.dot(w1_ref[...], p1_ref[...], preferred_element_type=f32)
    h1 = jnp.maximum(h1 + bias1_ref[...], 0.0)           # (C, HWP)

    # ---- stage h1 into a left-zero-padded scratch (3x3 shifts) ------------
    h1pad_ref[:, pl.ds(0, PADL)] = jnp.zeros((C, PADL), f32)
    h1pad_ref[:, pl.ds(PADL, HWP)] = h1                  # lane-aligned store

    # ---- build the stacked (5C, HWP) operand for the fused layer-2 matmul -
    for k, (di, dj) in enumerate(TAPS_3B):
        s = h1pad_ref[:, pl.ds(PADL + di * W + dj, HWP)]  # (C, HWP)
        p2_ref[pl.ds(k * C, C), :] = col_masked(s, dj)

    # ---- layer 2: single (C, 5C) @ (5C, HWP) matmul + ReLU -----------------
    h2 = jnp.dot(w2_ref[...], p2_ref[...], preferred_element_type=f32)
    h2 = jnp.maximum(h2 + b2_ref[...], 0.0)              # (C, HWP)

    # ---- layer 3: 1x1 conv C -> 1 + sigmoid; lane-dense (1, HWP) output ----
    logits = jnp.dot(w3_ref[...], h2, preferred_element_type=f32) + b3_ref[0, 0]
    o_ref[...] = jax.nn.sigmoid(logits).astype(o_ref.dtype)


def fused_pixelcnn_call(x, w1t, bias1, w2f, b2c, w3t, b3):
    """x: (B, 1, HWP) lane-padded images; returns (B, 1, HWP) probabilities."""
    B = x.shape[0]
    C = w1t.shape[0]
    return pl.pallas_call(
        _fused_pixelcnn_kernel,
        out_shape=jax.ShapeDtypeStruct((B, 1, HWP), jnp.float32),
        grid=(B,),
        in_specs=[
            pl.BlockSpec((None, 1, HWP), lambda b: (b, 0, 0)),    # raw image
            pl.BlockSpec((C, NT1), lambda b: (0, 0)),             # w1 taps (C, 24)
            pl.BlockSpec((None, C, 1), lambda b: (b, 0, 0)),      # per-image bias1
            pl.BlockSpec((C, NT2 * C), lambda b: (0, 0)),         # w2 fused (C, 5C)
            pl.BlockSpec((C, 1), lambda b: (0, 0)),               # b2 column
            pl.BlockSpec((1, C), lambda b: (0, 0)),               # w3^T
            pl.BlockSpec(memory_space=pltpu.MemorySpace.SMEM),    # b3 scalar
        ],
        out_specs=pl.BlockSpec((None, 1, HWP), lambda b: (b, 0, 0)),
        scratch_shapes=[
            pltpu.VMEM((1, PADL + HWP), jnp.float32),             # padded image
            pltpu.VMEM((NT1, HWP), jnp.float32),                  # layer-1 patches
            pltpu.VMEM((C, PADL + HWP), jnp.float32),             # padded h1
            pltpu.VMEM((NT2 * C, HWP), jnp.float32),              # stacked layer-2 slabs
        ],
        compiler_params=pltpu.CompilerParams(
            dimension_semantics=("parallel",)),
    )(x, w1t, bias1, w2f, b2c, w3t, b3)


# ----------------------------------------------------------------------------
# JAX glue: mask construction, parameter init
# ----------------------------------------------------------------------------
def causal_mask(K, mask_type):
    """PixelCNN mask over the (K, K) spatial kernel (type 'A' excludes center)."""
    c = K // 2
    m = jnp.zeros((K, K), dtype=jnp.float32)
    m = m.at[:c, :].set(1.0)
    m = m.at[c, :c].set(1.0)
    if mask_type == "B":
        m = m.at[c, c].set(1.0)
    return m


def init_params(key, latent_dim, C):
    k1, k2, k3, kz1, kz2 = jax.random.split(key, 5)
    # Torch-layout weights (Cout, Cin, K, K), masked.
    w1 = 0.10 * jax.random.normal(k1, (C, 1, 7, 7), jnp.float32)
    w1 = w1 * causal_mask(7, "A")[None, None]
    w2 = 0.05 * jax.random.normal(k2, (C, C, 3, 3), jnp.float32)
    w2 = w2 * causal_mask(3, "B")[None, None]
    w3 = 0.10 * jax.random.normal(k3, (1, C, 1, 1), jnp.float32)

    # Kernel layouts: only the causally-active taps, channel-major.
    w1t = jnp.stack([w1[:, 0, di + 3, dj + 3] for (di, dj) in TAPS_7A],
                    axis=1)                                        # (C, 24)
    w2f = jnp.concatenate([w2[:, :, di + 1, dj + 1] for (di, dj) in TAPS_3B],
                          axis=1)                                  # (C, 5C)
    w3t = w3.reshape(1, C)                                         # (1, C)

    return {
        "w1t": w1t, "b1": jnp.zeros((C,), jnp.float32),
        "w2f": w2f, "b2c": jnp.zeros((C, 1), jnp.float32),
        "w3t": w3t, "b3": jnp.zeros((1, 1), jnp.float32),
        "wz": 0.10 * jax.random.normal(kz1, (latent_dim, C), jnp.float32),
        "bz": 0.01 * jax.random.normal(kz2, (1, C), jnp.float32),
    }


# ----------------------------------------------------------------------------
# Conditional PixelCNN forward + decoder forward
# ----------------------------------------------------------------------------
def pixelcnn_forward(params, img_nchw, z):
    """img_nchw: (B, 1, 28, 28), z: (B, L) -> (B, 1, 28, 28) probabilities."""
    B = img_nchw.shape[0]

    # Raw image, flattened and lane-padded 784 -> 896 with zeros (3.5 KB/img).
    x = img_nchw.reshape(B, 1, HW)
    x = jnp.pad(x, ((0, 0), (0, 0), (0, HWP - HW)))                  # (B, 1, 896)

    # z-conditioning bias: ~2 KFLOPs -> plain JAX, folded with layer-1 bias.
    bias1 = z @ params["wz"] + params["bz"] + params["b1"][None, :]  # (B, C)
    bias1 = bias1[:, :, None]                                        # (B, C, 1)

    out = fused_pixelcnn_call(x, params["w1t"], bias1, params["w2f"],
                              params["b2c"], params["w3t"], params["b3"])
    return out[:, :, :HW].reshape(B, 1, H, W)


def pixelcnn_decoder_forward(params, z, img, generate_mode=False):
    """Mirrors pixelcnn_decoder.forward(z, img, generate_mode) -> (sample,)."""
    img_out = img.reshape(img.shape[0], 1, 28, 28)
    if generate_mode is False:
        sample = pixelcnn_forward(params, img_out, z)
    else:
        # TODO(synk): generate_mode=True (autoregressive pixelcnn.sample over
        # 784 pixels) is an inherently sequential host-level loop; only the
        # training-path forward is kernelized here.
        raise NotImplementedError("generate_mode=True not implemented")
    return (sample,)


# ----------------------------------------------------------------------------
if __name__ == "__main__":
    B, LATENT, CHANNELS = 2, 16, 32

    key = jax.random.PRNGKey(0)
    kz, kimg = jax.random.split(key)
    z = jax.random.normal(kz, (B, LATENT), dtype=jnp.float32)
    img = jax.random.uniform(kimg, (B, HW), dtype=jnp.float32)  # flattened MNIST

    params = init_params(jax.random.PRNGKey(42), LATENT, CHANNELS)

    fwd = jax.jit(lambda p, zz, ii: pixelcnn_decoder_forward(p, zz, ii,
                                                             generate_mode=False))
    (sample,) = fwd(params, z, img)
    sample = jax.block_until_ready(sample)

    assert sample.shape == (B, 1, 28, 28), sample.shape
    assert sample.dtype == jnp.float32
    assert bool(jnp.all(jnp.isfinite(sample)))
    assert bool(jnp.all((sample >= 0.0) & (sample <= 1.0)))
    print("KERNEL_OK")
</pallas_src>

<mosaic_0001>
module attributes {stable_mosaic.version = 11 : i64} {
  func.func @_fused_pixelcnn_kernel(%arg0: i32, %arg1: memref<1x1x896xf32, #tpu.memory_space<vmem>>, %arg2: memref<32x24xf32, #tpu.memory_space<vmem>>, %arg3: memref<1x32x1xf32, #tpu.memory_space<vmem>>, %arg4: memref<32x160xf32, #tpu.memory_space<vmem>>, %arg5: memref<32x1xf32, #tpu.memory_space<vmem>>, %arg6: memref<1x32xf32, #tpu.memory_space<vmem>>, %arg7: memref<1x1xf32, #tpu.memory_space<smem>>, %arg8: memref<1x1x896xf32, #tpu.memory_space<vmem>>, %arg9: memref<1x1024xf32, #tpu.memory_space<vmem>>, %arg10: memref<24x896xf32, #tpu.memory_space<vmem>>, %arg11: memref<32x1024xf32, #tpu.memory_space<vmem>>, %arg12: memref<160x896xf32, #tpu.memory_space<vmem>>) attributes {dimension_semantics = [#tpu.dimension_semantics<parallel>], iteration_bounds = array<i64: 2>, scalar_prefetch = 0 : i64, scratch_operands = 4 : i64, tpu.core_type = #tpu.core_type<tc>, window_params = [{transform_indices = @transform_0, window_bounds = array<i64: 1, 1, 896>}, {pipeline_mode = #tpu.pipeline_mode<synchronous>, transform_indices = @transform_1, window_bounds = array<i64: 32, 24>}, {transform_indices = @transform_2, window_bounds = array<i64: 1, 32, 1>}, {pipeline_mode = #tpu.pipeline_mode<synchronous>, transform_indices = @transform_3, window_bounds = array<i64: 32, 160>}, {pipeline_mode = #tpu.pipeline_mode<synchronous>, transform_indices = @transform_4, window_bounds = array<i64: 32, 1>}, {pipeline_mode = #tpu.pipeline_mode<synchronous>, transform_indices = @transform_5, window_bounds = array<i64: 1, 32>}, {transform_indices = @transform_6, window_bounds = array<i64: 1, 1>}, {transform_indices = @transform_7, window_bounds = array<i64: 1, 1, 896>}]} {
    %0 = tpu.iota {dimensions = array<i32: 1>} : vector<1x896xi32>
    %c28_i32 = arith.constant 28 : i32
    %c0_i32 = arith.constant 0 : i32
    %1 = arith.cmpi eq, %c28_i32, %c0_i32 : i32
    %c1_i32 = arith.constant 1 : i32
    %2 = arith.select %1, %c1_i32, %c28_i32 : i32
    %3 = vector.broadcast %2 : i32 to vector<1x896xi32>
    %4 = arith.remsi %0, %3 : vector<1x896xi32>
    %c0_i32_0 = arith.constant 0 : i32
    %5 = vector.broadcast %c0_i32_0 : i32 to vector<1x896xi32>
    %6 = arith.cmpi ne, %4, %5 : vector<1x896xi32>
    %c0_i32_1 = arith.constant 0 : i32
    %7 = vector.broadcast %c0_i32_1 : i32 to vector<1x896xi32>
    %8 = arith.cmpi slt, %4, %7 : vector<1x896xi32>
    %c0_i32_2 = arith.constant 0 : i32
    %9 = arith.cmpi slt, %2, %c0_i32_2 : i32
    %10 = vector.broadcast %9 : i1 to vector<1x896xi1>
    %11 = vector.broadcast %10 : vector<1x896xi1> to vector<1x896xi1>
    %12 = arith.xori %8, %11 : vector<1x896xi1>
    %13 = arith.andi %12, %6 : vector<1x896xi1>
    %14 = vector.broadcast %2 : i32 to vector<1x896xi32>
    %15 = arith.addi %4, %14 : vector<1x896xi32>
    %16 = arith.select %13, %15, %4 : vector<1x896xi1>, vector<1x896xi32>
    %cst = arith.constant 0.000000e+00 : f32
    %17 = vector.broadcast %cst : f32 to vector<1x128xf32>
    %c0 = arith.constant 0 : index
    %c0_3 = arith.constant 0 : index
    %18 = vector.load %arg9[%c0, %c0_3] : memref<1x1024xf32, #tpu.memory_space<vmem>>, vector<1x128xf32>
    tpu.vector_store %arg9[%c0, %c0_3], %17 {strides = array<i32>} : memref<1x1024xf32, #tpu.memory_space<vmem>>, vector<1x128xf32>,
    %c0_4 = arith.constant 0 : index
    %c0_5 = arith.constant 0 : index
    %c0_6 = arith.constant 0 : index
    %19 = vector.load %arg1[%c0_4, %c0_5, %c0_6] : memref<1x1x896xf32, #tpu.memory_space<vmem>>, vector<1x1x896xf32>
    %20 = vector.shape_cast %19 : vector<1x1x896xf32> to vector<1x896xf32>
    %c0_7 = arith.constant 0 : index
    %c128 = arith.constant 128 : index
    %21 = vector.load %arg9[%c0_7, %c128] : memref<1x1024xf32, #tpu.memory_space<vmem>>, vector<1x896xf32>
    tpu.vector_store %arg9[%c0_7, %c128], %20 {strides = array<i32>} : memref<1x1024xf32, #tpu.memory_space<vmem>>, vector<1x896xf32>,
    %c0_8 = arith.constant 0 : index
    %c41 = arith.constant 41 : index
    %22 = vector.load %arg9[%c0_8, %c41] : memref<1x1024xf32, #tpu.memory_space<vmem>>, vector<1x896xf32>
    %c3_i32 = arith.constant 3 : i32
    %23 = vector.broadcast %c3_i32 : i32 to vector<1x896xi32>
    %24 = arith.cmpi sge, %16, %23 : vector<1x896xi32>
    %cst_9 = arith.constant 0.000000e+00 : f32
    %25 = vector.broadcast %cst_9 : f32 to vector<1x896xf32>
    %26 = arith.select %24, %22, %25 : vector<1x896xi1>, vector<1x896xf32>
    %c0_10 = arith.constant 0 : index
    %c0_11 = arith.constant 0 : index
    %27 = vector.load %arg10[%c0_10, %c0_11] : memref<24x896xf32, #tpu.memory_space<vmem>>, vector<1x896xf32>
    tpu.vector_store %arg10[%c0_10, %c0_11], %26 {strides = array<i32>} : memref<24x896xf32, #tpu.memory_space<vmem>>, vector<1x896xf32>,
    %c0_12 = arith.constant 0 : index
    %c42 = arith.constant 42 : index
    %28 = vector.load %arg9[%c0_12, %c42] : memref<1x1024xf32, #tpu.memory_space<vmem>>, vector<1x896xf32>
    %c2_i32 = arith.constant 2 : i32
    %29 = vector.broadcast %c2_i32 : i32 to vector<1x896xi32>
    %30 = arith.cmpi sge, %16, %29 : vector<1x896xi32>
    %cst_13 = arith.constant 0.000000e+00 : f32
    %31 = vector.broadcast %cst_13 : f32 to vector<1x896xf32>
    %32 = arith.select %30, %28, %31 : vector<1x896xi1>, vector<1x896xf32>
    %c1 = arith.constant 1 : index
    %c0_14 = arith.constant 0 : index
    %33 = vector.load %arg10[%c1, %c0_14] : memref<24x896xf32, #tpu.memory_space<vmem>>, vector<1x896xf32>
    tpu.vector_store %arg10[%c1, %c0_14], %32 {strides = array<i32>} : memref<24x896xf32, #tpu.memory_space<vmem>>, vector<1x896xf32>,
    %c0_15 = arith.constant 0 : index
    %c43 = arith.constant 43 : index
    %34 = vector.load %arg9[%c0_15, %c43] : memref<1x1024xf32, #tpu.memory_space<vmem>>, vector<1x896xf32>
    %c1_i32_16 = arith.constant 1 : i32
    %35 = vector.broadcast %c1_i32_16 : i32 to vector<1x896xi32>
    %36 = arith.cmpi sge, %16, %35 : vector<1x896xi32>
    %cst_17 = arith.constant 0.000000e+00 : f32
    %37 = vector.broadcast %cst_17 : f32 to vector<1x896xf32>
    %38 = arith.select %36, %34, %37 : vector<1x896xi1>, vector<1x896xf32>
    %c2 = arith.constant 2 : index
    %c0_18 = arith.constant 0 : index
    %39 = vector.load %arg10[%c2, %c0_18] : memref<24x896xf32, #tpu.memory_space<vmem>>, vector<1x896xf32>
    tpu.vector_store %arg10[%c2, %c0_18], %38 {strides = array<i32>} : memref<24x896xf32, #tpu.memory_space<vmem>>, vector<1x896xf32>,
    %c0_19 = arith.constant 0 : index
    %c44 = arith.constant 44 : index
    %40 = vector.load %arg9[%c0_19, %c44] : memref<1x1024xf32, #tpu.memory_space<vmem>>, vector<1x896xf32>
    %c3 = arith.constant 3 : index
    %c0_20 = arith.constant 0 : index
    %41 = vector.load %arg10[%c3, %c0_20] : memref<24x896xf32, #tpu.memory_space<vmem>>, vector<1x896xf32>
    tpu.vector_store %arg10[%c3, %c0_20], %40 {strides = array<i32>} : memref<24x896xf32, #tpu.memory_space<vmem>>, vector<1x896xf32>,
    %c0_21 = arith.constant 0 : index
    %c45 = arith.constant 45 : index
    %42 = vector.load %arg9[%c0_21, %c45] : memref<1x1024xf32, #tpu.memory_space<vmem>>, vector<1x896xf32>
    %c27_i32 = arith.constant 27 : i32
    %43 = vector.broadcast %c27_i32 : i32 to vector<1x896xi32>
    %44 = arith.cmpi slt, %16, %43 : vector<1x896xi32>
    %cst_22 = arith.constant 0.000000e+00 : f32
    %45 = vector.broadcast %cst_22 : f32 to vector<1x896xf32>
    %46 = arith.select %44, %42, %45 : vector<1x896xi1>, vector<1x896xf32>
    %c4 = arith.constant 4 : index
    %c0_23 = arith.constant 0 : index
    %47 = vector.load %arg10[%c4, %c0_23] : memref<24x896xf32, #tpu.memory_space<vmem>>, vector<1x896xf32>
    tpu.vector_store %arg10[%c4, %c0_23], %46 {strides = array<i32>} : memref<24x896xf32, #tpu.memory_space<vmem>>, vector<1x896xf32>,
    %c0_24 = arith.constant 0 : index
    %c46 = arith.constant 46 : index
    %48 = vector.load %arg9[%c0_24, %c46] : memref<1x1024xf32, #tpu.memory_space<vmem>>, vector<1x896xf32>
    %c26_i32 = arith.constant 26 : i32
    %49 = vector.broadcast %c26_i32 : i32 to vector<1x896xi32>
    %50 = arith.cmpi slt, %16, %49 : vector<1x896xi32>
    %cst_25 = arith.constant 0.000000e+00 : f32
    %51 = vector.broadcast %cst_25 : f32 to vector<1x896xf32>
    %52 = arith.select %50, %48, %51 : vector<1x896xi1>, vector<1x896xf32>
    %c5 = arith.constant 5 : index
    %c0_26 = arith.constant 0 : index
    %53 = vector.load %arg10[%c5, %c0_26] : memref<24x896xf32, #tpu.memory_space<vmem>>, vector<1x896xf32>
    tpu.vector_store %arg10[%c5, %c0_26], %52 {strides = array<i32>} : memref<24x896xf32, #tpu.memory_space<vmem>>, vector<1x896xf32>,
    %c0_27 = arith.constant 0 : index
    %c47 = arith.constant 47 : index
    %54 = vector.load %arg9[%c0_27, %c47] : memref<1x1024xf32, #tpu.memory_space<vmem>>, vector<1x896xf32>
    %c25_i32 = arith.constant 25 : i32
    %55 = vector.broadcast %c25_i32 : i32 to vector<1x896xi32>
    %56 = arith.cmpi slt, %16, %55 : vector<1x896xi32>
    %cst_28 = arith.constant 0.000000e+00 : f32
    %57 = vector.broadcast %cst_28 : f32 to vector<1x896xf32>
    %58 = arith.select %56, %54, %57 : vector<1x896xi1>, vector<1x896xf32>
    %c6 = arith.constant 6 : index
    %c0_29 = arith.constant 0 : index
    %59 = vector.load %arg10[%c6, %c0_29] : memref<24x896xf32, #tpu.memory_space<vmem>>, vector<1x896xf32>
    tpu.vector_store %arg10[%c6, %c0_29], %58 {strides = array<i32>} : memref<24x896xf32, #tpu.memory_space<vmem>>, vector<1x896xf32>,
    %c0_30 = arith.constant 0 : index
    %c69 = arith.constant 69 : index
    %60 = vector.load %arg9[%c0_30, %c69] : memref<1x1024xf32, #tpu.memory_space<vmem>>, vector<1x896xf32>
    %c3_i32_31 = arith.constant 3 : i32
    %61 = vector.broadcast %c3_i32_31 : i32 to vector<1x896xi32>
    %62 = arith.cmpi sge, %16, %61 : vector<1x896xi32>
    %cst_32 = arith.constant 0.000000e+00 : f32
    %63 = vector.broadcast %cst_32 : f32 to vector<1x896xf32>
    %64 = arith.select %62, %60, %63 : vector<1x896xi1>, vector<1x896xf32>
    %c7 = arith.constant 7 : index
    %c0_33 = arith.constant 0 : index
    %65 = vector.load %arg10[%c7, %c0_33] : memref<24x896xf32, #tpu.memory_space<vmem>>, vector<1x896xf32>
    tpu.vector_store %arg10[%c7, %c0_33], %64 {strides = array<i32>} : memref<24x896xf32, #tpu.memory_space<vmem>>, vector<1x896xf32>,
    %c0_34 = arith.constant 0 : index
    %c70 = arith.constant 70 : index
    %66 = vector.load %arg9[%c0_34, %c70] : memref<1x1024xf32, #tpu.memory_space<vmem>>, vector<1x896xf32>
    %c2_i32_35 = arith.constant 2 : i32
    %67 = vector.broadcast %c2_i32_35 : i32 to vector<1x896xi32>
    %68 = arith.cmpi sge, %16, %67 : vector<1x896xi32>
    %cst_36 = arith.constant 0.000000e+00 : f32
    %69 = vector.broadcast %cst_36 : f32 to vector<1x896xf32>
    %70 = arith.select %68, %66, %69 : vector<1x896xi1>, vector<1x896xf32>
    %c8 = arith.constant 8 : index
    %c0_37 = arith.constant 0 : index
    %71 = vector.load %arg10[%c8, %c0_37] : memref<24x896xf32, #tpu.memory_space<vmem>>, vector<1x896xf32>
    tpu.vector_store %arg10[%c8, %c0_37], %70 {strides = array<i32>} : memref<24x896xf32, #tpu.memory_space<vmem>>, vector<1x896xf32>,
    %c0_38 = arith.constant 0 : index
    %c71 = arith.constant 71 : index
    %72 = vector.load %arg9[%c0_38, %c71] : memref<1x1024xf32, #tpu.memory_space<vmem>>, vector<1x896xf32>
    %c1_i32_39 = arith.constant 1 : i32
    %73 = vector.broadcast %c1_i32_39 : i32 to vector<1x896xi32>
    %74 = arith.cmpi sge, %16, %73 : vector<1x896xi32>
    %cst_40 = arith.constant 0.000000e+00 : f32
    %75 = vector.broadcast %cst_40 : f32 to vector<1x896xf32>
    %76 = arith.select %74, %72, %75 : vector<1x896xi1>, vector<1x896xf32>
    %c9 = arith.constant 9 : index
    %c0_41 = arith.constant 0 : index
    %77 = vector.load %arg10[%c9, %c0_41] : memref<24x896xf32, #tpu.memory_space<vmem>>, vector<1x896xf32>
    tpu.vector_store %arg10[%c9, %c0_41], %76 {strides = array<i32>} : memref<24x896xf32, #tpu.memory_space<vmem>>, vector<1x896xf32>,
    %c0_42 = arith.constant 0 : index
    %c72 = arith.constant 72 : index
    %78 = vector.load %arg9[%c0_42, %c72] : memref<1x1024xf32, #tpu.memory_space<vmem>>, vector<1x896xf32>
    %c10 = arith.constant 10 : index
    %c0_43 = arith.constant 0 : index
    %79 = vector.load %arg10[%c10, %c0_43] : memref<24x896xf32, #tpu.memory_space<vmem>>, vector<1x896xf32>
    tpu.vector_store %arg10[%c10, %c0_43], %78 {strides = array<i32>} : memref<24x896xf32, #tpu.memory_space<vmem>>, vector<1x896xf32>,
    %c0_44 = arith.constant 0 : index
    %c73 = arith.constant 73 : index
    %80 = vector.load %arg9[%c0_44, %c73] : memref<1x1024xf32, #tpu.memory_space<vmem>>, vector<1x896xf32>
    %c27_i32_45 = arith.constant 27 : i32
    %81 = vector.broadcast %c27_i32_45 : i32 to vector<1x896xi32>
    %82 = arith.cmpi slt, %16, %81 : vector<1x896xi32>
    %cst_46 = arith.constant 0.000000e+00 : f32
    %83 = vector.broadcast %cst_46 : f32 to vector<1x896xf32>
    %84 = arith.select %82, %80, %83 : vector<1x896xi1>, vector<1x896xf32>
    %c11 = arith.constant 11 : index
    %c0_47 = arith.constant 0 : index
    %85 = vector.load %arg10[%c11, %c0_47] : memref<24x896xf32, #tpu.memory_space<vmem>>, vector<1x896xf32>
    tpu.vector_store %arg10[%c11, %c0_47], %84 {strides = array<i32>} : memref<24x896xf32, #tpu.memory_space<vmem>>, vector<1x896xf32>,
    %c0_48 = arith.constant 0 : index
    %c74 = arith.constant 74 : index
    %86 = vector.load %arg9[%c0_48, %c74] : memref<1x1024xf32, #tpu.memory_space<vmem>>, vector<1x896xf32>
    %c26_i32_49 = arith.constant 26 : i32
    %87 = vector.broadcast %c26_i32_49 : i32 to vector<1x896xi32>
    %88 = arith.cmpi slt, %16, %87 : vector<1x896xi32>
    %cst_50 = arith.constant 0.000000e+00 : f32
    %89 = vector.broadcast %cst_50 : f32 to vector<1x896xf32>
    %90 = arith.select %88, %86, %89 : vector<1x896xi1>, vector<1x896xf32>
    %c12 = arith.constant 12 : index
    %c0_51 = arith.constant 0 : index
    %91 = vector.load %arg10[%c12, %c0_51] : memref<24x896xf32, #tpu.memory_space<vmem>>, vector<1x896xf32>
    tpu.vector_store %arg10[%c12, %c0_51], %90 {strides = array<i32>} : memref<24x896xf32, #tpu.memory_space<vmem>>, vector<1x896xf32>,
    %c0_52 = arith.constant 0 : index
    %c75 = arith.constant 75 : index
    %92 = vector.load %arg9[%c0_52, %c75] : memref<1x1024xf32, #tpu.memory_space<vmem>>, vector<1x896xf32>
    %c25_i32_53 = arith.constant 25 : i32
    %93 = vector.broadcast %c25_i32_53 : i32 to vector<1x896xi32>
    %94 = arith.cmpi slt, %16, %93 : vector<1x896xi32>
    %cst_54 = arith.constant 0.000000e+00 : f32
    %95 = vector.broadcast %cst_54 : f32 to vector<1x896xf32>
    %96 = arith.select %94, %92, %95 : vector<1x896xi1>, vector<1x896xf32>
    %c13 = arith.constant 13 : index
    %c0_55 = arith.constant 0 : index
    %97 = vector.load %arg10[%c13, %c0_55] : memref<24x896xf32, #tpu.memory_space<vmem>>, vector<1x896xf32>
    tpu.vector_store %arg10[%c13, %c0_55], %96 {strides = array<i32>} : memref<24x896xf32, #tpu.memory_space<vmem>>, vector<1x896xf32>,
    %c0_56 = arith.constant 0 : index
    %c97 = arith.constant 97 : index
    %98 = vector.load %arg9[%c0_56, %c97] : memref<1x1024xf32, #tpu.memory_space<vmem>>, vector<1x896xf32>
    %c3_i32_57 = arith.constant 3 : i32
    %99 = vector.broadcast %c3_i32_57 : i32 to vector<1x896xi32>
    %100 = arith.cmpi sge, %16, %99 : vector<1x896xi32>
    %cst_58 = arith.constant 0.000000e+00 : f32
    %101 = vector.broadcast %cst_58 : f32 to vector<1x896xf32>
    %102 = arith.select %100, %98, %101 : vector<1x896xi1>, vector<1x896xf32>
    %c14 = arith.constant 14 : index
    %c0_59 = arith.constant 0 : index
    %103 = vector.load %arg10[%c14, %c0_59] : memref<24x896xf32, #tpu.memory_space<vmem>>, vector<1x896xf32>
    tpu.vector_store %arg10[%c14, %c0_59], %102 {strides = array<i32>} : memref<24x896xf32, #tpu.memory_space<vmem>>, vector<1x896xf32>,
    %c0_60 = arith.constant 0 : index
    %c98 = arith.constant 98 : index
    %104 = vector.load %arg9[%c0_60, %c98] : memref<1x1024xf32, #tpu.memory_space<vmem>>, vector<1x896xf32>
    %c2_i32_61 = arith.constant 2 : i32
    %105 = vector.broadcast %c2_i32_61 : i32 to vector<1x896xi32>
    %106 = arith.cmpi sge, %16, %105 : vector<1x896xi32>
    %cst_62 = arith.constant 0.000000e+00 : f32
    %107 = vector.broadcast %cst_62 : f32 to vector<1x896xf32>
    %108 = arith.select %106, %104, %107 : vector<1x896xi1>, vector<1x896xf32>
    %c15 = arith.constant 15 : index
    %c0_63 = arith.constant 0 : index
    %109 = vector.load %arg10[%c15, %c0_63] : memref<24x896xf32, #tpu.memory_space<vmem>>, vector<1x896xf32>
    tpu.vector_store %arg10[%c15, %c0_63], %108 {strides = array<i32>} : memref<24x896xf32, #tpu.memory_space<vmem>>, vector<1x896xf32>,
    %c0_64 = arith.constant 0 : index
    %c99 = arith.constant 99 : index
    %110 = vector.load %arg9[%c0_64, %c99] : memref<1x1024xf32, #tpu.memory_space<vmem>>, vector<1x896xf32>
    %c1_i32_65 = arith.constant 1 : i32
    %111 = vector.broadcast %c1_i32_65 : i32 to vector<1x896xi32>
    %112 = arith.cmpi sge, %16, %111 : vector<1x896xi32>
    %cst_66 = arith.constant 0.000000e+00 : f32
    %113 = vector.broadcast %cst_66 : f32 to vector<1x896xf32>
    %114 = arith.select %112, %110, %113 : vector<1x896xi1>, vector<1x896xf32>
    %c16 = arith.constant 16 : index
    %c0_67 = arith.constant 0 : index
    %115 = vector.load %arg10[%c16, %c0_67] : memref<24x896xf32, #tpu.memory_space<vmem>>, vector<1x896xf32>
    tpu.vector_store %arg10[%c16, %c0_67], %114 {strides = array<i32>} : memref<24x896xf32, #tpu.memory_space<vmem>>, vector<1x896xf32>,
    %c0_68 = arith.constant 0 : index
    %c100 = arith.constant 100 : index
    %116 = vector.load %arg9[%c0_68, %c100] : memref<1x1024xf32, #tpu.memory_space<vmem>>, vector<1x896xf32>
    %c17 = arith.constant 17 : index
    %c0_69 = arith.constant 0 : index
    %117 = vector.load %arg10[%c17, %c0_69] : memref<24x896xf32, #tpu.memory_space<vmem>>, vector<1x896xf32>
    tpu.vector_store %arg10[%c17, %c0_69], %116 {strides = array<i32>} : memref<24x896xf32, #tpu.memory_space<vmem>>, vector<1x896xf32>,
    %c0_70 = arith.constant 0 : index
    %c101 = arith.constant 101 : index
    %118 = vector.load %arg9[%c0_70, %c101] : memref<1x1024xf32, #tpu.memory_space<vmem>>, vector<1x896xf32>
    %c27_i32_71 = arith.constant 27 : i32
    %119 = vector.broadcast %c27_i32_71 : i32 to vector<1x896xi32>
    %120 = arith.cmpi slt, %16, %119 : vector<1x896xi32>
    %cst_72 = arith.constant 0.000000e+00 : f32
    %121 = vector.broadcast %cst_72 : f32 to vector<1x896xf32>
    %122 = arith.select %120, %118, %121 : vector<1x896xi1>, vector<1x896xf32>
    %c18 = arith.constant 18 : index
    %c0_73 = arith.constant 0 : index
    %123 = vector.load %arg10[%c18, %c0_73] : memref<24x896xf32, #tpu.memory_space<vmem>>, vector<1x896xf32>
    tpu.vector_store %arg10[%c18, %c0_73], %122 {strides = array<i32>} : memref<24x896xf32, #tpu.memory_space<vmem>>, vector<1x896xf32>,
    %c0_74 = arith.constant 0 : index
    %c102 = arith.constant 102 : index
    %124 = vector.load %arg9[%c0_74, %c102] : memref<1x1024xf32, #tpu.memory_space<vmem>>, vector<1x896xf32>
    %c26_i32_75 = arith.constant 26 : i32
    %125 = vector.broadcast %c26_i32_75 : i32 to vector<1x896xi32>
    %126 = arith.cmpi slt, %16, %125 : vector<1x896xi32>
    %cst_76 = arith.constant 0.000000e+00 : f32
    %127 = vector.broadcast %cst_76 : f32 to vector<1x896xf32>
    %128 = arith.select %126, %124, %127 : vector<1x896xi1>, vector<1x896xf32>
    %c19 = arith.constant 19 : index
    %c0_77 = arith.constant 0 : index
    %129 = vector.load %arg10[%c19, %c0_77] : memref<24x896xf32, #tpu.memory_space<vmem>>, vector<1x896xf32>
    tpu.vector_store %arg10[%c19, %c0_77], %128 {strides = array<i32>} : memref<24x896xf32, #tpu.memory_space<vmem>>, vector<1x896xf32>,
    %c0_78 = arith.constant 0 : index
    %c103 = arith.constant 103 : index
    %130 = vector.load %arg9[%c0_78, %c103] : memref<1x1024xf32, #tpu.memory_space<vmem>>, vector<1x896xf32>
    %c25_i32_79 = arith.constant 25 : i32
    %131 = vector.broadcast %c25_i32_79 : i32 to vector<1x896xi32>
    %132 = arith.cmpi slt, %16, %131 : vector<1x896xi32>
    %cst_80 = arith.constant 0.000000e+00 : f32
    %133 = vector.broadcast %cst_80 : f32 to vector<1x896xf32>
    %134 = arith.select %132, %130, %133 : vector<1x896xi1>, vector<1x896xf32>
    %c20 = arith.constant 20 : index
    %c0_81 = arith.constant 0 : index
    %135 = vector.load %arg10[%c20, %c0_81] : memref<24x896xf32, #tpu.memory_space<vmem>>, vector<1x896xf32>
    tpu.vector_store %arg10[%c20, %c0_81], %134 {strides = array<i32>} : memref<24x896xf32, #tpu.memory_space<vmem>>, vector<1x896xf32>,
    %c0_82 = arith.constant 0 : index
    %c125 = arith.constant 125 : index
    %136 = vector.load %arg9[%c0_82, %c125] : memref<1x1024xf32, #tpu.memory_space<vmem>>, vector<1x896xf32>
    %c3_i32_83 = arith.constant 3 : i32
    %137 = vector.broadcast %c3_i32_83 : i32 to vector<1x896xi32>
    %138 = arith.cmpi sge, %16, %137 : vector<1x896xi32>
    %cst_84 = arith.constant 0.000000e+00 : f32
    %139 = vector.broadcast %cst_84 : f32 to vector<1x896xf32>
    %140 = arith.select %138, %136, %139 : vector<1x896xi1>, vector<1x896xf32>
    %c21 = arith.constant 21 : index
    %c0_85 = arith.constant 0 : index
    %141 = vector.load %arg10[%c21, %c0_85] : memref<24x896xf32, #tpu.memory_space<vmem>>, vector<1x896xf32>
    tpu.vector_store %arg10[%c21, %c0_85], %140 {strides = array<i32>} : memref<24x896xf32, #tpu.memory_space<vmem>>, vector<1x896xf32>,
    %c0_86 = arith.constant 0 : index
    %c126 = arith.constant 126 : index
    %142 = vector.load %arg9[%c0_86, %c126] : memref<1x1024xf32, #tpu.memory_space<vmem>>, vector<1x896xf32>
    %c2_i32_87 = arith.constant 2 : i32
    %143 = vector.broadcast %c2_i32_87 : i32 to vector<1x896xi32>
    %144 = arith.cmpi sge, %16, %143 : vector<1x896xi32>
    %cst_88 = arith.constant 0.000000e+00 : f32
    %145 = vector.broadcast %cst_88 : f32 to vector<1x896xf32>
    %146 = arith.select %144, %142, %145 : vector<1x896xi1>, vector<1x896xf32>
    %c22 = arith.constant 22 : index
    %c0_89 = arith.constant 0 : index
    %147 = vector.load %arg10[%c22, %c0_89] : memref<24x896xf32, #tpu.memory_space<vmem>>, vector<1x896xf32>
    tpu.vector_store %arg10[%c22, %c0_89], %146 {strides = array<i32>} : memref<24x896xf32, #tpu.memory_space<vmem>>, vector<1x896xf32>,
    %c0_90 = arith.constant 0 : index
    %c127 = arith.constant 127 : index
    %148 = vector.load %arg9[%c0_90, %c127] : memref<1x1024xf32, #tpu.memory_space<vmem>>, vector<1x896xf32>
    %c1_i32_91 = arith.constant 1 : i32
    %149 = vector.broadcast %c1_i32_91 : i32 to vector<1x896xi32>
    %150 = arith.cmpi sge, %16, %149 : vector<1x896xi32>
    %cst_92 = arith.constant 0.000000e+00 : f32
    %151 = vector.broadcast %cst_92 : f32 to vector<1x896xf32>
    %152 = arith.select %150, %148, %151 : vector<1x896xi1>, vector<1x896xf32>
    %c23 = arith.constant 23 : index
    %c0_93 = arith.constant 0 : index
    %153 = vector.load %arg10[%c23, %c0_93] : memref<24x896xf32, #tpu.memory_space<vmem>>, vector<1x896xf32>
    tpu.vector_store %arg10[%c23, %c0_93], %152 {strides = array<i32>} : memref<24x896xf32, #tpu.memory_space<vmem>>, vector<1x896xf32>,
    %c0_94 = arith.constant 0 : index
    %c0_95 = arith.constant 0 : index
    %154 = vector.load %arg2[%c0_94, %c0_95] : memref<32x24xf32, #tpu.memory_space<vmem>>, vector<32x24xf32>
    %c0_96 = arith.constant 0 : index
    %c0_97 = arith.constant 0 : index
    %155 = vector.load %arg10[%c0_96, %c0_97] : memref<24x896xf32, #tpu.memory_space<vmem>>, vector<24x896xf32>
    %cst_98 = arith.constant dense<0.000000e+00> : vector<32x896xf32>
    %156 = tpu.matmul %154, %155, %cst_98 {dimension_numbers = #tpu.dot_dimension_numbers<[1], [0], [0], [1], [0, 0, 1, 1], [], []>} : vector<32x24xf32>, vector<24x896xf32>, vector<32x896xf32> -> vector<32x896xf32>
    %c0_99 = arith.constant 0 : index
    %c0_100 = arith.constant 0 : index
    %c0_101 = arith.constant 0 : index
    %157 = vector.load %arg3[%c0_99, %c0_100, %c0_101] : memref<1x32x1xf32, #tpu.memory_space<vmem>>, vector<1x32x1xf32>
    %158 = vector.shape_cast %157 : vector<1x32x1xf32> to vector<32x1xf32>
    %159 = vector.broadcast %158 : vector<32x1xf32> to vector<32x896xf32>
    %160 = arith.addf %156, %159 : vector<32x896xf32>
    %cst_102 = arith.constant 0.000000e+00 : f32
    %161 = vector.broadcast %cst_102 : f32 to vector<32x896xf32>
    %162 = arith.maximumf %160, %161 : vector<32x896xf32>
    %cst_103 = arith.constant 0.000000e+00 : f32
    %163 = vector.broadcast %cst_103 : f32 to vector<32x128xf32>
    %c0_104 = arith.constant 0 : index
    %c0_105 = arith.constant 0 : index
    %164 = vector.load %arg11[%c0_104, %c0_105] : memref<32x1024xf32, #tpu.memory_space<vmem>>, vector<32x128xf32>
    tpu.vector_store %arg11[%c0_104, %c0_105], %163 {strides = array<i32>} : memref<32x1024xf32, #tpu.memory_space<vmem>>, vector<32x128xf32>,
    %c0_106 = arith.constant 0 : index
    %c128_107 = arith.constant 128 : index
    %165 = vector.load %arg11[%c0_106, %c128_107] : memref<32x1024xf32, #tpu.memory_space<vmem>>, vector<32x896xf32>
    tpu.vector_store %arg11[%c0_106, %c128_107], %162 {strides = array<i32>} : memref<32x1024xf32, #tpu.memory_space<vmem>>, vector<32x896xf32>,
    %c0_108 = arith.constant 0 : index
    %c99_109 = arith.constant 99 : index
    %166 = vector.load %arg11[%c0_108, %c99_109] : memref<32x1024xf32, #tpu.memory_space<vmem>>, vector<32x896xf32>
    %c1_i32_110 = arith.constant 1 : i32
    %167 = vector.broadcast %c1_i32_110 : i32 to vector<1x896xi32>
    %168 = arith.cmpi sge, %16, %167 : vector<1x896xi32>
    %cst_111 = arith.constant 0.000000e+00 : f32
    %169 = vector.shape_cast %168 : vector<1x896xi1> to vector<1x896xi1>
    %170 = vector.broadcast %169 : vector<1x896xi1> to vector<32x896xi1>
    %171 = vector.broadcast %cst_111 : f32 to vector<32x896xf32>
    %172 = arith.select %170, %166, %171 : vector<32x896xi1>, vector<32x896xf32>
    %c0_112 = arith.constant 0 : index
    %c0_113 = arith.constant 0 : index
    %173 = vector.load %arg12[%c0_112, %c0_113] : memref<160x896xf32, #tpu.memory_space<vmem>>, vector<32x896xf32>
    tpu.vector_store %arg12[%c0_112, %c0_113], %172 {strides = array<i32>} : memref<160x896xf32, #tpu.memory_space<vmem>>, vector<32x896xf32>,
    %c0_114 = arith.constant 0 : index
    %c100_115 = arith.constant 100 : index
    %174 = vector.load %arg11[%c0_114, %c100_115] : memref<32x1024xf32, #tpu.memory_space<vmem>>, vector<32x896xf32>
    %c32 = arith.constant 32 : index
    %c0_116 = arith.constant 0 : index
    %175 = vector.load %arg12[%c32, %c0_116] : memref<160x896xf32, #tpu.memory_space<vmem>>, vector<32x896xf32>
    tpu.vector_store %arg12[%c32, %c0_116], %174 {strides = array<i32>} : memref<160x896xf32, #tpu.memory_space<vmem>>, vector<32x896xf32>,
    %c0_117 = arith.constant 0 : index
    %c101_118 = arith.constant 101 : index
    %176 = vector.load %arg11[%c0_117, %c101_118] : memref<32x1024xf32, #tpu.memory_space<vmem>>, vector<32x896xf32>
    %c27_i32_119 = arith.constant 27 : i32
    %177 = vector.broadcast %c27_i32_119 : i32 to vector<1x896xi32>
    %178 = arith.cmpi slt, %16, %177 : vector<1x896xi32>
    %cst_120 = arith.constant 0.000000e+00 : f32
    %179 = vector.shape_cast %178 : vector<1x896xi1> to vector<1x896xi1>
    %180 = vector.broadcast %179 : vector<1x896xi1> to vector<32x896xi1>
    %181 = vector.broadcast %cst_120 : f32 to vector<32x896xf32>
    %182 = arith.select %180, %176, %181 : vector<32x896xi1>, vector<32x896xf32>
    %c64 = arith.constant 64 : index
    %c0_121 = arith.constant 0 : index
    %183 = vector.load %arg12[%c64, %c0_121] : memref<160x896xf32, #tpu.memory_space<vmem>>, vector<32x896xf32>
    tpu.vector_store %arg12[%c64, %c0_121], %182 {strides = array<i32>} : memref<160x896xf32, #tpu.memory_space<vmem>>, vector<32x896xf32>,
    %c0_122 = arith.constant 0 : index
    %c127_123 = arith.constant 127 : index
    %184 = vector.load %arg11[%c0_122, %c127_123] : memref<32x1024xf32, #tpu.memory_space<vmem>>, vector<32x896xf32>
    %c1_i32_124 = arith.constant 1 : i32
    %185 = vector.broadcast %c1_i32_124 : i32 to vector<1x896xi32>
    %186 = arith.cmpi sge, %16, %185 : vector<1x896xi32>
    %cst_125 = arith.constant 0.000000e+00 : f32
    %187 = vector.shape_cast %186 : vector<1x896xi1> to vector<1x896xi1>
    %188 = vector.broadcast %187 : vector<1x896xi1> to vector<32x896xi1>
    %189 = vector.broadcast %cst_125 : f32 to vector<32x896xf32>
    %190 = arith.select %188, %184, %189 : vector<32x896xi1>, vector<32x896xf32>
    %c96 = arith.constant 96 : index
    %c0_126 = arith.constant 0 : index
    %191 = vector.load %arg12[%c96, %c0_126] : memref<160x896xf32, #tpu.memory_space<vmem>>, vector<32x896xf32>
    tpu.vector_store %arg12[%c96, %c0_126], %190 {strides = array<i32>} : memref<160x896xf32, #tpu.memory_space<vmem>>, vector<32x896xf32>,
    %c0_127 = arith.constant 0 : index
    %c128_128 = arith.constant 128 : index
    %192 = vector.load %arg11[%c0_127, %c128_128] : memref<32x1024xf32, #tpu.memory_space<vmem>>, vector<32x896xf32>
    %c128_129 = arith.constant 128 : index
    %c0_130 = arith.constant 0 : index
    %193 = vector.load %arg12[%c128_129, %c0_130] : memref<160x896xf32, #tpu.memory_space<vmem>>, vector<32x896xf32>
    tpu.vector_store %arg12[%c128_129, %c0_130], %192 {strides = array<i32>} : memref<160x896xf32, #tpu.memory_space<vmem>>, vector<32x896xf32>,
    %c0_131 = arith.constant 0 : index
    %c0_132 = arith.constant 0 : index
    %194 = vector.load %arg4[%c0_131, %c0_132] : memref<32x160xf32, #tpu.memory_space<vmem>>, vector<32x160xf32>
    %c0_133 = arith.constant 0 : index
    %c0_134 = arith.constant 0 : index
    %195 = vector.load %arg12[%c0_133, %c0_134] : memref<160x896xf32, #tpu.memory_space<vmem>>, vector<160x896xf32>
    %cst_135 = arith.constant dense<0.000000e+00> : vector<32x896xf32>
    %196 = tpu.matmul %194, %195, %cst_135 {dimension_numbers = #tpu.dot_dimension_numbers<[1], [0], [0], [1], [0, 0, 1, 1], [], []>} : vector<32x160xf32>, vector<160x896xf32>, vector<32x896xf32> -> vector<32x896xf32>
    %c0_136 = arith.constant 0 : index
    %c0_137 = arith.constant 0 : index
    %197 = vector.load %arg5[%c0_136, %c0_137] : memref<32x1xf32, #tpu.memory_space<vmem>>, vector<32x1xf32>
    %198 = vector.broadcast %197 : vector<32x1xf32> to vector<32x896xf32>
    %199 = arith.addf %196, %198 : vector<32x896xf32>
    %cst_138 = arith.constant 0.000000e+00 : f32
    %200 = vector.broadcast %cst_138 : f32 to vector<32x896xf32>
    %201 = arith.maximumf %199, %200 : vector<32x896xf32>
    %c0_139 = arith.constant 0 : index
    %c0_140 = arith.constant 0 : index
    %202 = vector.load %arg6[%c0_139, %c0_140] : memref<1x32xf32, #tpu.memory_space<vmem>>, vector<1x32xf32>
    %cst_141 = arith.constant dense<0.000000e+00> : vector<1x896xf32>
    %203 = tpu.matmul %202, %201, %cst_141 {dimension_numbers = #tpu.dot_dimension_numbers<[1], [0], [0], [1], [0, 0, 1, 1], [], []>} : vector<1x32xf32>, vector<32x896xf32>, vector<1x896xf32> -> vector<1x896xf32>
    %c0_142 = arith.constant 0 : index
    %c0_143 = arith.constant 0 : index
    %204 = memref.load %arg7[%c0_142, %c0_143] : memref<1x1xf32, #tpu.memory_space<smem>>
    %205 = vector.broadcast %204 : f32 to vector<1x896xf32>
    %206 = arith.addf %203, %205 : vector<1x896xf32>
    %207 = arith.negf %206 : vector<1x896xf32>
    %208 = math.exp %207 : vector<1x896xf32>
    %cst_144 = arith.constant 1.000000e+00 : f32
    %209 = vector.broadcast %cst_144 : f32 to vector<1x896xf32>
    %210 = arith.addf %209, %208 : vector<1x896xf32>
    %211 = arith.divf %209, %210 : vector<1x896xf32>
    %c0_145 = arith.constant 0 : index
    %c0_146 = arith.constant 0 : index
    %c0_147 = arith.constant 0 : index
    %212 = vector.load %arg8[%c0_145, %c0_146, %c0_147] : memref<1x1x896xf32, #tpu.memory_space<vmem>>, vector<1x1x896xf32>
    %213 = vector.shape_cast %212 : vector<1x1x896xf32> to vector<1x896xf32>
    %214 = vector.shape_cast %211 : vector<1x896xf32> to vector<1x1x896xf32>
    tpu.vector_store %arg8[%c0_145, %c0_146, %c0_147], %214 {strides = array<i32>} : memref<1x1x896xf32, #tpu.memory_space<vmem>>, vector<1x1x896xf32>,
    return
  }
  func.func @transform_0(%arg0: i32) -> (i32, i32, i32) {
    %c0_i32 = arith.constant 0 : i32
    %c0_i32_0 = arith.constant 0 : i32
    %c0_i32_1 = arith.constant 0 : i32
    return %arg0, %c0_i32, %c0_i32_0 : i32, i32, i32
  }
  func.func @transform_1(%arg0: i32) -> (i32, i32) {
    %c0_i32 = arith.constant 0 : i32
    %c0_i32_0 = arith.constant 0 : i32
    %c0_i32_1 = arith.constant 0 : i32
    return %c0_i32, %c0_i32_0 : i32, i32
  }
  func.func @transform_2(%arg0: i32) -> (i32, i32, i32) {
    %c0_i32 = arith.constant 0 : i32
    %c0_i32_0 = arith.constant 0 : i32
    %c0_i32_1 = arith.constant 0 : i32
    return %arg0, %c0_i32, %c0_i32_0 : i32, i32, i32
  }
  func.func @transform_3(%arg0: i32) -> (i32, i32) {
    %c0_i32 = arith.constant 0 : i32
    %c0_i32_0 = arith.constant 0 : i32
    %c0_i32_1 = arith.constant 0 : i32
    return %c0_i32, %c0_i32_0 : i32, i32
  }
  func.func @transform_4(%arg0: i32) -> (i32, i32) {
    %c0_i32 = arith.constant 0 : i32
    %c0_i32_0 = arith.constant 0 : i32
    %c0_i32_1 = arith.constant 0 : i32
    return %c0_i32, %c0_i32_0 : i32, i32
  }
  func.func @transform_5(%arg0: i32) -> (i32, i32) {
    %c0_i32 = arith.constant 0 : i32
    %c0_i32_0 = arith.constant 0 : i32
    %c0_i32_1 = arith.constant 0 : i32
    return %c0_i32, %c0_i32_0 : i32, i32
  }
  func.func @transform_6(%arg0: i32) -> (i32, i32) {
    %c0_i32 = arith.constant 0 : i32
    %c0_i32_0 = arith.constant 0 : i32
    %c0_i32_1 = arith.constant 0 : i32
    return %c0_i32, %c0_i32_0 : i32, i32
  }
  func.func @transform_7(%arg0: i32) -> (i32, i32, i32) {
    %c0_i32 = arith.constant 0 : i32
    %c0_i32_0 = arith.constant 0 : i32
    %c0_i32_1 = arith.constant 0 : i32
    return %arg0, %c0_i32, %c0_i32_0 : i32, i32, i32
  }
}

</mosaic_0001>

<bundles_post_ra>
// kernel: _lambda_.1
= control target key start
LH: loop header
LB: loop body
LE: loop exit
PB: predicated region body
PF: predicated region fallthrough
CT: control target
= control target key end

     0   :  { %s6671_s26 = smov 0   ;;  %s9662_s0 = inlined_call_operand.vmem [shape: f32[2,1,896], index: 0, kind: input, shape index: {}]   ;;  %s9663_s1 = inlined_call_operand.vmem [shape: f32[32,24], index: 1, kind: input, shape index: {}]   ;;  %s9664_s2 = inlined_call_operand.vmem [shape: f32[2,32,1], index: 2, kind: input, shape index: {}]   ;;  %s9665_s3 = inlined_call_operand.vmem [shape: f32[32,160], index: 3, kind: input, shape index: {}]   ;;  %s9666_s4 = inlined_call_operand.vmem [shape: f32[32,1], index: 4, kind: input, shape index: {}]   ;;  %s9667_s5 = inlined_call_operand.vmem [shape: f32[1,32], index: 5, kind: input, shape index: {}]   ;;  %s9668_s6 = inlined_call_operand.<no memory space> [shape: f32[1,1], index: 6, kind: input, shape index: {}]   ;;  %s9669_s7 = inlined_call_operand.vmem [shape: f32[2,1,896], index: 7, kind: output, shape index: {}]  }
   0x1   :  { %12 = sst [smem:[#allocation6]] %s9668_s6 }
   0x2 LB: > { %s5778_s27 = sadd.s32 4294967295, %s6597_s26   ;;  %p5782_p0 = scmp.ge.s32.totalorder %s6597_s26, 1  ;;  %s6597_s26 = sphi %s6671_s26, %s18_s26  }
   0x3   : > { %p247_p1 = scmp.lt.s32.totalorder %s6597_s26, 3 }
   0x5   : > { %p248_p2 = pnand %p5782_p0, %p247_p1 }
   0x7   : > { %251 = sbr.rel (%p248_p2) target bundleno = 1463 (0x5b7), region = 48 }
   0xe   : > { %p282_p3 = scmp.lt.s32.totalorder %s5778_s27, 1  ;;  %v295_v0 = vlaneseq  ;;  %v9670_v1 = vmov 0.0   ;;  %v9680_v2 = vmov 0   ;;  %v9767_v3 = vmov 0  ;;  %s6601_s8 = smov 87  }
   0xf   : > { %3396 = vmatprep.mubr.f32.mxu0 %v9670_v1  ;;  %3485 = vmatprep.mubr.f32.mxu1 %v9670_v1  ;;  %s6602_s9 = smov 86   ;;  %s6603_s10 = smov 85  }
  0x10   : > { %s10056_s27 = smov (!%p282_p3, %s5778_s27), 1  ;;  %vm438_vm0 = vcmp.lt.s32.totalorder %v295_v0, 128  ;;  %6240 = vset.pattern.permute.xlu1 %v9680_v2  ;;  %6241 = vset.pattern.permute.xlu0 %v9680_v2  ;;  %vm6689_vm1 = vcmp.lt.s32.totalorder %v295_v0, 896  ;;  %v6701_v5 = vshrl.u32 %v295_v0, 7  ;;  %s6604_s11 = smov 83   ;;  %v7030_v63 = vand.u32 127, %v295_v0 }
  0x11   : > { %440 = vst.msk [vmem:[#allocation2] sm:$0x1] %vm438_vm0, %v9670_v1  ;;  %s6188_s6 = smul.u32 7, %s10056_s27  ;;  %v9768_v3 = vsel %vm6689_vm1, 4294967295, %v9767_v3  ;;  %s6605_s12 = smov 82  }
  0x12   : > { %9769 = vst [vmem:[#allocation7_spill] sm:$0xff] %v9768_v3  ;;  %v9678_v6 = vsub.s32 0, %v6701_v5  ;;  %v9676_v7 = vsub.s32 2, %v6701_v5  ;;  %v9679_v8 = vsub.s32 1, %v6701_v5  ;;  %v9677_v9 = vsub.s32 3, %v6701_v5  ;;  %s6606_s13 = smov 81  }
  0x13   : > { %s285_s30 = scalar_lea.vmem %s9662_s0, %s6188_s6  ;;  %v9674_v13 = vsub.s32 4, %v6701_v5  ;;  %v9675_v14 = vsub.s32 5, %v6701_v5  ;;  %v9673_v17 = vsub.s32 6, %v6701_v5  ;;  %s6607_s14 = smov 59   ;;  %v9672_v59 = vsub.s32 7, %v6701_v5 }
  0x14   : > { %v441_v4 = vld [vmem:[%s285_s30] sm:$0xff]  ;;  %s6608_s15 = smov 58   ;;  %s6609_s16 = smov 57  }
  0x15   : > { %444 = vst.msk [vmem:[#allocation2 + $0x1] sm:$0x7f] %vm6689_vm1, %v441_v4  ;;  %s6610_s17 = smov 55   ;;  %s6611_s18 = smov 54  }
  0x16   : > { %s6612_s19 = smov 53   ;;  %s6613_s20 = smov 31  }
  0x17   : > { %s6614_s21 = smov 30   ;;  %s6615_s22 = smov 29  }
  0x18   : > { %s6617_s23 = smov 27   ;;  %s6618_s24 = smov 26  }
  0x19   : > { %s6619_s25 = smov 25   ;;  %s6620_s28 = smov 3  }
  0x1a   : > { %s6621_s29 = smov 2   ;;  %s6622_s30 = smov 1  }
  0x1c   : > { %v6707_v10 = vld [vmem:[#allocation2] sm:$0xff] }
  0x1d   : > { %v6712_v11 = vrot.slane %v6707_v10, %v9676_v7  ;;  %v6717_v12 = vrot.slane %v6707_v10, %v9678_v6  ;;  %v6728_v15 = vrot.slane %v6707_v10, %v9677_v9  ;;  %v6733_v16 = vrot.slane %v6707_v10, %v9679_v8 }
  0x1e   : > { %v6743_v18 = vrot.slane %v6707_v10, %v9675_v14  ;;  %v6748_v19 = vrot.slane %v6707_v10, %v9674_v13  ;;  %v6757_v20 = vrot.slane %v6707_v10, %v9673_v17  ;;  %v7027_v62 = vrot.slane %v6707_v10, %v9672_v59 }
  0x1f   : > { %490 = vrot.lane.b32.xlu1 %v6712_v11, %s6601_s8  ;;  %486 = vrot.lane.b32.xlu0 %v6717_v12, %s6601_s8  ;;  %v7078_v6 = vadd.s32 512, %v7030_v63  ;;  %v7081_v8 = vadd.s32 640, %v7030_v63 }
  0x23   : > { %492 = vrot.lane.b32.xlu1 %v6728_v15, %s6601_s8  ;;  %488 = vrot.lane.b32.xlu0 %v6733_v16, %s6601_s8 }
  0x27   : > { %496 = vrot.lane.b32.xlu1 %v6743_v18, %s6601_s8  ;;  %494 = vrot.lane.b32.xlu0 %v6748_v19, %s6601_s8 }
  0x2b   : > { %623 = vrot.lane.b32.xlu1 %v6717_v12, %s6602_s9  ;;  %498 = vrot.lane.b32.xlu0 %v6757_v20, %s6601_s8 }
  0x2f   : > { %627 = vrot.lane.b32.xlu1 %v6712_v11, %s6602_s9  ;;  %625 = vrot.lane.b32.xlu0 %v6733_v16, %s6602_s9 }
  0x33   : > { %631 = vrot.lane.b32.xlu1 %v6748_v19, %s6602_s9  ;;  %629 = vrot.lane.b32.xlu0 %v6728_v15, %s6602_s9 }
  0x37   : > { %635 = vrot.lane.b32.xlu1 %v6757_v20, %s6602_s9  ;;  %633 = vrot.lane.b32.xlu0 %v6743_v18, %s6602_s9 }
  0x3b   : > { %763 = vrot.lane.b32.xlu1 %v6733_v16, %s6603_s10  ;;  %761 = vrot.lane.b32.xlu0 %v6717_v12, %s6603_s10 }
  0x3f   : > { %767 = vrot.lane.b32.xlu1 %v6728_v15, %s6603_s10  ;;  %765 = vrot.lane.b32.xlu0 %v6712_v11, %s6603_s10 }
  0x43   : > { %771 = vrot.lane.b32.xlu1 %v6743_v18, %s6603_s10  ;;  %769 = vrot.lane.b32.xlu0 %v6748_v19, %s6603_s10 }
  0x47   : > { %910 = vrot.lane.b32.xlu1 %v6717_v12, %s6604_s11  ;;  %773 = vrot.lane.b32.xlu0 %v6757_v20, %s6603_s10 }
  0x4b   : > { %914 = vrot.lane.b32.xlu1 %v6712_v11, %s6604_s11  ;;  %912 = vrot.lane.b32.xlu0 %v6733_v16, %s6604_s11 }
  0x4f   : > { %918 = vrot.lane.b32.xlu1 %v6748_v19, %s6604_s11  ;;  %916 = vrot.lane.b32.xlu0 %v6728_v15, %s6604_s11 }
  0x53   : > { %922 = vrot.lane.b32.xlu1 %v6757_v20, %s6604_s11  ;;  %920 = vrot.lane.b32.xlu0 %v6743_v18, %s6604_s11 }
  0x57   : > { %1050 = vrot.lane.b32.xlu1 %v6733_v16, %s6605_s12  ;;  %1048 = vrot.lane.b32.xlu0 %v6717_v12, %s6605_s12 }
  0x5b   : > { %1054 = vrot.lane.b32.xlu1 %v6728_v15, %s6605_s12  ;;  %1052 = vrot.lane.b32.xlu0 %v6712_v11, %s6605_s12 }
  0x5f   : > { %1058 = vrot.lane.b32.xlu1 %v6743_v18, %s6605_s12  ;;  %1056 = vrot.lane.b32.xlu0 %v6748_v19, %s6605_s12 }
  0x63   : > { %1186 = vrot.lane.b32.xlu1 %v6717_v12, %s6606_s13  ;;  %1060 = vrot.lane.b32.xlu0 %v6757_v20, %s6605_s12 }
  0x67   : > { %1190 = vrot.lane.b32.xlu1 %v6712_v11, %s6606_s13  ;;  %1188 = vrot.lane.b32.xlu0 %v6733_v16, %s6606_s13 }
  0x6b   : > { %1194 = vrot.lane.b32.xlu1 %v6748_v19, %s6606_s13  ;;  %1192 = vrot.lane.b32.xlu0 %v6728_v15, %s6606_s13 }
  0x6f   : > { %1198 = vrot.lane.b32.xlu1 %v6757_v20, %s6606_s13  ;;  %1196 = vrot.lane.b32.xlu0 %v6743_v18, %s6606_s13 }
  0x73   : > { %1319 = vrot.lane.b32.xlu1 %v6733_v16, %s6607_s14  ;;  %1317 = vrot.lane.b32.xlu0 %v6717_v12, %s6607_s14 }
  0x77   : > { %1323 = vrot.lane.b32.xlu1 %v6728_v15, %s6607_s14  ;;  %1321 = vrot.lane.b32.xlu0 %v6712_v11, %s6607_s14 }
  0x7b   : > { %1327 = vrot.lane.b32.xlu1 %v6743_v18, %s6607_s14  ;;  %1325 = vrot.lane.b32.xlu0 %v6748_v19, %s6607_s14 }
  0x7f   : > { %1448 = vrot.lane.b32.xlu1 %v6717_v12, %s6608_s15  ;;  %1329 = vrot.lane.b32.xlu0 %v6757_v20, %s6607_s14 }
  0x83   : > { %1452 = vrot.lane.b32.xlu1 %v6712_v11, %s6608_s15  ;;  %1450 = vrot.lane.b32.xlu0 %v6733_v16, %s6608_s15 }
  0x87   : > { %1456 = vrot.lane.b32.xlu1 %v6748_v19, %s6608_s15  ;;  %1454 = vrot.lane.b32.xlu0 %v6728_v15, %s6608_s15 }
  0x8b   : > { %1460 = vrot.lane.b32.xlu1 %v6757_v20, %s6608_s15  ;;  %1458 = vrot.lane.b32.xlu0 %v6743_v18, %s6608_s15 }
  0x8f   : > { %1581 = vrot.lane.b32.xlu1 %v6733_v16, %s6609_s16  ;;  %1579 = vrot.lane.b32.xlu0 %v6717_v12, %s6609_s16 }
  0x91   : > { %v6863_v21 = vpop.permute.xlu1 %490  ;;  %v6865_v22 = vpop.permute.xlu0 %486 }
  0x93   : > { %1585 = vrot.lane.b32.xlu1 %v6728_v15, %s6609_s16  ;;  %1583 = vrot.lane.b32.xlu0 %v6712_v11, %s6609_s16 }
  0x95   : > { %v6871_v23 = vpop.permute.xlu1 %492  ;;  %v6873_v24 = vpop.permute.xlu0 %488 }
  0x97   : > { %1589 = vrot.lane.b32.xlu1 %v6743_v18, %s6609_s16  ;;  %1587 = vrot.lane.b32.xlu0 %v6748_v19, %s6609_s16 }
  0x99   : > { %v6879_v25 = vpop.permute.xlu1 %496  ;;  %v6881_v26 = vpop.permute.xlu0 %494 }
  0x9b   : > { %1721 = vrot.lane.b32.xlu1 %v6717_v12, %s6610_s17  ;;  %1591 = vrot.lane.b32.xlu0 %v6757_v20, %s6609_s16 }
  0x9d   : > { %v6887_v27 = vpop.permute.xlu1 %623  ;;  %v6889_v28 = vpop.permute.xlu0 %498 }
  0x9e   : > { %9770 = vst [vmem:[#allocation8_spill] sm:$0xff] %v6889_v28 }
  0x9f   : > { %1725 = vrot.lane.b32.xlu1 %v6712_v11, %s6610_s17  ;;  %1723 = vrot.lane.b32.xlu0 %v6733_v16, %s6610_s17 }
  0xa1   : > { %v6895_v29 = vpop.permute.xlu1 %627  ;;  %v6897_v30 = vpop.permute.xlu0 %625 }
  0xa3   : > { %1729 = vrot.lane.b32.xlu1 %v6748_v19, %s6610_s17  ;;  %1727 = vrot.lane.b32.xlu0 %v6728_v15, %s6610_s17 }
  0xa5   : > { %v6903_v31 = vpop.permute.xlu1 %631  ;;  %v6905_v32 = vpop.permute.xlu0 %629 }
  0xa7   : > { %1733 = vrot.lane.b32.xlu1 %v6757_v20, %s6610_s17  ;;  %1731 = vrot.lane.b32.xlu0 %v6743_v18, %s6610_s17 }
  0xa9   : > { %v6911_v33 = vpop.permute.xlu1 %635  ;;  %v6913_v34 = vpop.permute.xlu0 %633 }
  0xaa   : > { %9771 = vst [vmem:[#allocation9_spill] sm:$0xff] %v6911_v33 }
  0xab   : > { %1854 = vrot.lane.b32.xlu1 %v6733_v16, %s6611_s18  ;;  %1852 = vrot.lane.b32.xlu0 %v6717_v12, %s6611_s18 }
  0xad   : > { %v6919_v35 = vpop.permute.xlu1 %763  ;;  %v6921_v36 = vpop.permute.xlu0 %761 }
  0xaf   : > { %1858 = vrot.lane.b32.xlu1 %v6728_v15, %s6611_s18  ;;  %1856 = vrot.lane.b32.xlu0 %v6712_v11, %s6611_s18 }
  0xb1   : > { %v6927_v37 = vpop.permute.xlu1 %767  ;;  %v6929_v38 = vpop.permute.xlu0 %765 }
  0xb3   : > { %1862 = vrot.lane.b32.xlu1 %v6743_v18, %s6611_s18  ;;  %1860 = vrot.lane.b32.xlu0 %v6748_v19, %s6611_s18 }
  0xb5   : > { %v6935_v39 = vpop.permute.xlu1 %771  ;;  %v6937_v40 = vpop.permute.xlu0 %769 }
  0xb7   : > { %1983 = vrot.lane.b32.xlu1 %v6717_v12, %s6612_s19  ;;  %1864 = vrot.lane.b32.xlu0 %v6757_v20, %s6611_s18 }
  0xb9   : > { %v6943_v41 = vpop.permute.xlu1 %910  ;;  %v6945_v42 = vpop.permute.xlu0 %773 }
  0xba   : > { %9772 = vst [vmem:[#allocation10_spill] sm:$0xff] %v6945_v42 }
  0xbb   : > { %1987 = vrot.lane.b32.xlu1 %v6712_v11, %s6612_s19  ;;  %1985 = vrot.lane.b32.xlu0 %v6733_v16, %s6612_s19 }
  0xbd   : > { %v6951_v43 = vpop.permute.xlu1 %914  ;;  %v6953_v44 = vpop.permute.xlu0 %912 }
  0xbf   : > { %1991 = vrot.lane.b32.xlu1 %v6748_v19, %s6612_s19  ;;  %1989 = vrot.lane.b32.xlu0 %v6728_v15, %s6612_s19 }
  0xc1   : > { %v6959_v45 = vpop.permute.xlu1 %918  ;;  %v6961_v46 = vpop.permute.xlu0 %916 }
  0xc3   : > { %1995 = vrot.lane.b32.xlu1 %v6757_v20, %s6612_s19  ;;  %1993 = vrot.lane.b32.xlu0 %v6743_v18, %s6612_s19 }
  0xc5   : > { %v6967_v47 = vpop.permute.xlu1 %922  ;;  %v6969_v48 = vpop.permute.xlu0 %920 }
  0xc6   : > { %9773 = vst [vmem:[#allocation11_spill] sm:$0xff] %v6967_v47 }
  0xc7   : > { %2116 = vrot.lane.b32.xlu1 %v6733_v16, %s6613_s20  ;;  %2114 = vrot.lane.b32.xlu0 %v6717_v12, %s6613_s20 }
  0xc9   : > { %v6975_v49 = vpop.permute.xlu1 %1050  ;;  %v6977_v50 = vpop.permute.xlu0 %1048 }
  0xcb   : > { %2120 = vrot.lane.b32.xlu1 %v6728_v15, %s6613_s20  ;;  %2118 = vrot.lane.b32.xlu0 %v6712_v11, %s6613_s20 }
  0xcd   : > { %v6983_v51 = vpop.permute.xlu1 %1054  ;;  %v6985_v52 = vpop.permute.xlu0 %1052 }
  0xcf   : > { %2124 = vrot.lane.b32.xlu1 %v6743_v18, %s6613_s20  ;;  %2122 = vrot.lane.b32.xlu0 %v6748_v19, %s6613_s20 }
  0xd1   : > { %v6991_v53 = vpop.permute.xlu1 %1058  ;;  %v6993_v54 = vpop.permute.xlu0 %1056 }
  0xd2   : > { %9774 = vst [vmem:[#allocation12_spill] sm:$0xff] %v6991_v53 }
  0xd3   : > { %2245 = vrot.lane.b32.xlu1 %v6717_v12, %s6614_s21  ;;  %2126 = vrot.lane.b32.xlu0 %v6757_v20, %s6613_s20  ;;  %v7041_v12 = vadd.s32 384, %v7030_v63 }
  0xd5   : > { %v6999_v55 = vpop.permute.xlu1 %1186  ;;  %v7001_v56 = vpop.permute.xlu0 %1060 }
  0xd6   : > { %9775 = vst [vmem:[#allocation13_spill] sm:$0xff] %v6999_v55  ;;  %9776 = vst [vmem:[#allocation14_spill] sm:$0xff] %v7001_v56 }
  0xd7   : > { %2249 = vrot.lane.b32.xlu1 %v6712_v11, %s6614_s21  ;;  %2247 = vrot.lane.b32.xlu0 %v6733_v16, %s6614_s21  ;;  %v7051_v16 = vadd.s32 128, %v7030_v63 }
  0xd9   : > { %v7007_v57 = vpop.permute.xlu1 %1190  ;;  %v7009_v58 = vpop.permute.xlu0 %1188  ;;  %v7074_v7 = vmul.u32.u64.low 2454267026, %v7051_v16  ;;  %v7075_v9 = vmul.u32.u64.high 2454267026, %v7051_v16, %v7074_v7 }
  0xda   : > { %9777 = vst [vmem:[#allocation15_spill] sm:$0xff] %v7007_v57  ;;  %9778 = vst [vmem:[#allocation16_spill] sm:$0xff] %v7009_v58 }
  0xdb   : > { %2253 = vrot.lane.b32.xlu1 %v6748_v19, %s6614_s21  ;;  %2251 = vrot.lane.b32.xlu0 %v6728_v15, %s6614_s21  ;;  %v7044_v15 = vadd.s32 256, %v7030_v63  ;;  %vm323_vm5 = vc.u32 %v7074_v7, 2454267026 }
  0xdd   : > { %v7016_v60 = vpop.permute.xlu1 %1194  ;;  %v7018_v61 = vpop.permute.xlu0 %1192  ;;  %v7066_v59 = vmul.u32.u64.low 2454267026, %v7044_v15  ;;  %v7067_v17 = vmul.u32.u64.high 2454267026, %v7044_v15, %v7066_v59 }
  0xde   : > { %9779 = vst [vmem:[#allocation17_spill] sm:$0xff] %v7016_v60  ;;  %9780 = vst [vmem:[#allocation18_spill] sm:$0xff] %v7018_v61 }
  0xdf   : > { %2257 = vrot.lane.b32.xlu1 %v6757_v20, %s6614_s21  ;;  %2255 = vrot.lane.b32.xlu0 %v6743_v18, %s6614_s21  ;;  %v7054_v18 = vmul.u32.u64.low 2454267026, %v7030_v63  ;;  %v7055_v19 = vmul.u32.u64.high 2454267026, %v7030_v63, %v7054_v18  ;;  %v7062_v20 = vmul.u32.u64.low 2454267026, %v7041_v12  ;;  %v7063_v1 = vmul.u32.u64.high 2454267026, %v7041_v12, %v7062_v20 }
  0xe0   : > { %vm337_vm4 = vc.u32 %v7066_v59, 2454267026 }
  0xe1   : > { %v7032_v4 = vpop.permute.xlu1 %1198  ;;  %v7034_v11 = vpop.permute.xlu0 %1196  ;;  %vm309_vm2 = vc.u32 %v7054_v18, 2454267026  ;;  %vm351_vm3 = vc.u32 %v7062_v20, 2454267026 }
  0xe2   : > { %9781 = vst [vmem:[#allocation19_spill] sm:$0xff] %v7032_v4  ;;  %9782 = vst [vmem:[#allocation20_spill] sm:$0xff] %v7034_v11  ;;  %v9789_v4 = vmov 0  }
  0xe3   : > { %637 = vrot.lane.b32.xlu1 %v7027_v62, %s6602_s9  ;;  %500 = vrot.lane.b32.xlu0 %v7027_v62, %s6601_s8  ;;  %v310_v11 = vsel %vm309_vm2, 1, %v9789_v4  ;;  %v338_v59 = vsel %vm337_vm4, 1, %v9789_v4  ;;  %v324_v20 = vsel %vm323_vm5, 1, %v9789_v4  ;;  %s6623_s8 = smov 56   ;;  %s6624_s9 = smov 84  }
  0xe4   : > { %v311_v7 = vadd.s32 %v7055_v19, %v310_v11  ;;  %v339_v58 = vadd.s32 %v7067_v17, %v338_v59  ;;  %v325_v11 = vadd.s32 %v7075_v9, %v324_v20 }
  0xe5   : > { %v7046_v10 = vpop.permute.xlu1 %1319  ;;  %v7048_v0 = vpop.permute.xlu0 %1317 }
  0xe6   : > { %9783 = vst [vmem:[#allocation21_spill] sm:$0xff] %v7046_v10  ;;  %9784 = vst [vmem:[#allocation22_spill] sm:$0xff] %v7048_v0  ;;  %v7093_v18 = vmul.u32.u64.low 2454267026, %v7078_v6  ;;  %v7094_v0 = vmul.u32.u64.high 2454267026, %v7078_v6, %v7093_v18  ;;  %v352_v10 = vsel %vm351_vm3, 1, %v9789_v4  ;;  %v312_v19 = vshrl.u32 %v311_v7, 4 }
  0xe7   : > { %924 = vrot.lane.b32.xlu1 %v7027_v62, %s6604_s11  ;;  %775 = vrot.lane.b32.xlu0 %v7027_v62, %s6603_s10  ;;  %v353_v55 = vadd.s32 %v7063_v1, %v352_v10  ;;  %v340_v17 = vshrl.u32 %v339_v58, 4  ;;  %s6625_s10 = smov 28   ;;  %s5830_s11 = sshll.u32 %s10056_s27, 5 }
  0xe8   : > { %vm365_vm6 = vc.u32 %v7093_v18, 2454267026  ;;  %v7130_v18 = vld [vmem:[#allocation2] sm:$0xff]  ;;  %v313_v59 = vmul.u32 28, %v312_v19 }
  0xe9   : > { %v7069_v13 = vpop.permute.xlu1 %1323  ;;  %v7071_v14 = vpop.permute.xlu0 %1321  ;;  %v366_v60 = vsel %vm365_vm6, 1, %v9789_v4  ;;  %v354_v1 = vshrl.u32 %v353_v55, 4  ;;  %v341_v58 = vmul.u32 28, %v340_v17 }
  0xea   : > { %9785 = vst [vmem:[#allocation23_spill] sm:$0xff] %v7069_v13  ;;  %9786 = vst [vmem:[#allocation24_spill] sm:$0xff] %v7071_v14  ;;  %v7098_v14 = vmul.u32.u64.low 2454267026, %v7081_v8  ;;  %v7099_v13 = vmul.u32.u64.high 2454267026, %v7081_v8, %v7098_v14  ;;  %v367_v9 = vadd.s32 %v7094_v0, %v366_v60  ;;  %v9797_v0 = vsub.s32 0, %v6701_v5 }
  0xeb   : > { %1200 = vrot.lane.b32.xlu1 %v7027_v62, %s6606_s13  ;;  %1062 = vrot.lane.b32.xlu0 %v7027_v62, %s6605_s12 }
  0xec   : > { %vm379_vm7 = vc.u32 %v7098_v14, 2454267026  ;;  %v326_v14 = vshrl.u32 %v325_v11, 4  ;;  %v9796_v11 = vsub.s32 1, %v6701_v5 }
  0xed   : > { %v7087_v2 = vpop.permute.xlu1 %1327  ;;  %v7089_v3 = vpop.permute.xlu0 %1325  ;;  %v380_v10 = vsel %vm379_vm7, 1, %v9789_v4 }
  0xee   : > { %9787 = vst [vmem:[#allocation25_spill] sm:$0xff] %v7087_v2  ;;  %9788 = vst [vmem:[#allocation26_spill] sm:$0xff] %v7089_v3  ;;  %v381_v7 = vadd.s32 %v7099_v13, %v380_v10  ;;  %v7144_v60 = vrot.slane %v7130_v18, %v9796_v11  ;;  %v7149_v13 = vrot.slane %v7130_v18, %v9797_v0  ;;  %v327_v19 = vmul.u32 28, %v326_v14 }
  0xef   : > { %1462 = vrot.lane.b32.xlu1 %v7027_v62, %s6608_s15  ;;  %1331 = vrot.lane.b32.xlu0 %v7027_v62, %s6607_s14  ;;  %v368_v10 = vshrl.u32 %v367_v9, 4  ;;  %v9800_v14 = vsub.s32 3, %v6701_v5  ;;  %s290_s14 = scalar_lea.vmem %s9664_s2, %s5830_s11 }
  0xf0   : > { %v382_v17 = vshrl.u32 %v381_v7, 4 }
  0xf1   : > { %v7108_v2 = vpop.permute.xlu1 %1448  ;;  %v7110_v3 = vpop.permute.xlu0 %1329  ;;  %v7165_v9 = vrot.slane %v7130_v18, %v9800_v14 }
  0xf2   : > { %9790 = vst [vmem:[#allocation27_spill] sm:$0xff] %v7108_v2  ;;  %9791 = vst [vmem:[#allocation28_spill] sm:$0xff] %v7110_v3 }
  0xf3   : > { %1735 = vrot.lane.b32.xlu1 %v7027_v62, %s6610_s17  ;;  %1593 = vrot.lane.b32.xlu0 %v7027_v62, %s6609_s16 }
  0xf5   : > { %v7120_v2 = vpop.permute.xlu1 %1452  ;;  %v7122_v3 = vpop.permute.xlu0 %1450 }
  0xf6   : > { %9792 = vst [vmem:[#allocation29_spill] sm:$0xff] %v7120_v2  ;;  %9793 = vst [vmem:[#allocation30_spill] sm:$0xff] %v7122_v3  ;;  %v355_v3 = vmul.u32 28, %v354_v1  ;;  %v314_v1 = vsub.s32 %v7030_v63, %v313_v59  ;;  %v9801_v59 = vsub.s32 2, %v6701_v5 }
  0xf7   : > { %1997 = vrot.lane.b32.xlu1 %v7027_v62, %s6612_s19  ;;  %1866 = vrot.lane.b32.xlu0 %v7027_v62, %s6611_s18 }
  0xf8   : > { %v7170_v7 = vrot.slane %v7130_v18, %v9801_v59  ;;  %vm401_vm8 = vcmp.ne.s32.totalorder %v314_v1, 0  ;;  %vm408_vm9 = vcmp.lt.s32.totalorder %v314_v1, 0 }
  0xf9   : > { %v7133_v20 = vpop.permute.xlu1 %1456  ;;  %v7135_v55 = vpop.permute.xlu0 %1454  ;;  %vm7192_vm0 = vmand %vm408_vm9, %vm401_vm8  ;;  %vm9708_vm9 = vcmask 711680  }
  0xfa   : > { %9794 = vst [vmem:[#allocation31_spill] sm:$0xff] %v7133_v20  ;;  %9795 = vst [vmem:[#allocation32_spill] sm:$0xff] %v7135_v55  ;;  %v342_v55 = vsub.s32 %v7044_v15, %v341_v58  ;;  %v383_v15 = vmul.u32 28, %v382_v17 }
  0xfb   : > { %2259 = vrot.lane.b32.xlu1 %v7027_v62, %s6614_s21  ;;  %2128 = vrot.lane.b32.xlu0 %v7027_v62, %s6613_s20  ;;  %v356_v62 = vsub.s32 %v7041_v12, %v355_v3  ;;  %v328_v3 = vsub.s32 %v7051_v16, %v327_v19  ;;  %v369_v12 = vmul.u32 28, %v368_v10  ;;  %v9804_v16 = vsub.s32 5, %v6701_v5 }
  0xfc   : > { %vm403_vm12 = vcmp.ne.s32.totalorder %v342_v55, 0  ;;  %vm410_vm13 = vcmp.lt.s32.totalorder %v342_v55, 0  ;;  %v9805_v19 = vsub.s32 4, %v6701_v5 }
  0xfd   : > { %v7152_v20 = vpop.permute.xlu1 %1460  ;;  %v7154_v2 = vpop.permute.xlu0 %1458  ;;  %vm404_vm10 = vcmp.ne.s32.totalorder %v356_v62, 0  ;;  %vm411_vm11 = vcmp.lt.s32.totalorder %v356_v62, 0  ;;  %v7184_v0 = vrot.slane %v7130_v18, %v9804_v16  ;;  %vm402_vm14 = vcmp.ne.s32.totalorder %v328_v3, 0  ;;  %vm417_vm3 = vmand %vm410_vm13, %vm403_vm12 }
  0xfe   : > { %9798 = vst [vmem:[#allocation33_spill] sm:$0xff] %v7152_v20  ;;  %9799 = vst [vmem:[#allocation34_spill] sm:$0xff] %v7154_v2  ;;  %v7189_v10 = vrot.slane %v7130_v18, %v9805_v19  ;;  %vm409_vm15 = vcmp.lt.s32.totalorder %v328_v3, 0  ;;  %v370_v14 = vsub.s32 %v7078_v6, %v369_v12  ;;  %v425_v59 = vadd.s32 28, %v356_v62 }
  0xff   : > { %2378 = vrot.lane.b32.xlu1 %v7144_v60, %s6615_s22  ;;  %2376 = vrot.lane.b32.xlu0 %v7149_v13, %s6615_s22  ;;  %v424_v20 = vadd.s32 28, %v342_v55  ;;  %v422_v2 = vadd.s32 28, %v314_v1  ;;  %vm418_vm2 = vmand %vm411_vm11, %vm404_vm10  ;;  %v384_v16 = vsub.s32 %v7081_v8, %v383_v15  ;;  %v9812_v6 = vsub.s32 6, %v6701_v5 }
 0x100   : > { %vm7205_vm4 = vmand %vm409_vm15, %vm402_vm14  ;;  %v6616_v12 = vmov 1966171168   ;;  %vm405_vm5 = vcmp.ne.s32.totalorder %v370_v14, 0  ;;  %vm412_vm6 = vcmp.lt.s32.totalorder %v370_v14, 0 }
 0x101   : > { %v7173_v58 = vpop.permute.xlu1 %1581  ;;  %v7175_v11 = vpop.permute.xlu0 %1579  ;;  %v7216_v8 = vrot.slane %v7130_v18, %v9812_v6  ;;  %v535_v15 = vunpack.c.l.s4 %v6616_v12  ;;  %v7224_v61 = vsel %vm7192_vm0, %v422_v2, %v314_v1  ;;  %vm406_vm7 = vcmp.ne.s32.totalorder %v384_v16, 0  ;;  %vm7234_vm10 = vmand %vm412_vm6, %vm405_vm5 }
 0x102   : > { %9802 = vst [vmem:[#allocation35_spill] sm:$0xff] %v7173_v58  ;;  %9803 = vst [vmem:[#allocation36_spill] sm:$0xff] %v7175_v11  ;;  %v423_v58 = vadd.s32 28, %v328_v3  ;;  %vm413_vm8 = vcmp.lt.s32.totalorder %v384_v16, 0  ;;  %v506_v2 = vsel %vm9708_vm9, %v6871_v23, %v6881_v26  ;;  %vm9712_vm13 = vcmp.ge.s32.totalorder %v7224_v61, 3 }
 0x103   : > { %2382 = vrot.lane.b32.xlu1 %v7165_v9, %s6615_s22  ;;  %2380 = vrot.lane.b32.xlu0 %v7170_v7, %s6615_s22  ;;  %v536_v57 = vunpack.c.0.s8 %v535_v15  ;;  %vm420_vm14 = vmand %vm413_vm8, %vm406_vm7  ;;  %v505_v1 = vsel %vm9708_vm9, %v6863_v21, %v6871_v23  ;;  %vm9720_vm0 = vcmask 703488  }
 0x104   : > { %v7232_v6 = vsel %vm7205_vm4, %v423_v58, %v328_v3  ;;  %v503_v3 = vsel %vm9708_vm9, %v6865_v22, %v6873_v24  ;;  %v504_v58 = vsel %vm9708_vm9, %v6873_v24, %v6863_v21 }
 0x105   : > { %v7199_v11 = vpop.permute.xlu1 %1585  ;;  %v7201_v19 = vpop.permute.xlu0 %1583  ;;  %vm9718_vm15 = vcmp.ge.s32.totalorder %v7232_v6, 3  ;;  %v517_v22 = vsel %vm9712_vm13, %v503_v3, 0.0 }
 0x106   : > { %9808 = vst [vmem:[#allocation37_spill] sm:$0xff] %v7199_v11  ;;  %9809 = vst [vmem:[#allocation38_spill] sm:$0xff] %v7201_v19  ;;  %v7218_v19 = vsel %vm418_vm2, %v425_v59, %v356_v62  ;;  %v7220_v11 = vsel %vm417_vm3, %v424_v20, %v342_v55  ;;  %v426_v20 = vadd.s32 28, %v370_v14  ;;  %v427_v55 = vadd.s32 28, %v384_v16 }
 0x107   : > { %2386 = vrot.lane.b32.xlu1 %v7184_v0, %s6615_s22  ;;  %2384 = vrot.lane.b32.xlu0 %v7189_v10, %s6615_s22  ;;  %vm9719_vm11 = vcmp.ge.s32.totalorder %v7218_v19, 3  ;;  %vm9716_vm12 = vcmp.ge.s32.totalorder %v7220_v11, 3  ;;  %v518_v24 = vsel %vm9718_vm15, %v504_v58, 0.0  ;;  %vm9711_vm2 = vcmp.ge.s32.totalorder %v7224_v61, 2 }
 0x108   : > { %v520_v12 = vsel %vm9719_vm11, %v506_v2, 0.0  ;;  %v7268_v23 = vsel %vm7234_vm10, %v426_v20, %v370_v14  ;;  %v7270_v15 = vsel %vm420_vm14, %v427_v55, %v384_v16  ;;  %v519_v21 = vsel %vm9716_vm12, %v505_v1, 0.0 }
 0x109   : > { %v7226_v53 = vpop.permute.xlu1 %1589  ;;  %v7228_v56 = vpop.permute.xlu0 %1587  ;;  %v7283_v14 = vadd.s32 768, %v7030_v63  ;;  %v7286_v16 = vsub.s32 %v536_v57, %v6701_v5  ;;  %v532_v62 = vcombine.low %v519_v21, %v520_v12  ;;  %vm9710_vm3 = vcmp.ge.s32.totalorder %v7232_v6, 2 }
 0x10a   : > { %9813 = vst [vmem:[#allocation39_spill] sm:$0xff] %v7226_v53  ;;  %vm9715_vm4 = vcmp.ge.s32.totalorder %v7220_v11, 2  ;;  %vm9717_vm5 = vcmp.ge.s32.totalorder %v7218_v19, 2  ;;  %v531_v55 = vcombine.low %v517_v22, %v518_v24  ;;  %vm9714_vm6 = vcmp.ge.s32.totalorder %v7268_v23, 3 }
 0x10b   : > { %2518 = vrot.lane.b32.xlu1 %v7149_v13, %s6617_s23  ;;  %2388 = vrot.lane.b32.xlu0 %v7216_v8, %s6615_s22  ;;  %9816 = vst [vmem:[#allocation40_spill] sm:$0xff] %v7286_v16  ;;  %vm9709_vm7 = vcmp.ge.s32.totalorder %v7270_v15, 3  ;;  %v508_v63 = vsel %vm9708_vm9, %v6879_v25, %v6889_v28  ;;  %v640_v57 = vsel %vm9720_vm0, %v6887_v27, %v6897_v30  ;;  %vm9721_vm8 = vcmp.ge.s32.totalorder %v7268_v23, 2 }
 0x10c   : > { %v641_v1 = vsel %vm9720_vm0, %v6897_v30, %v6895_v29  ;;  %v7312_v3 = vmul.u32.u64.low 2454267026, %v7283_v14  ;;  %v7313_v58 = vmul.u32.u64.high 2454267026, %v7283_v14, %v7312_v3  ;;  %v507_v12 = vsel %vm9708_vm9, %v6881_v26, %v6879_v25 }
 0x10d   : > { %v7260_v17 = vpop.permute.xlu1 %1721  ;;  %v7262_v59 = vpop.permute.xlu0 %1591  ;;  %v547_v21 = vrot.slane %v532_v62, %v7286_v16  ;;  %v642_v22 = vsel %vm9720_vm0, %v6895_v29, %v6905_v32  ;;  %v643_v27 = vsel %vm9720_vm0, %v6905_v32, %v6903_v31  ;;  %v522_v28 = vsel %vm9709_vm7, %v508_v63, 0.0 }
 0x10e   : > { %vm9729_vm10 = vcmask 695296   ;;  %vm9726_vm14 = vcmp.ge.s32.totalorder %v7232_v6, 1  ;;  %v540_v25 = vrot.slane %v531_v55, %v7286_v16  ;;  %v654_v26 = vsel %vm9711_vm2, %v640_v57, 0.0 }
 0x10f   : > { %2522 = vrot.lane.b32.xlu1 %v7170_v7, %s6617_s23  ;;  %2520 = vrot.lane.b32.xlu0 %v7144_v60, %s6617_s23  ;;  %v655_v29 = vsel %vm9710_vm3, %v641_v1, 0.0  ;;  %vm9722_vm9 = vcmp.ge.s32.totalorder %v7220_v11, 1  ;;  %v521_v32 = vsel %vm9714_vm6, %v507_v12, 0.0  ;;  %v656_v62 = vsel %vm9715_vm4, %v642_v22, 0.0 }
 0x110   : > { %v657_v55 = vsel %vm9717_vm5, %v643_v27, 0.0  ;;  %vm9727_vm7 = vcmp.ge.s32.totalorder %v7224_v61, 1  ;;  %vm393_vm3 = vc.u32 %v7312_v3, 2454267026  ;;  %v562_v63 = vcombine.low %v540_v25, %v547_v21 }
 0x111   : > { %v7288_v20 = vpop.permute.xlu1 %1725  ;;  %v7290_v2 = vpop.permute.xlu0 %1723  ;;  %v533_v57 = vcombine.low %v521_v32, %v522_v28  ;;  %vm9725_vm2 = vcmp.ge.s32.totalorder %v7270_v15, 2  ;;  %vm9728_vm13 = vcmp.ge.s32.totalorder %v7218_v19, 1  ;;  %v668_v12 = vcombine.low %v654_v26, %v655_v29 }
 0x112   : > { %vm9731_vm12 = vcmask 678912   ;;  %v669_v22 = vcombine.low %v656_v62, %v657_v55  ;;  %v781_v21 = vsel %vm9729_vm10, %v6927_v37, %v6937_v40  ;;  %vm9724_vm5 = vcmp.lt.s32.totalorder %v7220_v11, 27 }
 0x113   : > { %2526 = vrot.lane.b32.xlu1 %v7189_v10, %s6617_s23  ;;  %2524 = vrot.lane.b32.xlu0 %v7165_v9, %s6617_s23  ;;  %v394_v28 = vsel %vm393_vm3, 1, %v9789_v4  ;;  %vm9723_vm15 = vcmp.lt.s32.totalorder %v7218_v19, 27  ;;  %vm9730_vm11 = vcmask 670720   ;;  %v7372_v27 = vrot.slane %v562_v63, %v7286_v16 }
 0x114   : > { %v7375_v25 = vrot.slane %v533_v57, %v7286_v16  ;;  %v644_v26 = vsel %vm9720_vm0, %v6903_v31, %v6913_v34  ;;  %v780_v4 = vsel %vm9729_vm10, %v6929_v38, %v6927_v37  ;;  %vm9750_vm3 = vcmp.ge.s32.totalorder %v7270_v15, 1 }
 0x115   : > { %v7325_v24 = vpop.permute.xlu1 %1729  ;;  %v7327_v30 = vpop.permute.xlu0 %1727  ;;  %9817 = vst [vmem:[#allocation41_spill] sm:$0xff] %v7372_v27  ;;  %v677_v32 = vrot.slane %v668_v12, %v7286_v16  ;;  %v779_v62 = vsel %vm9729_vm10, %v6919_v35, %v6929_v38  ;;  %vm9749_vm6 = vcmp.ge.s32.totalorder %v7268_v23, 1  ;;  %v795_v31 = vsel %vm9728_vm13, %v781_v21, 0.0  ;;  %v9832_v27 = vld [vmem:[#allocation13_spill] sm:$0xff] }
 0x116   : > { %9818 = vst [vmem:[#allocation42_spill] sm:$0xff] %v7375_v25  ;;  %v395_v37 = vadd.s32 %v7313_v58, %v394_v28  ;;  %v684_v55 = vrot.slane %v669_v22, %v7286_v16  ;;  %v929_v63 = vsel %vm9731_vm12, %v6951_v43, %v6961_v46  ;;  %v930_v57 = vsel %vm9731_vm12, %v6961_v46, %v6959_v45 }
 0x117   : > { %2530 = vrot.lane.b32.xlu1 %v7216_v8, %s6617_s23  ;;  %2528 = vrot.lane.b32.xlu0 %v7184_v0, %s6617_s23  ;;  %vm9733_vm4 = vcmp.lt.s32.totalorder %v7218_v19, 26  ;;  %v645_v38 = vsel %vm9720_vm0, %v6913_v34, %v6911_v33  ;;  %v7414_v58 = vsel %vm9721_vm8, %v644_v26, 0.0  ;;  %v778_v46 = vsel %vm9729_vm10, %v6921_v36, %v6919_v35 }
 0x118   : > { %v794_v12 = vsel %vm9722_vm9, %v780_v4, 0.0  ;;  %v793_v22 = vsel %vm9726_vm14, %v779_v62, 0.0  ;;  %v927_v28 = vsel %vm9731_vm12, %v6943_v41, %v6953_v44  ;;  %v928_v34 = vsel %vm9731_vm12, %v6953_v44, %v6951_v43 }
 0x119   : > { %v7352_v1 = vpop.permute.xlu1 %1733  ;;  %v7354_v53 = vpop.permute.xlu0 %1731  ;;  %v807_v21 = vcombine.low %v794_v12, %v795_v31  ;;  %vm9745_vm0 = vcmp.lt.s32.totalorder %v7268_v23, 27  ;;  %v943_v36 = vsel %vm9724_vm5, %v929_v63, 0.0  ;;  %v944_v4 = vsel %vm9723_vm15, %v930_v57, 0.0 }
 0x11a   : > { %vm9744_vm8 = vcmp.lt.s32.totalorder %v7270_v15, 27  ;;  %v1068_v41 = vsel %vm9730_vm11, %v6983_v51, %v6993_v54  ;;  %vm9732_vm9 = vcmp.lt.s32.totalorder %v7270_v15, 26  ;;  %v396_v43 = vshrl.u32 %v395_v37, 4 }
 0x11b   : > { %2651 = vrot.lane.b32.xlu1 %v7144_v60, %s6618_s24  ;;  %2649 = vrot.lane.b32.xlu0 %v7149_v13, %s6618_s24  ;;  %v699_v44 = vcombine.low %v677_v32, %v684_v55  ;;  %v7445_v62 = vsel %vm9725_vm2, %v645_v38, 0.0  ;;  %v792_v31 = vsel %vm9727_vm7, %v778_v46, 0.0  ;;  %v1066_v63 = vsel %vm9730_vm11, %v6975_v49, %v6985_v52 }
 0x11c   : > { %vm9734_vm15 = vcmp.lt.s32.totalorder %v7268_v23, 26  ;;  %vm9740_vm5 = vcmask 662528   ;;  %v806_v32 = vcombine.low %v792_v31, %v793_v22  ;;  %vm9819_vm2 = vcmp.lt.s32.totalorder %v7224_v61, 27 }
 0x11d   : > { %v7385_v3 = vpop.permute.xlu1 %1854  ;;  %v7387_v29 = vpop.permute.xlu0 %1852  ;;  %v941_v37 = vsel %vm9819_vm2, %v927_v28, 0.0  ;;  %vm9820_vm14 = vcmp.lt.s32.totalorder %v7232_v6, 27  ;;  %v1067_v57 = vsel %vm9730_vm11, %v6985_v52, %v6983_v51  ;;  %vm9746_vm7 = vcmp.lt.s32.totalorder %v7220_v11, 25 }
 0x11e   : > { %v942_v55 = vsel %vm9820_vm14, %v928_v34, 0.0  ;;  %v783_v38 = vsel %vm9729_vm10, %v6935_v39, %v6945_v42  ;;  %v956_v46 = vcombine.low %v943_v36, %v944_v4  ;;  %v1065_v12 = vsel %vm9730_vm11, %v6977_v50, %v6975_v49  ;;  %v9836_v42 = vld [vmem:[#allocation24_spill] sm:$0xff] }
 0x11f   : > { %2655 = vrot.lane.b32.xlu1 %v7165_v9, %s6618_s24  ;;  %2653 = vrot.lane.b32.xlu0 %v7170_v7, %s6618_s24  ;;  %v1082_v22 = vsel %vm9733_vm4, %v1068_v41, 0.0  ;;  %v782_v51 = vsel %vm9729_vm10, %v6937_v40, %v6935_v39  ;;  %v7482_v52 = vrot.slane %v807_v21, %v7286_v16  ;;  %vm9821_vm2 = vcmp.lt.s32.totalorder %v7232_v6, 26 }
 0x120   : > { %v1080_v36 = vsel %vm9821_vm2, %v1066_v63, 0.0  ;;  %vm9739_vm14 = vcmp.lt.s32.totalorder %v7224_v61, 25  ;;  %vm9738_vm13 = vcmp.lt.s32.totalorder %v7232_v6, 25  ;;  %v397_v49 = vmul.u32 28, %v396_v43 }
 0x121   : > { %v7430_v26 = vpop.permute.xlu1 %1858  ;;  %v7432_v35 = vpop.permute.xlu0 %1856  ;;  %v7489_v50 = vrot.slane %v699_v44, %v7286_v16  ;;  %v670_v4 = vcombine.low %v7414_v58, %v7445_v62  ;;  %v955_v41 = vcombine.low %v941_v37, %v942_v55  ;;  %vm9823_vm10 = vcmp.lt.s32.totalorder %v7220_v11, 26 }
 0x122   : > { %v1081_v39 = vsel %vm9823_vm10, %v1067_v57, 0.0  ;;  %v815_v40 = vrot.slane %v806_v32, %v7286_v16  ;;  %v797_v21 = vsel %vm9750_vm3, %v783_v38, 0.0  ;;  %vm9824_vm2 = vcmp.lt.s32.totalorder %v7224_v61, 26  ;;  %v9826_v38 = vld [vmem:[#allocation14_spill] sm:$0xff] }
 0x123   : > { %2659 = vrot.lane.b32.xlu1 %v7184_v0, %s6618_s24  ;;  %2657 = vrot.lane.b32.xlu0 %v7189_v10, %s6618_s24  ;;  %9822 = vst [vmem:[#allocation43_spill] sm:$0xff] %v7489_v50  ;;  %v1079_v43 = vsel %vm9824_vm2, %v1065_v12, 0.0  ;;  %v1094_v58 = vcombine.low %v1081_v39, %v1082_v22  ;;  %v796_v44 = vsel %vm9749_vm6, %v782_v51, 0.0  ;;  %v971_v62 = vrot.slane %v956_v46, %v7286_v16  ;;  %v9827_v12 = vld [vmem:[#allocation12_spill] sm:$0xff]  ;;  %v9830_v39 = vld [vmem:[#allocation17_spill] sm:$0xff] }
 0x124   : > { %v931_v31 = vsel %vm9731_vm12, %v6959_v45, %v6969_v48  ;;  %v1093_v63 = vcombine.low %v1079_v43, %v1080_v36  ;;  %v837_v55 = vcombine.low %v815_v40, %v7482_v52  ;;  %v932_v57 = vsel %vm9731_vm12, %v6969_v48, %v6967_v47  ;;  %v9837_v47 = vld [vmem:[#allocation21_spill] sm:$0xff] }
 0x125   : > { %v7474_v28 = vpop.permute.xlu1 %1862  ;;  %v7476_v34 = vpop.permute.xlu0 %1860  ;;  %v1070_v22 = vsel %vm9730_vm11, %v9827_v12, %v9826_v38  ;;  %v398_v46 = vsub.s32 %v7283_v14, %v397_v49  ;;  %v808_v51 = vcombine.low %v796_v44, %v797_v21  ;;  %v964_v45 = vrot.slane %v955_v41, %v7286_v16  ;;  %v9828_v14 = vld [vmem:[#allocation18_spill] sm:$0xff]  ;;  %v9829_v49 = vld [vmem:[#allocation15_spill] sm:$0xff]  ;;  %v9831_v38 = vld [vmem:[#allocation16_spill] sm:$0xff] }
 0x126   : > { %v1069_v36 = vsel %vm9730_vm11, %v6993_v54, %v9827_v12  ;;  %vm9742_vm10 = vcmask 482304   ;;  %v945_v48 = vsel %vm9745_vm0, %v931_v31, 0.0  ;;  %v1109_v52 = vrot.slane %v1094_v58, %v7286_v16 }
 0x127   : > { %2780 = vrot.lane.b32.xlu1 %v7149_v13, %s6619_s25  ;;  %2661 = vrot.lane.b32.xlu0 %v7216_v8, %s6618_s24  ;;  %v1205_v41 = vsel %vm9740_vm5, %v9829_v49, %v9828_v14  ;;  %v1206_v54 = vsel %vm9740_vm5, %v9828_v14, %v9830_v39  ;;  %v986_v40 = vcombine.low %v964_v45, %v971_v62  ;;  %v946_v21 = vsel %vm9744_vm8, %v932_v57, 0.0  ;;  %v9834_v45 = vld [vmem:[#allocation26_spill] sm:$0xff] }
 0x128   : > { %v1102_v43 = vrot.slane %v1093_v63, %v7286_v16  ;;  %v1084_v44 = vsel %vm9732_vm9, %v1070_v22, 0.0  ;;  %vm9743_vm2 = vcmask 474112   ;;  %v1083_v12 = vsel %vm9734_vm15, %v1069_v36, 0.0  ;;  %v9835_v36 = vld [vmem:[#allocation23_spill] sm:$0xff] }
 0x129   : > { %v7510_v37 = vpop.permute.xlu1 %1983  ;;  %v7512_v32 = vpop.permute.xlu0 %1864  ;;  %v1203_v62 = vsel %vm9740_vm5, %v9832_v27, %v9831_v38  ;;  %v1204_v57 = vsel %vm9740_vm5, %v9831_v38, %v9829_v49  ;;  %vm9748_vm11 = vcmp.lt.s32.totalorder %v7268_v23, 25  ;;  %vm9747_vm12 = vcmp.lt.s32.totalorder %v7270_v15, 25 }
 0x12a   : > { %9825 = vst [vmem:[#allocation44_spill] sm:$0xff] %v7510_v37  ;;  %vm407_vm9 = vcmp.ne.s32.totalorder %v398_v46, 0  ;;  %v1219_v63 = vsel %vm9746_vm7, %v1205_v41, 0.0  ;;  %vm9833_vm4 = vcmp.lt.s32.totalorder %v7218_v19, 25  ;;  %v1337_v14 = vsel %vm9742_vm10, %v9835_v36, %v9834_v45 }
 0x12b   : > { %2784 = vrot.lane.b32.xlu1 %v7170_v7, %s6619_s25  ;;  %2782 = vrot.lane.b32.xlu0 %v7144_v60, %s6619_s25  ;;  %v1220_v22 = vsel %vm9833_vm4, %v1206_v54, 0.0  ;;  %vm414_vm15 = vcmp.lt.s32.totalorder %v398_v46, 0  ;;  %v957_v27 = vcombine.low %v945_v48, %v946_v21  ;;  %v1124_v38 = vcombine.low %v1102_v43, %v1109_v52 }
 0x12c   : > { %v1095_v49 = vcombine.low %v1083_v12, %v1084_v44  ;;  %v428_v50 = vadd.s32 28, %v398_v46  ;;  %v1217_v41 = vsel %vm9739_vm14, %v1203_v62, 0.0  ;;  %v1218_v54 = vsel %vm9738_vm13, %v1204_v57, 0.0  ;;  %vm7593_vm13 = vmand %vm414_vm15, %vm407_vm9  ;;  %v9857_v12 = vld [vmem:[#allocation30_spill] sm:$0xff] }
 0x12d   : > { %v7544_v31 = vpop.permute.xlu1 %1987  ;;  %v7546_v58 = vpop.permute.xlu0 %1985  ;;  %v1335_v25 = vsel %vm9742_vm10, %v9837_v47, %v9836_v42  ;;  %v1336_v33 = vsel %vm9742_vm10, %v9836_v42, %v9835_v36  ;;  %v7584_v52 = vrot.slane %v670_v4, %v7286_v16  ;;  %v7587_v21 = vrot.slane %v837_v55, %v7286_v16  ;;  %v9845_v4 = vld [vmem:[#allocation22_spill] sm:$0xff] }
 0x12e   : > { %v1232_v43 = vcombine.low %v1219_v63, %v1220_v22  ;;  %vm9840_vm4 = vcmp.ge.s32.totalorder %v7218_v19, 3  ;;  %v7598_v42 = vrot.slane %v808_v51, %v7286_v16  ;;  %v7601_v62 = vrot.slane %v986_v40, %v7286_v16 }
 0x12f   : > { %2788 = vrot.lane.b32.xlu1 %v7189_v10, %s6619_s25  ;;  %2786 = vrot.lane.b32.xlu0 %v7165_v9, %s6619_s25  ;;  %9838 = vst [vmem:[#allocation12_spill] sm:$0xff] %v7584_v52  ;;  %9839 = vst [vmem:[#allocation18_spill] sm:$0xff] %v7587_v21  ;;  %v1351_v44 = vsel %vm9840_vm4, %v1337_v14, 0.0  ;;  %v1334_v55 = vsel %vm9742_vm10, %v9845_v4, %v9837_v47  ;;  %vm1595_vm14 = vcmask 465920   ;;  %v7611_v57 = vrot.slane %v957_v27, %v7286_v16  ;;  %v9874_v52 = vld [vmem:[#allocation36_spill] sm:$0xff] }
 0x130   : > { %9843 = vst [vmem:[#allocation15_spill] sm:$0xff] %v7598_v42  ;;  %9844 = vst [vmem:[#allocation17_spill] sm:$0xff] %v7601_v62  ;;  %v1231_v63 = vcombine.low %v1217_v41, %v1218_v54  ;;  %vm9847_vm9 = vcmp.ge.s32.totalorder %v7232_v6, 3  ;;  %vm9848_vm15 = vcmp.ge.s32.totalorder %v7220_v11, 3  ;;  %v7618_v22 = vrot.slane %v1124_v38, %v7286_v16  ;;  %v9851_v41 = vld [vmem:[#allocation20_spill] sm:$0xff]  ;;  %v9852_v38 = vld [vmem:[#allocation19_spill] sm:$0xff] }
 0x131   : > { %v7579_v37 = vpop.permute.xlu1 %1991  ;;  %v7581_v48 = vpop.permute.xlu0 %1989  ;;  %9846 = vst [vmem:[#allocation16_spill] sm:$0xff] %v7611_v57  ;;  %v1349_v51 = vsel %vm9847_vm9, %v1335_v25, 0.0  ;;  %v1350_v40 = vsel %vm9848_vm15, %v1336_v33, 0.0  ;;  %v7621_v47 = vrot.slane %v1095_v49, %v7286_v16  ;;  %v7629_v27 = vsel %vm7593_vm13, %v428_v50, %v398_v46  ;;  %v9856_v46 = vld [vmem:[#allocation31_spill] sm:$0xff]  ;;  %v9861_v62 = vld [vmem:[#allocation28_spill] sm:$0xff] }
 0x132   : > { %9849 = vst [vmem:[#allocation13_spill] sm:$0xff] %v7618_v22  ;;  %v1363_v36 = vcombine.low %v1350_v40, %v1351_v44  ;;  %v7632_v25 = vrot.slane %v1232_v43, %v7286_v16  ;;  %v1207_v33 = vsel %vm9740_vm5, %v9830_v39, %v9851_v41  ;;  %v1208_v49 = vsel %vm9740_vm5, %v9851_v41, %v9852_v38  ;;  %v9854_v40 = vld [vmem:[#allocation32_spill] sm:$0xff]  ;;  %v9855_v22 = vld [vmem:[#allocation29_spill] sm:$0xff] }
 0x133   : > { %2792 = vrot.lane.b32.xlu1 %v7216_v8, %s6619_s25  ;;  %2790 = vrot.lane.b32.xlu0 %v7184_v0, %s6619_s25  ;;  %9850 = vst [vmem:[#allocation26_spill] sm:$0xff] %v7621_v47  ;;  %vm9853_vm4 = vcmp.ge.s32.totalorder %v7224_v61, 3  ;;  %v1467_v50 = vsel %vm9743_vm2, %v9855_v22, %v9854_v40  ;;  %v1468_v43 = vsel %vm9743_vm2, %v9854_v40, %v9856_v46  ;;  %vm1737_vm13 = vcmask 449536   ;;  %v9862_v38 = vld [vmem:[#allocation25_spill] sm:$0xff] }
 0x134   : > { %v1348_v54 = vsel %vm9853_vm4, %v1334_v55, 0.0  ;;  %v1240_v39 = vrot.slane %v1231_v63, %v7286_v16  ;;  %v9858_v55 = vld [vmem:[#allocation27_spill] sm:$0xff]  ;;  %v1466_v41 = vsel %vm9743_vm2, %v9857_v12, %v9855_v22  ;;  %v1221_v47 = vsel %vm9748_vm11, %v1207_v33, 0.0 }
 0x135   : > { %v7623_v14 = vpop.permute.xlu1 %1995  ;;  %v7625_v4 = vpop.permute.xlu0 %1993  ;;  %v1362_v44 = vcombine.low %v1348_v54, %v1349_v51  ;;  %v1465_v51 = vsel %vm9743_vm2, %v9858_v55, %v9857_v12  ;;  %v9859_v54 = vsub.s32 7, %v6701_v5  ;;  %v1222_v21 = vsel %vm9747_vm12, %v1208_v49, 0.0 }
 0x136   : > { %v1378_v63 = vrot.slane %v1363_v36, %v7286_v16  ;;  %v1339_v55 = vsel %vm9742_vm10, %v9862_v38, %v9861_v62  ;;  %v1338_v5 = vsel %vm9742_vm10, %v9834_v45, %v9862_v38  ;;  %vm9864_vm9 = vcmp.ge.s32.totalorder %v7220_v11, 2  ;;  %v9866_v36 = vld [vmem:[#allocation37_spill] sm:$0xff] }
 0x137   : > { %2913 = vrot.lane.b32.xlu1 %v7144_v60, %s6620_s28  ;;  %2911 = vrot.lane.b32.xlu0 %v7149_v13, %s6620_s28  ;;  %v7662_v40 = vrot.slane %v7130_v18, %v9859_v54  ;;  %v1481_v18 = vsel %vm9864_vm9, %v1467_v50, 0.0  ;;  %vm9865_vm15 = vcmp.ge.s32.totalorder %v7218_v19, 2  ;;  %v1599_v49 = vsel %vm1595_vm14, %v9866_v36, %v7228_v56 }
 0x138   : > { %v1482_v33 = vsel %vm9865_vm15, %v1468_v43, 0.0  ;;  %v1262_v12 = vcombine.low %v1240_v39, %v7632_v25  ;;  %v1371_v54 = vrot.slane %v1362_v44, %v7286_v16  ;;  %vm9867_vm4 = vcmp.ge.s32.totalorder %v7224_v61, 2  ;;  %v9870_v43 = vld [vmem:[#allocation38_spill] sm:$0xff]  ;;  %v9871_v25 = vld [vmem:[#allocation35_spill] sm:$0xff] }
 0x139   : > { %9860 = vst [vmem:[#allocation23_spill] sm:$0xff] %v7662_v40  ;;  %v7672_v42 = vpop.permute.xlu1 %2116  ;;  %v7674_v22 = vpop.permute.xlu0 %2114  ;;  %v1479_v62 = vsel %vm9867_vm4, %v1465_v51, 0.0  ;;  %vm9868_vm5 = vcmp.ge.s32.totalorder %v7232_v6, 2  ;;  %v1233_v38 = vcombine.low %v1221_v47, %v1222_v21  ;;  %vm9869_vm9 = vcmp.ge.s32.totalorder %v7270_v15, 3 }
 0x13a   : > { %9863 = vst [vmem:[#allocation24_spill] sm:$0xff] %v7674_v22  ;;  %v1480_v45 = vsel %vm9868_vm5, %v1466_v41, 0.0  ;;  %v1353_v50 = vsel %vm9869_vm9, %v1339_v55, 0.0  ;;  %v1597_v44 = vsel %vm1595_vm14, %v9871_v25, %v9870_v43  ;;  %v1598_v39 = vsel %vm1595_vm14, %v9870_v43, %v9866_v36 }
 0x13b   : > { %2917 = vrot.lane.b32.xlu1 %v7165_v9, %s6620_s28  ;;  %2915 = vrot.lane.b32.xlu0 %v7170_v7, %s6620_s28  ;;  %vm9872_vm5 = vcmp.ge.s32.totalorder %v7268_v23, 3  ;;  %v1393_v41 = vcombine.low %v1371_v54, %v1378_v63  ;;  %v1494_v40 = vcombine.low %v1481_v18, %v1482_v33  ;;  %vm9873_vm15 = vcmp.ge.s32.totalorder %v7218_v19, 1  ;;  %v9875_v18 = vld [vmem:[#allocation34_spill] sm:$0xff] }
 0x13c   : > { %v1352_v51 = vsel %vm9872_vm5, %v1338_v5, 0.0  ;;  %v1613_v57 = vsel %vm9873_vm15, %v1599_v49, 0.0  ;;  %vm1868_vm4 = vcmask 441344   ;;  %v1493_v55 = vcombine.low %v1479_v62, %v1480_v45 }
 0x13d   : > { %v7708_v21 = vpop.permute.xlu1 %2120  ;;  %v7710_v47 = vpop.permute.xlu0 %2118  ;;  %v1596_v22 = vsel %vm1595_vm14, %v9874_v52, %v9871_v25  ;;  %v1738_v36 = vsel %vm1737_vm13, %v7260_v17, %v7290_v2  ;;  %v1739_v63 = vsel %vm1737_vm13, %v7290_v2, %v7288_v20  ;;  %v1364_v5 = vcombine.low %v1352_v51, %v1353_v50  ;;  %v9878_v17 = vld [vmem:[#allocation33_spill] sm:$0xff] }
 0x13e   : > { %v1469_v33 = vsel %vm9743_vm2, %v9856_v46, %v9875_v18  ;;  %vm9876_vm9 = vcmp.ge.s32.totalorder %v7232_v6, 1  ;;  %vm9877_vm5 = vcmp.ge.s32.totalorder %v7220_v11, 1  ;;  %v1470_v2 = vsel %vm9743_vm2, %v9875_v18, %v9878_v17 }
 0x13f   : > { %v1611_v62 = vsel %vm9876_vm9, %v1597_v44, 0.0  ;;  %v1612_v49 = vsel %vm9877_vm5, %v1598_v39, 0.0  ;;  %2921 = vrot.lane.b32.xlu1 %v7184_v0, %s6620_s28  ;;  %2919 = vrot.lane.b32.xlu0 %v7189_v10, %s6620_s28  ;;  %v1740_v46 = vsel %vm1737_vm13, %v7288_v20, %v7327_v30  ;;  %v1741_v54 = vsel %vm1737_vm13, %v7327_v30, %v7325_v24  ;;  %v9882_v39 = vld [vmem:[#allocation39_spill] sm:$0xff] }
 0x140   : > { %v1625_v52 = vcombine.low %v1612_v49, %v1613_v57  ;;  %vm1999_vm15 = vcmask 433152   ;;  %v7742_v45 = vrot.slane %v1494_v40, %v7286_v16  ;;  %vm9879_vm9 = vcmp.ge.s32.totalorder %v7224_v61, 1 }
 0x141   : > { %v1610_v50 = vsel %vm9879_vm9, %v1596_v22, 0.0  ;;  %vm9880_vm5 = vcmp.lt.s32.totalorder %v7224_v61, 27  ;;  %vm9881_vm10 = vcmp.lt.s32.totalorder %v7232_v6, 27  ;;  %v7750_v25 = vpop.permute.xlu1 %2124  ;;  %v7752_v20 = vpop.permute.xlu0 %2122  ;;  %v7755_v44 = vrot.slane %v1262_v12, %v7286_v16 }
 0x142   : > { %v1752_v43 = vsel %vm9880_vm5, %v1738_v36, 0.0  ;;  %v1753_v57 = vsel %vm9881_vm10, %v1739_v63, 0.0  ;;  %v7758_v30 = vrot.slane %v1493_v55, %v7286_v16  ;;  %v1624_v40 = vcombine.low %v1610_v50, %v1611_v62 }
 0x143   : > { %v1601_v22 = vsel %vm1595_vm14, %v9882_v39, %v7262_v59  ;;  %vm9883_vm9 = vcmp.ge.s32.totalorder %v7268_v23, 2  ;;  %vm9884_vm10 = vcmp.ge.s32.totalorder %v7270_v15, 2  ;;  %vm9885_vm5 = vcmp.lt.s32.totalorder %v7220_v11, 27  ;;  %3042 = vrot.lane.b32.xlu1 %v7149_v13, %s6621_s29  ;;  %2923 = vrot.lane.b32.xlu0 %v7216_v8, %s6620_s28 }
 0x144   : > { %v7765_v51 = vsel %vm9883_vm9, %v1469_v33, 0.0  ;;  %v7769_v36 = vsel %vm9884_vm10, %v1470_v2, 0.0  ;;  %v1754_v12 = vsel %vm9885_vm5, %v1740_v46, 0.0  ;;  %vm9886_vm2 = vcmp.lt.s32.totalorder %v7218_v19, 27 }
 0x145   : > { %v1755_v55 = vsel %vm9886_vm2, %v1741_v54, 0.0  ;;  %v7780_v63 = vrot.slane %v1233_v38, %v7286_v16  ;;  %v1600_v18 = vsel %vm1595_vm14, %v7228_v56, %v9882_v39  ;;  %v7786_v33 = vrot.slane %v1625_v52, %v7286_v16  ;;  %v7800_v54 = vpop.permute.xlu1 %2245  ;;  %v7802_v56 = vpop.permute.xlu0 %2126  ;;  %v9890_v52 = vld [vmem:[#allocation44_spill] sm:$0xff] }
 0x146   : > { %v1766_v62 = vcombine.low %v1752_v43, %v1753_v57  ;;  %v7789_v49 = vrot.slane %v1393_v41, %v7286_v16  ;;  %v7792_v2 = vrot.slane %v1364_v5, %v7286_v16  ;;  %v7798_v38 = vsel %vm9750_vm3, %v1601_v22, 0.0 }
 0x147   : > { %vm9751_vm2 = vcmask 252928   ;;  %v7807_v41 = vrot.slane %v1624_v40, %v7286_v16  ;;  %v1767_v5 = vcombine.low %v1754_v12, %v1755_v55  ;;  %v1870_v50 = vsel %vm1868_vm4, %v7385_v3, %v7432_v35  ;;  %3046 = vrot.lane.b32.xlu1 %v7170_v7, %s6621_s29  ;;  %3044 = vrot.lane.b32.xlu0 %v7144_v60, %s6621_s29 }
 0x148   : > { %v7814_v43 = vsel %vm9749_vm6, %v1600_v18, 0.0  ;;  %v1742_v57 = vsel %vm1737_vm13, %v7325_v24, %v7354_v53  ;;  %v1743_v39 = vsel %vm1737_vm13, %v7354_v53, %v7352_v1  ;;  %v1872_v40 = vsel %vm1868_vm4, %v7430_v26, %v7476_v34 }
 0x149   : > { %v1655_v22 = vcombine.low %v7807_v41, %v7786_v33  ;;  %v7834_v12 = vrot.slane %v1766_v62, %v7286_v16  ;;  %v1869_v53 = vsel %vm1868_vm4, %v7387_v29, %v7385_v3  ;;  %v1871_v55 = vsel %vm1868_vm4, %v7432_v35, %v7430_v26  ;;  %v7850_v41 = vpop.permute.xlu1 %2249  ;;  %v7852_v24 = vpop.permute.xlu0 %2247 }
 0x14a   : > { %vm9887_vm9 = vcmp.lt.s32.totalorder %v7232_v6, 26  ;;  %v2002_v33 = vsel %vm1999_vm15, %v7544_v31, %v7581_v48  ;;  %v2003_v62 = vsel %vm1999_vm15, %v7581_v48, %v7579_v37  ;;  %v1782_v3 = vrot.slane %v1767_v5, %v7286_v16 }
 0x14b   : > { %v1884_v18 = vsel %vm9887_vm9, %v1870_v50, 0.0  ;;  %v1756_v29 = vsel %vm9745_vm0, %v1742_v57, 0.0  ;;  %v1757_v26 = vsel %vm9744_vm8, %v1743_v39, 0.0  ;;  %vm9888_vm10 = vcmp.lt.s32.totalorder %v7218_v19, 26  ;;  %3050 = vrot.lane.b32.xlu1 %v7189_v10, %s6621_s29  ;;  %3048 = vrot.lane.b32.xlu0 %v7165_v9, %s6621_s29 }
 0x14c   : > { %v1886_v35 = vsel %vm9888_vm10, %v1872_v40, 0.0  ;;  %vm9889_vm5 = vcmp.lt.s32.totalorder %v7224_v61, 26  ;;  %v1874_v48 = vsel %vm1868_vm4, %v7474_v28, %v7512_v32  ;;  %v2000_v5 = vsel %vm1999_vm15, %v9890_v52, %v7546_v58 }
 0x14d   : > { %v1883_v50 = vsel %vm9889_vm5, %v1869_v53, 0.0  ;;  %v2001_v57 = vsel %vm1999_vm15, %v7546_v58, %v7544_v31  ;;  %vm9891_vm9 = vcmp.lt.s32.totalorder %v7220_v11, 26  ;;  %v2016_v53 = vsel %vm9746_vm7, %v2002_v33, 0.0  ;;  %v7894_v33 = vpop.permute.xlu0 %2251 }
 0x14e   : > { %v1885_v39 = vsel %vm9891_vm9, %v1871_v55, 0.0  ;;  %v1897_v40 = vcombine.low %v1883_v50, %v1884_v18  ;;  %vm9892_vm10 = vcmp.lt.s32.totalorder %v7218_v19, 25  ;;  %vm9752_vm5 = vcmp.ge.s32.totalorder %v7629_v27, 2  ;;  %v7892_v18 = vpop.permute.xlu1 %2253 }
 0x14f   : > { %v2017_v52 = vsel %vm9892_vm10, %v2003_v62, 0.0  ;;  %v1873_v31 = vsel %vm1868_vm4, %v7476_v34, %v7474_v28  ;;  %v1898_v58 = vcombine.low %v1885_v39, %v1886_v35  ;;  %v2004_v46 = vsel %vm1999_vm15, %v7579_v37, %v7625_v4  ;;  %3054 = vrot.lane.b32.xlu1 %v7216_v8, %s6621_s29  ;;  %3052 = vrot.lane.b32.xlu0 %v7184_v0, %s6621_s29 }
 0x150   : > { %v2005_v55 = vsel %vm1999_vm15, %v7625_v4, %v7623_v14  ;;  %vm9893_vm9 = vcmp.lt.s32.totalorder %v7270_v15, 26  ;;  %vm9894_vm10 = vcmp.lt.s32.totalorder %v7224_v61, 25  ;;  %vm9895_vm8 = vcmp.lt.s32.totalorder %v7232_v6, 25 }
 0x151   : > { %v1888_v62 = vsel %vm9893_vm9, %v1874_v48, 0.0  ;;  %v2014_v50 = vsel %vm9894_vm10, %v2000_v5, 0.0  ;;  %v2015_v28 = vsel %vm9895_vm8, %v2001_v57, 0.0  ;;  %v2132_v34 = vsel %vm9751_vm2, %v7672_v42, %v7710_v47 }
 0x152   : > { %vm2261_vm0 = vcmask 244736   ;;  %v1797_v37 = vcombine.low %v7834_v12, %v1782_v3  ;;  %v1768_v4 = vcombine.low %v1756_v29, %v1757_v26  ;;  %v2029_v35 = vcombine.low %v2016_v53, %v2017_v52  ;;  %v9897_v12 = vld [vmem:[#allocation24_spill] sm:$0xff]  ;;  %v7929_v52 = vpop.permute.xlu0 %2255 }
 0x153   : > { %vm9754_vm9 = vcmp.ge.s32.totalorder %v7629_v27, 3  ;;  %vm9896_vm10 = vcmp.lt.s32.totalorder %v7268_v23, 26  ;;  %v2018_v5 = vsel %vm9748_vm11, %v2004_v46, 0.0  ;;  %v2019_v57 = vsel %vm9747_vm12, %v2005_v55, 0.0  ;;  %v7927_v46 = vpop.permute.xlu1 %2257  ;;  %3175 = vrot.lane.b32.xlu1 %v7144_v60, %s6622_s30  ;;  %3173 = vrot.lane.b32.xlu0 %v7149_v13, %s6622_s30 }
 0x154   : > { %v1887_v48 = vsel %vm9896_vm10, %v1873_v31, 0.0  ;;  %v2131_v3 = vsel %vm9751_vm2, %v9897_v12, %v7672_v42  ;;  %vm9766_vm8 = vcmp.lt.s32.totalorder %v7629_v27, 27  ;;  %vm727_vm7 = vcmp.ge.s32.totalorder %v7629_v27, 1 }
 0x155   : > { %v7923_v29 = vrot.slane %v1898_v58, %v7286_v16  ;;  %v1899_v26 = vcombine.low %v1887_v48, %v1888_v62  ;;  %v2028_v39 = vcombine.low %v2014_v50, %v2015_v28  ;;  %vm9898_vm10 = vcmp.ge.s32.totalorder %v7232_v6, 3 }
 0x156   : > { %v2146_v53 = vsel %vm9898_vm10, %v2132_v34, 0.0  ;;  %v9899_v42 = vcombine.low %v7758_v30, %v7742_v45  ;;  %v9900_v58 = vcombine.low %v7765_v51, %v7769_v36  ;;  %v7944_v62 = vrot.slane %v1655_v22, %v7286_v16 }
 0x157   : > { %v7947_v50 = vrot.slane %v1897_v40, %v7286_v16  ;;  %v7950_v28 = vrot.slane %v2029_v35, %v7286_v16  ;;  %v2030_v34 = vcombine.low %v2018_v5, %v2019_v57  ;;  %vm9901_vm10 = vcmp.ge.s32.totalorder %v7224_v61, 3  ;;  %v9904_v57 = vld [vmem:[#allocation9_spill] sm:$0xff]  ;;  %3179 = vrot.lane.b32.xlu1 %v7165_v9, %s6622_s30  ;;  %3177 = vrot.lane.b32.xlu0 %v7170_v7, %s6622_s30 }
 0x158   : > { %v7935_v31 = vrot.slane %v9899_v42, %v7286_v16  ;;  %v7941_v55 = vrot.slane %v9900_v58, %v7286_v16  ;;  %v2145_v45 = vsel %vm9901_vm10, %v2131_v3, 0.0  ;;  %v2134_v30 = vsel %vm9751_vm2, %v7708_v21, %v7752_v20  ;;  %v9906_v3 = vld [vmem:[#allocation8_spill] sm:$0xff] }
 0x159   : > { %v9902_v51 = vcombine.low %v7814_v43, %v7798_v38  ;;  %v7968_v22 = vrot.slane %v1797_v37, %v7286_v16  ;;  %v7971_v40 = vrot.slane %v1768_v4, %v7286_v16  ;;  %v2159_v35 = vcombine.low %v2145_v45, %v2146_v53  ;;  %v638_v43 = vpop.permute.xlu1 %637  ;;  %v501_v37 = vpop.permute.xlu0 %500 }
 0x15a   : > { %v1928_v48 = vcombine.low %v7947_v50, %v7923_v29  ;;  %v7976_v60 = vrot.slane %v1899_v26, %v7286_v16  ;;  %v7979_v13 = vrot.slane %v2028_v39, %v7286_v16  ;;  %v2133_v38 = vsel %vm9751_vm2, %v7710_v47, %v7708_v21 }
 0x15b   : > { %v7965_v36 = vrot.slane %v9902_v51, %v7286_v16  ;;  %vm9753_vm10 = vcmp.lt.s32.totalorder %v7629_v27, 25  ;;  %vm1014_vm12 = vcmp.lt.s32.totalorder %v7629_v27, 26  ;;  %v2135_v4 = vsel %vm9751_vm2, %v7752_v20, %v7750_v25  ;;  %3183 = vrot.lane.b32.xlu1 %v7184_v0, %s6622_s30  ;;  %3181 = vrot.lane.b32.xlu0 %v7189_v10, %s6622_s30 }
 0x15c   : > { %vm9903_vm11 = vcmp.ge.s32.totalorder %v7218_v19, 3  ;;  %vm9905_vm6 = vcmask 703488   ;;  %vm9907_vm3 = vcmask 711680   ;;  %v2059_v21 = vcombine.low %v7979_v13, %v7950_v28 }
 0x15d   : > { %v2148_v5 = vsel %vm9903_vm11, %v2134_v30, 0.0  ;;  %v646_v12 = vsel %vm9905_vm6, %v9904_v57, %v638_v43  ;;  %v509_v26 = vsel %vm9907_vm3, %v9906_v3, %v501_v37  ;;  %v7998_v47 = vrot.slane %v2030_v34, %v7286_v16  ;;  %v925_v51 = vpop.permute.xlu1 %924  ;;  %v9911_v37 = vld [vmem:[#allocation42_spill] sm:$0xff] }
 0x15e   : > { %v660_v39 = vsel %vm9752_vm5, %v646_v12, 0.0  ;;  %v523_v20 = vsel %vm9754_vm9, %v509_v26, 0.0  ;;  %vm9908_vm11 = vcmp.ge.s32.totalorder %v7220_v11, 3  ;;  %v8011_v42 = vrot.slane %v2159_v35, %v7286_v16  ;;  %v776_v35 = vpop.permute.xlu0 %775  ;;  %v9912_v12 = vld [vmem:[#allocation11_spill] sm:$0xff] }
 0x15f   : > { %v2147_v53 = vsel %vm9908_vm11, %v2133_v38, 0.0  ;;  %v698_v58 = vrot.slane %v660_v39, %v7286_v16  ;;  %v561_v34 = vrot.slane %v523_v20, %v7286_v16  ;;  %vm9909_vm6 = vcmp.ge.s32.totalorder %v7268_v23, 3  ;;  %v9910_v38 = vld [vmem:[#allocation12_spill] sm:$0xff]  ;;  %3185 = vrot.lane.b32.xlu0 %v7216_v8, %s6622_s30 }
 0x160   : > { %v8017_v45 = vsel %vm9909_vm6, %v2135_v4, 0.0  ;;  %v2160_v30 = vcombine.low %v2147_v53, %v2148_v5  ;;  %v2136_v9 = vsel %vm9751_vm2, %v7750_v25, %v7802_v56  ;;  %v2262_v7 = vsel %vm2261_vm0, %v7800_v54, %v7852_v24  ;;  %v9914_v4 = vld [vmem:[#allocation10_spill] sm:$0xff] }
 0x161   : > { %v700_v43 = vcombine.low %v9910_v38, %v698_v58  ;;  %v563_v57 = vcombine.low %v9911_v37, %v561_v34  ;;  %vm9913_vm3 = vcmask 678912   ;;  %vm9915_vm11 = vcmask 695296  }
 0x162   : > { %v933_v3 = vsel %vm9913_vm3, %v9912_v12, %v925_v51  ;;  %v784_v5 = vsel %vm9915_vm11, %v9914_v4, %v776_v35  ;;  %v2264_v25 = vsel %vm2261_vm0, %v7850_v41, %v7894_v33  ;;  %v2265_v54 = vsel %vm2261_vm0, %v7894_v33, %v7892_v18  ;;  %v1201_v35 = vpop.permute.xlu1 %1200  ;;  %v1063_v38 = vpop.permute.xlu0 %1062  ;;  %v9921_v4 = vld [vmem:[#allocation15_spill] sm:$0xff] }
 0x163   : > { %v947_v26 = vsel %vm9766_vm8, %v933_v3, 0.0  ;;  %v798_v39 = vsel %vm727_vm7, %v784_v5, 0.0  ;;  %v714_v20 = vrot.slane %v700_v43, %v7286_v16  ;;  %v577_v53 = vrot.slane %v563_v57, %v7286_v16  ;;  %v9918_v43 = vld [vmem:[#allocation43_spill] sm:$0xff]  ;;  %v9919_v57 = vld [vmem:[#allocation41_spill] sm:$0xff] }
 0x164   : > { %v985_v58 = vrot.slane %v947_v26, %v7286_v16  ;;  %v836_v33 = vrot.slane %v798_v39, %v7286_v16  ;;  %v8050_v34 = vrot.slane %v2160_v30, %v7286_v16  ;;  %vm9916_vm6 = vcmp.ge.s32.totalorder %v7270_v15, 3  ;;  %v9920_v30 = vld [vmem:[#allocation16_spill] sm:$0xff]  ;;  %v9926_v26 = vld [vmem:[#allocation14_spill] sm:$0xff] }
 0x165   : > { %v8054_v51 = vsel %vm9916_vm6, %v2136_v9, 0.0  ;;  %v2263_v0 = vsel %vm2261_vm0, %v7852_v24, %v7850_v41  ;;  %vm9917_vm3 = vcmp.ge.s32.totalorder %v7224_v61, 2  ;;  %v715_v37 = vcombine.low %v9918_v43, %v714_v20  ;;  %v9924_v41 = vld [vmem:[#allocation19_spill] sm:$0xff] }
 0x166   : > { %v8061_v10 = vsel %vm9917_vm3, %v2262_v7, 0.0  ;;  %v578_v12 = vcombine.low %v9919_v57, %v577_v53  ;;  %v987_v3 = vcombine.low %v9920_v30, %v985_v58  ;;  %v838_v5 = vcombine.low %v9921_v4, %v836_v33  ;;  %v9928_v20 = vld [vmem:[#allocation23_spill] sm:$0xff]  ;;  %v1332_v57 = vpop.permute.xlu0 %1331 }
 0x167   : > { %vm9922_vm11 = vcmp.ge.s32.totalorder %v7220_v11, 2  ;;  %vm9923_vm6 = vcmp.ge.s32.totalorder %v7218_v19, 2  ;;  %vm9925_vm2 = vcmask 662528   ;;  %vm9927_vm3 = vcmask 670720   ;;  %2390 = vrot.lane.b32.xlu1 %v9928_v20, %s6615_s22  ;;  %2532 = vrot.lane.b32.xlu0 %v9928_v20, %s6617_s23 }
 0x168   : > { %v2278_v9 = vsel %vm9922_vm11, %v2264_v25, 0.0  ;;  %v2279_v24 = vsel %vm9923_vm6, %v2265_v54, 0.0  ;;  %v1209_v7 = vsel %vm9925_vm2, %v9924_v41, %v1201_v35  ;;  %v1071_v39 = vsel %vm9927_vm3, %v9926_v26, %v1063_v38  ;;  %718 = vst.msk [vmem:[#allocation3 + $0x1] ss:$8 sm:$0xf] %vm6689_vm1, %v715_v37  ;;  %v9933_v41 = vld [vmem:[#allocation28_spill] sm:$0xff] }
 0x169   : > { %719 = vst.msk [vmem:[#allocation3 + $0x1] ss:$8 sm:$0x70] %vm6689_vm1, %v715_v37  ;;  %580 = vst.msk [vmem:[#allocation3] ss:$8 sm:$0xf] %vm6689_vm1, %v578_v12  ;;  %v1001_v25 = vrot.slane %v987_v3, %v7286_v16  ;;  %v852_v54 = vrot.slane %v838_v5, %v7286_v16  ;;  %v2266_v33 = vsel %vm2261_vm0, %v7892_v18, %v7929_v52  ;;  %v1463_v37 = vpop.permute.xlu1 %1462 }
 0x16a   : > { %581 = vst.msk [vmem:[#allocation3] ss:$8 sm:$0x70] %vm6689_vm1, %v578_v12  ;;  %v1223_v58 = vsel %vm9753_vm10, %v1209_v7, 0.0  ;;  %v1085_v8 = vsel %vm1014_vm12, %v1071_v39, 0.0  ;;  %v2267_v35 = vsel %vm2261_vm0, %v7929_v52, %v7927_v46  ;;  %v9930_v12 = vld [vmem:[#allocation17_spill] sm:$0xff] }
 0x16b   : > { %v1261_v38 = vrot.slane %v1223_v58, %v7286_v16  ;;  %v1123_v43 = vrot.slane %v1085_v8, %v7286_v16  ;;  %v1002_v30 = vcombine.low %v9930_v12, %v1001_v25  ;;  %v9931_v3 = vld [vmem:[#allocation18_spill] sm:$0xff]  ;;  %vm9932_vm2 = vcmask 474112   ;;  %2663 = vrot.lane.b32.xlu1 %v9928_v20, %s6618_s24  ;;  %2794 = vrot.lane.b32.xlu0 %v9928_v20, %s6619_s25 }
 0x16c   : > { %v853_v4 = vcombine.low %v9931_v3, %v852_v54  ;;  %v1471_v5 = vsel %vm9932_vm2, %v9878_v17, %v1463_v37  ;;  %vm9934_vm11 = vcmask 482304   ;;  %v9935_v26 = vld [vmem:[#allocation26_spill] sm:$0xff]  ;;  %vm9936_vm6 = vcmp.ge.s32.totalorder %v7232_v6, 2 }
 0x16d   : > { %v1340_v18 = vsel %vm9934_vm11, %v9933_v41, %v1332_v57  ;;  %v1263_v7 = vcombine.low %v7780_v63, %v1261_v38  ;;  %v1125_v52 = vcombine.low %v9935_v26, %v1123_v43  ;;  %v1485_v39 = vsel %vm9752_vm5, %v1471_v5, 0.0  ;;  %1005 = vst.msk [vmem:[#allocation3 + $0x4] ss:$8 sm:$0xf] %vm6689_vm1, %v1002_v30  ;;  %v1736_v38 = vpop.permute.xlu1 %1735  ;;  %v1594_v43 = vpop.permute.xlu0 %1593 }
 0x16e   : > { %v1354_v58 = vsel %vm9754_vm9, %v1340_v18, 0.0  ;;  %v2277_v17 = vsel %vm9936_vm6, %v2263_v0, 0.0  ;;  %v2291_v25 = vcombine.low %v2278_v9, %v2279_v24  ;;  %1006 = vst.msk [vmem:[#allocation3 + $0x4] ss:$8 sm:$0x70] %vm6689_vm1, %v1002_v30  ;;  %v1523_v63 = vrot.slane %v1485_v39, %v7286_v16 }
 0x16f   : > { %856 = vst.msk [vmem:[#allocation3 + $0x2] ss:$8 sm:$0xf] %vm6689_vm1, %v853_v4  ;;  %857 = vst.msk [vmem:[#allocation3 + $0x2] ss:$8 sm:$0x70] %vm6689_vm1, %v853_v4  ;;  %v1392_v54 = vrot.slane %v1354_v58, %v7286_v16  ;;  %v1277_v24 = vrot.slane %v1263_v7, %v7286_v16  ;;  %v1139_v8 = vrot.slane %v1125_v52, %v7286_v16  ;;  %2925 = vrot.lane.b32.xlu1 %v9928_v20, %s6620_s28 }
 0x170   : > { %vm9937_vm3 = vcmp.ge.s32.totalorder %v7268_v23, 2  ;;  %vm9938_vm2 = vcmp.ge.s32.totalorder %v7270_v15, 2  ;;  %v1525_v37 = vcombine.low %v7941_v55, %v1523_v63  ;;  %v1744_v12 = vsel %vm1737_vm13, %v7352_v1, %v1736_v38  ;;  %3056 = vrot.lane.b32.xlu0 %v9928_v20, %s6621_s29 }
 0x171   : > { %v8131_v0 = vsel %vm9937_vm3, %v2266_v33, 0.0  ;;  %v8135_v9 = vsel %vm9938_vm2, %v2267_v35, 0.0  ;;  %v1394_v57 = vcombine.low %v7792_v2, %v1392_v54  ;;  %v1602_v33 = vsel %vm1595_vm14, %v7262_v59, %v1594_v43  ;;  %v9939_v35 = vld [vmem:[#allocation13_spill] sm:$0xff]  ;;  %v1998_v26 = vpop.permute.xlu1 %1997  ;;  %v1867_v52 = vpop.permute.xlu0 %1866 }
 0x172   : > { %v1278_v30 = vcombine.low %v7755_v44, %v1277_v24  ;;  %v1140_v3 = vcombine.low %v9939_v35, %v1139_v8  ;;  %v1758_v4 = vsel %vm9766_vm8, %v1744_v12, 0.0  ;;  %v1616_v5 = vsel %vm727_vm7, %v1602_v33, 0.0  ;;  %v6590_v33 = vld [vmem:[#allocation2] sm:$0xff] }
 0x173   : > { %v1539_v1 = vrot.slane %v1525_v37, %v7286_v16  ;;  %v1408_v59 = vrot.slane %v1394_v57, %v7286_v16  ;;  %v1796_v44 = vrot.slane %v1758_v4, %v7286_v16  ;;  %v1654_v2 = vrot.slane %v1616_v5, %v7286_v16  ;;  %3187 = vrot.lane.b32.xlu1 %v9928_v20, %s6622_s30 }
 0x174   : > { %v2190_v55 = vcombine.low %v8011_v42, %v8050_v34  ;;  %v2161_v41 = vcombine.low %v8017_v45, %v8054_v51  ;;  %v2290_v18 = vcombine.low %v8061_v10, %v2277_v17  ;;  %v8165_v7 = vrot.slane %v2291_v25, %v7286_v16  ;;  %1281 = vst.msk [vmem:[#allocation3 + $0x6] ss:$8 sm:$0xf] %vm6689_vm1, %v1278_v30 }
 0x175   : > { %1282 = vst.msk [vmem:[#allocation3 + $0x6] ss:$8 sm:$0x70] %vm6689_vm1, %v1278_v30  ;;  %1143 = vst.msk [vmem:[#allocation3 + $0x5] ss:$8 sm:$0xf] %vm6689_vm1, %v1140_v3  ;;  %v1540_v45 = vcombine.low %v7935_v31, %v1539_v1  ;;  %v1409_v51 = vcombine.low %v7789_v49, %v1408_v59  ;;  %v1798_v10 = vcombine.low %v7971_v40, %v1796_v44  ;;  %v2260_v54 = vpop.permute.xlu1 %2259  ;;  %860 = vrot.lane.b32.xlu0 %v6590_v33, %s6624_s9 }
 0x176   : > { %1144 = vst.msk [vmem:[#allocation3 + $0x5] ss:$8 sm:$0x70] %vm6689_vm1, %v1140_v3  ;;  %v1656_v39 = vcombine.low %v7965_v36, %v1654_v2  ;;  %v2292_v58 = vcombine.low %v8131_v0, %v8135_v9  ;;  %v2006_v17 = vsel %vm1999_vm15, %v7623_v14, %v1998_v26  ;;  %v1875_v25 = vsel %vm1868_vm4, %v7512_v32, %v1867_v52  ;;  %v2129_v0 = vpop.permute.xlu0 %2128 }
 0x177   : > { %1543 = vst.msk [vmem:[#allocation3 + $0x38] ss:$8 sm:$0xf] %vm6689_vm1, %v1540_v45  ;;  %1544 = vst.msk [vmem:[#allocation3 + $0x38] ss:$8 sm:$0x70] %vm6689_vm1, %v1540_v45  ;;  %v1812_v32 = vrot.slane %v1798_v10, %v7286_v16  ;;  %v2182_v36 = vrot.slane %v2161_v41, %v7286_v16  ;;  %v2299_v40 = vrot.slane %v2290_v18, %v7286_v16  ;;  %1678 = vrot.lane.b32.xlu1 %v6590_v33, %s6623_s8 }
 0x178   : > { %1412 = vst.msk [vmem:[#allocation3 + $0x7] ss:$8 sm:$0xf] %vm6689_vm1, %v1409_v51  ;;  %1413 = vst.msk [vmem:[#allocation3 + $0x7] ss:$8 sm:$0x70] %vm6689_vm1, %v1409_v51  ;;  %v1670_v14 = vrot.slane %v1656_v39, %v7286_v16  ;;  %v2268_v8 = vsel %vm2261_vm0, %v7927_v46, %v2260_v54  ;;  %v2198_v29 = vrot.slane %v2190_v55, %v7286_v16 }
 0x179   : > { %v2020_v49 = vsel %vm9753_vm10, %v2006_v17, 0.0  ;;  %v1889_v31 = vsel %vm1014_vm12, %v1875_v25, 0.0  ;;  %v1813_v9 = vcombine.low %v7968_v22, %v1812_v32  ;;  %vm9940_vm14 = vcmask 252928   ;;  %v8241_v3 = vpop.permute.xlu1 %2378  ;;  %2475 = vrot.lane.b32.xlu0 %v6590_v33, %s6625_s10  ;;  %s5326_s8 = sld [smem:[#allocation6]] }
 0x17a   : > { %v2058_v20 = vrot.slane %v2020_v49, %v7286_v16  ;;  %v1927_v63 = vrot.slane %v1889_v31, %v7286_v16  ;;  %v1671_v24 = vcombine.low %v7944_v62, %v1670_v14  ;;  %v2137_v38 = vsel %vm9940_vm14, %v7802_v56, %v2129_v0  ;;  %v8243_v4 = vpop.permute.xlu0 %2376  ;;  %v3295_v49 = vld [vmem:[%s290_s14] sm:$0xff]  ;;  %v3296_v31 = vld [vmem:[%s290_s14 + $0x8] sm:$0xff] }
 0x17b   : > { %v2282_v57 = vsel %vm9752_vm5, %v2268_v8, 0.0  ;;  %v2151_v12 = vsel %vm9754_vm9, %v2137_v38, 0.0  ;;  %v2321_v46 = vcombine.low %v2299_v40, %v8165_v7  ;;  %v2313_v62 = vrot.slane %v2292_v58, %v7286_v16  ;;  %1816 = vst.msk [vmem:[#allocation3 + $0x3b] ss:$8 sm:$0xf] %vm6689_vm1, %v1813_v9  ;;  %3301 = vperm.xlu1 %6240, %v3295_v49  }
 0x17c   : > { %v2060_v43 = vcombine.low %v7998_v47, %v2058_v20  ;;  %v1929_v37 = vcombine.low %v7976_v60, %v1927_v63  ;;  %1817 = vst.msk [vmem:[#allocation3 + $0x3b] ss:$8 sm:$0x70] %vm6689_vm1, %v1813_v9  ;;  %1674 = vst.msk [vmem:[#allocation3 + $0x39] ss:$8 sm:$0xf] %vm6689_vm1, %v1671_v24  ;;  %v2320_v56 = vrot.slane %v2282_v57, %v7286_v16 }
 0x17d   : > { %1675 = vst.msk [vmem:[#allocation3 + $0x39] ss:$8 sm:$0x70] %vm6689_vm1, %v1671_v24  ;;  %v2189_v22 = vrot.slane %v2151_v12, %v7286_v16  ;;  %v1936_v60 = vrot.slane %v1928_v48, %v7286_v16  ;;  %v2067_v47 = vrot.slane %v2059_v21, %v7286_v16  ;;  %v2329_v50 = vrot.slane %v2321_v46, %v7286_v16  ;;  %v2383_v13 = vpop.permute.xlu1 %2382  ;;  %v3298_v63 = vld [vmem:[%s290_s14 + $0x18] sm:$0xff] }
 0x17e   : > { %v2074_v30 = vrot.slane %v2060_v43, %v7286_v16  ;;  %v1943_v35 = vrot.slane %v1929_v37, %v7286_v16  ;;  %v2322_v5 = vcombine.low %v2313_v62, %v2320_v56  ;;  %v2381_v21 = vpop.permute.xlu0 %2380  ;;  %3306 = vperm.xlu0 %6241, %v3296_v31   ;;  %v9941_v54 = vmov 0.0  }
 0x17f   : > { %v2191_v1 = vcombine.low %v2182_v36, %v2189_v22  ;;  %v3297_v36 = vld [vmem:[%s290_s14 + $0x10] sm:$0xff]  ;;  %vm2392_vm0 = vcmask 236544   ;;  %vm2534_vm13 = vcmask 220160   ;;  %vm9942_vm4 = vcmp.ge.s32.totalorder %v7218_v19, 1 }
 0x180   : > { %v2075_v59 = vcombine.low %v2067_v47, %v2074_v30  ;;  %v1944_v44 = vcombine.low %v1936_v60, %v1943_v35  ;;  %v2336_v28 = vrot.slane %v2322_v5, %v7286_v16  ;;  %3311 = vperm.xlu1 %6240, %v3297_v36   ;;  %v2394_v62 = vsel %vm2392_vm0, %v8241_v3, %v2381_v21 }
 0x181   : > { %v2205_v48 = vrot.slane %v2191_v1, %v7286_v16  ;;  %v8269_v2 = vpop.permute.xlu1 %2386  ;;  %v2395_v56 = vsel %vm2392_vm0, %v2381_v21, %v2383_v13  ;;  %v2393_v22 = vsel %vm2392_vm0, %v8243_v4, %v8241_v3  ;;  %vm9943_vm15 = vcmp.ge.s32.totalorder %v7232_v6, 1 }
 0x182   : > { %2078 = vst.msk [vmem:[#allocation3 + $0x3d] ss:$8 sm:$0xf] %vm6689_vm1, %v2075_v59  ;;  %2079 = vst.msk [vmem:[#allocation3 + $0x3d] ss:$8 sm:$0x70] %vm6689_vm1, %v2075_v59  ;;  %v2337_v42 = vcombine.low %v2329_v50, %v2336_v28  ;;  %v8271_v55 = vpop.permute.xlu0 %2384  ;;  %6243 = vrot.lane.b32.xlu0 %v9941_v54, %s6615_s22 }
 0x183   : > { %1947 = vst.msk [vmem:[#allocation3 + $0x3c] ss:$8 sm:$0xf] %vm6689_vm1, %v1944_v44  ;;  %1948 = vst.msk [vmem:[#allocation3 + $0x3c] ss:$8 sm:$0x70] %vm6689_vm1, %v1944_v44  ;;  %v2206_v34 = vcombine.low %v2198_v29, %v2205_v48  ;;  %v2396_v46 = vsel %vm2392_vm0, %v2383_v13, %v8271_v55 }
 0x184   : > { %2340 = vst.msk [vmem:[#allocation3 + $0x3f] ss:$8 sm:$0xf] %vm6689_vm1, %v2337_v42  ;;  %2341 = vst.msk [vmem:[#allocation3 + $0x3f] ss:$8 sm:$0x70] %vm6689_vm1, %v2337_v42  ;;  %3316 = vperm.xlu1 %6240, %v3298_v63  }
 0x185   : > { %2209 = vst.msk [vmem:[#allocation3 + $0x3e] ss:$8 sm:$0xf] %vm6689_vm1, %v2206_v34  ;;  %2210 = vst.msk [vmem:[#allocation3 + $0x3e] ss:$8 sm:$0x70] %vm6689_vm1, %v2206_v34  ;;  %v2519_v41 = vpop.permute.xlu1 %2518 }
 0x186   : > { %v8273_v18 = vpop.permute.xlu0 %2388  ;;  %v2410_v60 = vsel %vm9942_vm4, %v2396_v46, 0.0  ;;  %v2408_v35 = vsel %vm9943_vm15, %v2394_v62, 0.0  ;;  %vm9944_vm11 = vcmp.ge.s32.totalorder %v7220_v11, 1  ;;  %vm9945_vm6 = vcmp.ge.s32.totalorder %v7224_v61, 1  ;;  %6253 = vrot.lane.b32.xlu0 %v9941_v54, %s6625_s10 }
 0x187   : > { %v2409_v5 = vsel %vm9944_vm11, %v2395_v56, 0.0  ;;  %v2407_v4 = vsel %vm9945_vm6, %v2393_v22, 0.0  ;;  %v2398_v28 = vsel %vm2392_vm0, %v8269_v2, %v8273_v18  ;;  %vm9946_vm3 = vcmp.lt.s32.totalorder %v7224_v61, 27 }
 0x188   : > { %6248 = vrot.lane.b32.xlu1 %v9941_v54, %s6615_s22  ;;  %v2422_v29 = vcombine.low %v2409_v5, %v2410_v60  ;;  %v2421_v50 = vcombine.low %v2407_v4, %v2408_v35  ;;  %vm9947_vm2 = vcmp.lt.s32.totalorder %v7232_v6, 27  ;;  %vm9948_vm14 = vcmp.lt.s32.totalorder %v7220_v11, 27 }
 0x189   : > { %v2523_v7 = vpop.permute.xlu1 %2522  ;;  %vm9949_vm4 = vcmp.lt.s32.totalorder %v7218_v19, 27  ;;  %vm9950_vm15 = vcmp.ge.s32.totalorder %v7270_v15, 1  ;;  %vm9951_vm11 = vcmp.ge.s32.totalorder %v7268_v23, 1  ;;  %vm2665_vm6 = vcmask 211968  }
 0x18a   : > { %v2521_v26 = vpop.permute.xlu0 %2520  ;;  %v8374_v46 = vrot.slane %v2421_v50, %v7286_v16  ;;  %vm9959_vm5 = vcmp.lt.s32.totalorder %v7232_v6, 25  ;;  %vm9963_vm10 = vcmp.lt.s32.totalorder %v7268_v23, 27  ;;  %vm9977_vm9 = vcmp.ge.s32.totalorder %v7218_v19, 2 }
 0x18b   : > { %v2535_v1 = vsel %vm2534_vm13, %v2519_v41, %v2521_v26  ;;  %v2536_v59 = vsel %vm2534_vm13, %v2521_v26, %v2523_v7  ;;  %v8363_v26 = vrot.slane %v2422_v29, %v7286_v16 }
 0x18c   : > { %v2549_v21 = vsel %vm9946_vm3, %v2535_v1, 0.0  ;;  %v2550_v42 = vsel %vm9947_vm2, %v2536_v59, 0.0  ;;  %vm2796_vm3 = vcmask 203776   ;;  %vm2927_vm2 = vcmask 23552   ;;  %6258 = vrot.lane.b32.xlu1 %v9941_v54, %s6625_s10 }
 0x18d   : > { %v8275_v52 = vpop.permute.xlu1 %2526  ;;  %v2563_v49 = vcombine.low %v2549_v21, %v2550_v42 }
 0x18e   : > { %v2525_v45 = vpop.permute.xlu0 %2524 }
 0x18f   : > { %v2537_v44 = vsel %vm2534_vm13, %v2523_v7, %v2525_v45  ;;  %v2538_v3 = vsel %vm2534_vm13, %v2525_v45, %v8275_v52  ;;  %v2397_v7 = vsel %vm2392_vm0, %v8271_v55, %v8269_v2  ;;  %v8367_v45 = vsel %vm9950_vm15, %v2398_v28, 0.0 }
 0x190   : > { %v2551_v34 = vsel %vm9948_vm14, %v2537_v44, 0.0  ;;  %v2552_v41 = vsel %vm9949_vm4, %v2538_v3, 0.0  ;;  %v8378_v62 = vsel %vm9951_vm11, %v2397_v7, 0.0  ;;  %v2452_v2 = vcombine.low %v8374_v46, %v8363_v26 }
 0x191   : > { %v8277_v51 = vpop.permute.xlu1 %2530  ;;  %v2564_v31 = vcombine.low %v2551_v34, %v2552_v41  ;;  %v2423_v55 = vcombine.low %v8378_v62, %v8367_v45  ;;  %v8388_v22 = vrot.slane %v2563_v49, %v7286_v16  ;;  %vm9952_vm14 = vcmp.lt.s32.totalorder %v7218_v19, 26 }
 0x192   : > { %v8279_v10 = vpop.permute.xlu0 %2528  ;;  %vm9953_vm4 = vcmp.lt.s32.totalorder %v7220_v11, 25  ;;  %vm9954_vm15 = vcmp.lt.s32.totalorder %v7218_v19, 25  ;;  %vm9955_vm11 = vcmp.lt.s32.totalorder %v7232_v6, 26 }
 0x193   : > { %v8391_v60 = vrot.slane %v2564_v31, %v7286_v16  ;;  %v2539_v44 = vsel %vm2534_vm13, %v8275_v52, %v8279_v10  ;;  %v2540_v21 = vsel %vm2534_vm13, %v8279_v10, %v8277_v51 }
 0x195   : > { %v8281_v39 = vpop.permute.xlu1 %2651 }
 0x196   : > { %v8283_v58 = vpop.permute.xlu0 %2649 }
 0x199   : > { %v8285_v17 = vpop.permute.xlu1 %2655 }
 0x19a   : > { %v8287_v25 = vpop.permute.xlu0 %2653 }
 0x19b   : > { %v2667_v3 = vsel %vm2665_vm6, %v8281_v39, %v8287_v25  ;;  %v2668_v4 = vsel %vm2665_vm6, %v8287_v25, %v8285_v17 }
 0x19d   : > { %v8293_v32 = vpop.permute.xlu1 %2659 }
 0x19e   : > { %v8295_v14 = vpop.permute.xlu0 %2657 }
 0x19f   : > { %v2669_v56 = vsel %vm2665_vm6, %v8285_v17, %v8295_v14 }
 0x1a0   : > { %v2683_v50 = vsel %vm9952_vm14, %v2669_v56, 0.0  ;;  %vm9956_vm14 = vcmp.lt.s32.totalorder %v7220_v11, 26 }
 0x1a1   : > { %v8297_v40 = vpop.permute.xlu1 %2780 }
 0x1a2   : > { %v8299_v20 = vpop.permute.xlu0 %2661 }
 0x1a5   : > { %v8303_v0 = vpop.permute.xlu1 %2784 }
 0x1a6   : > { %v8305_v9 = vpop.permute.xlu0 %2782 }
 0x1a7   : > { %v2797_v52 = vsel %vm2796_vm3, %v8297_v40, %v8305_v9  ;;  %v2798_v28 = vsel %vm2796_vm3, %v8305_v9, %v8303_v0  ;;  %v2681_v40 = vsel %vm9955_vm11, %v2667_v3, 0.0  ;;  %vm9960_vm11 = vcmp.lt.s32.totalorder %v7224_v61, 26 }
 0x1a8   : > { %v2812_v10 = vsel %vm9959_vm5, %v2798_v28, 0.0  ;;  %v2671_v3 = vsel %vm2665_vm6, %v8293_v32, %v8299_v20  ;;  %vm9964_vm5 = vcmp.lt.s32.totalorder %v7270_v15, 27 }
 0x1a9   : > { %v8307_v24 = vpop.permute.xlu1 %2788 }
 0x1aa   : > { %v2787_v8 = vpop.permute.xlu0 %2786 }
 0x1ab   : > { %v2799_v35 = vsel %vm2796_vm3, %v8303_v0, %v2787_v8  ;;  %v2800_v5 = vsel %vm2796_vm3, %v2787_v8, %v8307_v24  ;;  %v2666_v8 = vsel %vm2665_vm6, %v8283_v58, %v8281_v39  ;;  %v2682_v0 = vsel %vm9956_vm14, %v2668_v4, 0.0 }
 0x1ac   : > { %v2813_v17 = vsel %vm9953_vm4, %v2799_v35, 0.0  ;;  %v2814_v25 = vsel %vm9954_vm15, %v2800_v5, 0.0  ;;  %vm9957_vm4 = vcmp.ge.s32.totalorder %v7218_v19, 3  ;;  %v2695_v41 = vcombine.low %v2682_v0, %v2683_v50 }
 0x1ad   : > { %v8311_v38 = vpop.permute.xlu1 %2792  ;;  %vm9958_vm15 = vcmp.lt.s32.totalorder %v7224_v61, 25  ;;  %v2680_v7 = vsel %vm9960_vm11, %v2666_v8, 0.0  ;;  %v2826_v49 = vcombine.low %v2813_v17, %v2814_v25  ;;  %vm9961_vm14 = vcmp.ge.s32.totalorder %v7232_v6, 3 }
 0x1ae   : > { %v8313_v43 = vpop.permute.xlu0 %2790  ;;  %v2553_v35 = vsel %vm9963_vm10, %v2539_v44, 0.0  ;;  %v2694_v5 = vcombine.low %v2680_v7, %v2681_v40  ;;  %v2710_v44 = vrot.slane %v2695_v41, %v7286_v16  ;;  %vm9966_vm10 = vcmp.lt.s32.totalorder %v7270_v15, 26 }
 0x1af   : > { %v2801_v28 = vsel %vm2796_vm3, %v8307_v24, %v8313_v43  ;;  %v2802_v17 = vsel %vm2796_vm3, %v8313_v43, %v8311_v38  ;;  %vm9967_vm11 = vcmp.lt.s32.totalorder %v7268_v23, 26 }
 0x1b0   : > { %v2703_v24 = vrot.slane %v2694_v5, %v7286_v16 }
 0x1b1   : > { %v8315_v37 = vpop.permute.xlu1 %2913 }
 0x1b2   : > { %v8317_v57 = vpop.permute.xlu0 %2911 }
 0x1b5   : > { %v2918_v12 = vpop.permute.xlu1 %2917 }
 0x1b6   : > { %v2916_v33 = vpop.permute.xlu0 %2915 }
 0x1b7   : > { %v2929_v39 = vsel %vm2927_vm2, %v8315_v37, %v2916_v33  ;;  %v2930_v58 = vsel %vm2927_vm2, %v2916_v33, %v2918_v12  ;;  %v2928_v33 = vsel %vm2927_vm2, %v8317_v57, %v8315_v37  ;;  %v2554_v37 = vsel %vm9964_vm5, %v2540_v21, 0.0 }
 0x1b8   : > { %v2943_v31 = vsel %vm9961_vm14, %v2929_v39, 0.0  ;;  %v2670_v57 = vsel %vm2665_vm6, %v8295_v14, %v8293_v32  ;;  %v2594_v32 = vcombine.low %v8388_v22, %v8391_v60  ;;  %v2685_v14 = vsel %vm9966_vm10, %v2671_v3, 0.0 }
 0x1b9   : > { %v8329_v47 = vpop.permute.xlu1 %2921  ;;  %v2841_v39 = vrot.slane %v2826_v49, %v7286_v16  ;;  %v2565_v21 = vcombine.low %v2553_v35, %v2554_v37  ;;  %v2684_v40 = vsel %vm9967_vm11, %v2670_v57, 0.0  ;;  %vm9968_vm14 = vcmp.lt.s32.totalorder %v7268_v23, 25 }
 0x1ba   : > { %v8331_v30 = vpop.permute.xlu0 %2919  ;;  %v2815_v22 = vsel %vm9968_vm14, %v2801_v28, 0.0  ;;  %vm9970_vm5 = vcmp.ge.s32.totalorder %v7270_v15, 3  ;;  %vm9971_vm10 = vcmp.ge.s32.totalorder %v7268_v23, 3  ;;  %vm3189_vm11 = vcmask 7168  }
 0x1bb   : > { %v2931_v29 = vsel %vm2927_vm2, %v2918_v12, %v8331_v30  ;;  %v2811_v12 = vsel %vm9958_vm15, %v2797_v52, 0.0  ;;  %vm9965_vm15 = vcmp.ge.s32.totalorder %v7224_v61, 3  ;;  %v8509_v3 = vrot.slane %v2594_v32, %v7286_v16 }
 0x1bc   : > { %v2945_v9 = vsel %vm9957_vm4, %v2931_v29, 0.0  ;;  %vm9962_vm4 = vcmp.ge.s32.totalorder %v7220_v11, 3  ;;  %v2825_v29 = vcombine.low %v2811_v12, %v2812_v10  ;;  %v2942_v8 = vsel %vm9965_vm15, %v2928_v33, 0.0 }
 0x1bd   : > { %v8347_v48 = vpop.permute.xlu1 %3042  ;;  %v2944_v56 = vsel %vm9962_vm4, %v2930_v58, 0.0  ;;  %v2956_v25 = vcombine.low %v2942_v8, %v2943_v31  ;;  %vm9969_vm4 = vcmp.lt.s32.totalorder %v7270_v15, 25  ;;  %v2725_v10 = vcombine.low %v2703_v24, %v2710_v44 }
 0x1be   : > { %v8349_v13 = vpop.permute.xlu0 %2923  ;;  %v2957_v4 = vcombine.low %v2944_v56, %v2945_v9  ;;  %v2834_v0 = vrot.slane %v2825_v29, %v7286_v16  ;;  %v2816_v60 = vsel %vm9969_vm4, %v2802_v17, 0.0  ;;  %v2932_v9 = vsel %vm2927_vm2, %v8331_v30, %v8329_v47 }
 0x1bf   : > { %v2933_v58 = vsel %vm2927_vm2, %v8329_v47, %v8349_v13  ;;  %v2696_v33 = vcombine.low %v2684_v40, %v2685_v14  ;;  %v2965_v7 = vrot.slane %v2956_v25, %v7286_v16  ;;  %vm3058_vm15 = vcmask 15360  }
 0x1c0   : > { %v2972_v43 = vrot.slane %v2957_v4, %v7286_v16  ;;  %v2947_v49 = vsel %vm9970_vm5, %v2933_v58, 0.0  ;;  %v2856_v31 = vcombine.low %v2834_v0, %v2841_v39  ;;  %v2827_v56 = vcombine.low %v2815_v22, %v2816_v60 }
 0x1c1   : > { %v8369_v36 = vpop.permute.xlu1 %3046  ;;  %v2946_v35 = vsel %vm9971_vm10, %v2932_v9, 0.0  ;;  %v2460_v47 = vrot.slane %v2452_v2, %v7286_v16  ;;  %v2444_v30 = vrot.slane %v2423_v55, %v7286_v16  ;;  %v2586_v29 = vrot.slane %v2565_v21, %v7286_v16 }
 0x1c2   : > { %v8371_v63 = vpop.permute.xlu0 %3044  ;;  %v2987_v5 = vcombine.low %v2965_v7, %v2972_v43  ;;  %v2958_v4 = vcombine.low %v2946_v35, %v2947_v49  ;;  %v8513_v8 = vrot.slane %v2725_v10, %v7286_v16  ;;  %v2717_v44 = vrot.slane %v2696_v33, %v7286_v16 }
 0x1c3   : > { %v3059_v26 = vsel %vm3058_vm15, %v8347_v48, %v8371_v63  ;;  %v8520_v45 = vrot.slane %v2856_v31, %v7286_v16  ;;  %v3060_v46 = vsel %vm3058_vm15, %v8371_v63, %v8369_v36  ;;  %v8528_v55 = vrot.slane %v2827_v56, %v7286_v16 }
 0x1c4   : > { %v8531_v28 = vrot.slane %v2987_v5, %v7286_v16  ;;  %v8540_v63 = vrot.slane %v2958_v4, %v7286_v16  ;;  %vm9972_vm14 = vcmp.ge.s32.totalorder %v7224_v61, 2  ;;  %vm9973_vm4 = vcmp.ge.s32.totalorder %v7232_v6, 2 }
 0x1c5   : > { %v8397_v1 = vpop.permute.xlu1 %3050  ;;  %v3073_v25 = vsel %vm9972_vm14, %v3059_v26, 0.0  ;;  %v3074_v21 = vsel %vm9973_vm4, %v3060_v46, 0.0  ;;  %vm9974_vm5 = vcmp.ge.s32.totalorder %v7232_v6, 1  ;;  %vm9975_vm10 = vcmp.ge.s32.totalorder %v7218_v19, 1 }
 0x1c6   : > { %v8399_v59 = vpop.permute.xlu0 %3048  ;;  %vm9976_vm14 = vcmp.ge.s32.totalorder %v7220_v11, 2  ;;  %vm9978_vm4 = vcmp.ge.s32.totalorder %v7224_v61, 1  ;;  %v3087_v9 = vcombine.low %v3073_v25, %v3074_v21 }
 0x1c7   : > { %v3061_v48 = vsel %vm3058_vm15, %v8369_v36, %v8399_v59  ;;  %v3062_v17 = vsel %vm3058_vm15, %v8399_v59, %v8397_v1 }
 0x1c8   : > { %v3075_v40 = vsel %vm9976_vm14, %v3061_v48, 0.0  ;;  %vm9982_vm14 = vcmp.ge.s32.totalorder %v7270_v15, 1 }
 0x1c9   : > { %v8439_v42 = vpop.permute.xlu1 %3054 }
 0x1ca   : > { %v8441_v34 = vpop.permute.xlu0 %3052 }
 0x1cb   : > { %v3064_v0 = vsel %vm3058_vm15, %v8441_v34, %v8439_v42 }
 0x1cd   : > { %v3176_v50 = vpop.permute.xlu1 %3175 }
 0x1ce   : > { %v3174_v52 = vpop.permute.xlu0 %3173 }
 0x1cf   : > { %v3190_v32 = vsel %vm3189_vm11, %v3174_v52, %v3176_v50  ;;  %v3063_v52 = vsel %vm3058_vm15, %v8397_v1, %v8441_v34 }
 0x1d1   : > { %v3180_v41 = vpop.permute.xlu1 %3179 }
 0x1d2   : > { %v3178_v12 = vpop.permute.xlu0 %3177 }
 0x1d3   : > { %v3191_v62 = vsel %vm3189_vm11, %v3176_v50, %v3178_v12  ;;  %v3192_v14 = vsel %vm3189_vm11, %v3178_v12, %v3180_v41  ;;  %v3076_v50 = vsel %vm9977_vm9, %v3062_v17, 0.0  ;;  %vm9980_vm9 = vcmp.ge.s32.totalorder %v7268_v23, 2 }
 0x1d4   : > { %v3205_v36 = vsel %vm9974_vm5, %v3191_v62, 0.0  ;;  %vm9979_vm5 = vcmp.ge.s32.totalorder %v7220_v11, 1  ;;  %v3088_v7 = vcombine.low %v3075_v40, %v3076_v50  ;;  %v3077_v56 = vsel %vm9980_vm9, %v3063_v52, 0.0 }
 0x1d5   : > { %v3184_v37 = vpop.permute.xlu1 %3183  ;;  %v3206_v22 = vsel %vm9979_vm5, %v3192_v14, 0.0  ;;  %vm9985_vm5 = vcmp.lt.s32.totalorder %v7629_v27, 25  ;;  %vm3319_vm9 = vcmask 195584  }
 0x1d6   : > { %v3182_v57 = vpop.permute.xlu0 %3181 }
 0x1d7   : > { %v3193_v2 = vsel %vm3189_vm11, %v3180_v41, %v3182_v57  ;;  %v3194_v49 = vsel %vm3189_vm11, %v3182_v57, %v3184_v37 }
 0x1d8   : > { %v3207_v59 = vsel %vm9975_vm10, %v3193_v2, 0.0  ;;  %vm9981_vm10 = vcmp.ge.s32.totalorder %v7270_v15, 2 }
 0x1d9   : > { %v2391_v39 = vpop.permute.xlu1 %2390  ;;  %v3219_v12 = vcombine.low %v3206_v22, %v3207_v59  ;;  %v3078_v35 = vsel %vm9981_vm10, %v3064_v0, 0.0  ;;  %vm4932_vm10 = vcmask 261120  }
 0x1da   : > { %v3186_v58 = vpop.permute.xlu0 %3185  ;;  %v2399_v24 = vsel %vm2392_vm0, %v8273_v18, %v2391_v39  ;;  %v3204_v18 = vsel %vm9978_vm4, %v3190_v32, 0.0  ;;  %vm9984_vm4 = vcmp.ge.s32.totalorder %v7629_v27, 3 }
 0x1db   : > { %v2413_v43 = vsel %vm727_vm7, %v2399_v24, 0.0  ;;  %v3218_v41 = vcombine.low %v3204_v18, %v3205_v36  ;;  %v3195_v1 = vsel %vm3189_vm11, %v3184_v37, %v3186_v58  ;;  %v3234_v62 = vrot.slane %v3219_v12, %v7286_v16 }
 0x1dc   : > { %v2451_v60 = vrot.slane %v2413_v43, %v7286_v16  ;;  %v3096_v24 = vrot.slane %v3087_v9, %v7286_v16 }
 0x1dd   : > { %v2664_v10 = vpop.permute.xlu1 %2663  ;;  %v3227_v57 = vrot.slane %v3218_v41, %v7286_v16 }
 0x1de   : > { %v2533_v33 = vpop.permute.xlu0 %2532  ;;  %v2453_v31 = vcombine.low %v2444_v30, %v2451_v60  ;;  %v2672_v34 = vsel %vm2665_vm6, %v8299_v20, %v2664_v10  ;;  %v3209_v30 = vsel %vm9982_vm14, %v3195_v1, 0.0  ;;  %vm9983_vm6 = vcmp.ge.s32.totalorder %v7268_v23, 1 }
 0x1df   : > { %v2686_v5 = vsel %vm1014_vm12, %v2672_v34, 0.0  ;;  %v2541_v4 = vsel %vm2534_vm13, %v8277_v51, %v2533_v33  ;;  %v3208_v46 = vsel %vm9983_vm6, %v3194_v49, 0.0  ;;  %vm1681_vm12 = vcmask 457728  }
 0x1e0   : > { %v2467_v26 = vrot.slane %v2453_v31, %v7286_v16  ;;  %v2724_v37 = vrot.slane %v2686_v5, %v7286_v16  ;;  %v2555_v20 = vsel %vm9766_vm8, %v2541_v4, 0.0  ;;  %v3220_v39 = vcombine.low %v3208_v46, %v3209_v30 }
 0x1e1   : > { %v2593_v2 = vrot.slane %v2555_v20, %v7286_v16  ;;  %v2926_v51 = vpop.permute.xlu1 %2925  ;;  %v3249_v40 = vcombine.low %v3227_v57, %v3234_v62  ;;  %vm9988_vm14 = vcmp.ge.s32.totalorder %v7232_v6, 1 }
 0x1e2   : > { %v2795_v48 = vpop.permute.xlu0 %2794  ;;  %v2468_v17 = vcombine.low %v2460_v47, %v2467_v26  ;;  %v2726_v25 = vcombine.low %v2717_v44, %v2724_v37  ;;  %v2934_v32 = vsel %vm2927_vm2, %v8349_v13, %v2926_v51  ;;  %v3089_v44 = vcombine.low %v3077_v56, %v3078_v35  ;;  %vm9015_vm6 = vmpackc.low %vm9988_vm14, %vm9988_vm14 }
 0x1e3   : > { %v2803_v14 = vsel %vm2796_vm3, %v8311_v38, %v2795_v48  ;;  %v2595_v21 = vcombine.low %v2586_v29, %v2593_v2  ;;  %v2948_v36 = vsel %vm9984_vm4, %v2934_v32, 0.0  ;;  %v3103_v29 = vrot.slane %v3088_v7, %v7286_v16 }
 0x1e4   : > { %v2817_v59 = vsel %vm9985_vm5, %v2803_v14, 0.0  ;;  %2471 = vst.msk [vmem:[#allocation3 + $0x70] ss:$8 sm:$0xf] %vm6689_vm1, %v2468_v17  ;;  %v2740_v13 = vrot.slane %v2726_v25, %v7286_v16  ;;  %v2986_v38 = vrot.slane %v2948_v36, %v7286_v16  ;;  %v3241_v9 = vrot.slane %v3220_v39, %v7286_v16 }
 0x1e5   : > { %2472 = vst.msk [vmem:[#allocation3 + $0x70] ss:$8 sm:$0x70] %vm6689_vm1, %v2468_v17  ;;  %v2855_v47 = vrot.slane %v2817_v59, %v7286_v16  ;;  %v2609_v50 = vrot.slane %v2595_v21, %v7286_v16  ;;  %v3188_v52 = vpop.permute.xlu1 %3187  ;;  %vm9986_vm3 = vcmp.ge.s32.totalorder %v7629_v27, 2  ;;  %v3110_v10 = vrot.slane %v3089_v44, %v7286_v16 }
 0x1e6   : > { %v3057_v43 = vpop.permute.xlu0 %3056  ;;  %v2741_v0 = vcombine.low %v8513_v8, %v2740_v13  ;;  %v2988_v18 = vcombine.low %v8540_v63, %v2986_v38  ;;  %v3196_v60 = vsel %vm3189_vm11, %v3186_v58, %v3188_v52  ;;  %v3118_v58 = vcombine.low %v3096_v24, %v3103_v29  ;;  %v3270_v52 = vld [vmem:[%s9663_s1] sm:$0xff] }
 0x1e7   : > { %v2857_v22 = vcombine.low %v8528_v55, %v2855_v47  ;;  %v2610_v41 = vcombine.low %v8509_v3, %v2609_v50  ;;  %v3210_v12 = vsel %vm727_vm7, %v3196_v60, 0.0  ;;  %v3065_v1 = vsel %vm3058_vm15, %v8439_v42, %v3057_v43 }
 0x1e8   : > { %2744 = vst.msk [vmem:[#allocation3 + $0x73] ss:$8 sm:$0xf] %vm6689_vm1, %v2741_v0  ;;  %2745 = vst.msk [vmem:[#allocation3 + $0x73] ss:$8 sm:$0x70] %vm6689_vm1, %v2741_v0  ;;  %v3002_v8 = vrot.slane %v2988_v18, %v7286_v16  ;;  %v3248_v63 = vrot.slane %v3210_v12, %v7286_v16  ;;  %v3257_v4 = vrot.slane %v3249_v40, %v7286_v16 }
 0x1e9   : > { %v2871_v55 = vrot.slane %v2857_v22, %v7286_v16  ;;  %v3079_v3 = vsel %vm9986_vm3, %v3065_v1, 0.0  ;;  %2613 = vst.msk [vmem:[#allocation3 + $0x72] ss:$8 sm:$0xf] %vm6689_vm1, %v2610_v41  ;;  %v1679_v33 = vpop.permute.xlu1 %1678  ;;  %vm863_vm2 = vcmask 687104   ;;  %v3126_v26 = vrot.slane %v3118_v58, %v7286_v16 }
 0x1ea   : > { %2614 = vst.msk [vmem:[#allocation3 + $0x72] ss:$8 sm:$0x70] %vm6689_vm1, %v2610_v41  ;;  %v3117_v42 = vrot.slane %v3079_v3, %v7286_v16  ;;  %v861_v7 = vpop.permute.xlu0 %860  ;;  %v3003_v49 = vcombine.low %v8531_v28, %v3002_v8  ;;  %v3250_v34 = vcombine.low %v3241_v9, %v3248_v63  ;;  %v1680_v56 = vrot.slane %v1679_v33, 1  ;;  %v3271_v8 = vld [vmem:[%s9663_s1 + $0x8] sm:$0xff]  ;;  %v3272_v63 = vld [vmem:[%s9663_s1 + $0x10] sm:$0xff] }
 0x1eb   : > { %v2872_v31 = vcombine.low %v8520_v45, %v2871_v55  ;;  %v862_v5 = vrot.slane %v861_v7, 1  ;;  %vm2478_vm15 = vcmask 228352   ;;  %v3273_v3 = vld [vmem:[%s9663_s1 + $0x18] sm:$0xff]  ;;  %vm9994_vm5 = vcmp.ge.s32.totalorder %v7218_v19, 1 }
 0x1ec   : > { %v3119_v35 = vcombine.low %v3110_v10, %v3117_v42  ;;  %3006 = vst.msk [vmem:[#allocation3 + $0x75] ss:$8 sm:$0xf] %vm6689_vm1, %v3003_v49  ;;  %3007 = vst.msk [vmem:[#allocation3 + $0x75] ss:$8 sm:$0x70] %vm6689_vm1, %v3003_v49  ;;  %v3264_v45 = vrot.slane %v3250_v34, %v7286_v16  ;;  %v1682_v28 = vsel %vm1681_vm12, %v1679_v33, %v1680_v56 }
 0x1ed   : > { %2875 = vst.msk [vmem:[#allocation3 + $0x74] ss:$8 sm:$0xf] %vm6689_vm1, %v2872_v31  ;;  %2876 = vst.msk [vmem:[#allocation3 + $0x74] ss:$8 sm:$0x70] %vm6689_vm1, %v2872_v31  ;;  %v864_v37 = vsel %vm863_vm2, %v861_v7, %v862_v5 }
 0x1ee   : > { %v3133_v30 = vrot.slane %v3119_v35, %v7286_v16  ;;  %1685 = vst.msk [vmem:[#allocation3 + $0x3a] ss:$8 sm:$0xf] %vm6689_vm1, %v1682_v28  ;;  %1686 = vst.msk [vmem:[#allocation3 + $0x3a] ss:$8 sm:$0x70] %vm6689_vm1, %v1682_v28  ;;  %v2476_v20 = vpop.permute.xlu0 %2475  ;;  %v3265_v57 = vcombine.low %v3257_v4, %v3264_v45 }
 0x1ef   : > { %867 = vst.msk [vmem:[#allocation3 + $0x3] ss:$8 sm:$0xf] %vm6689_vm1, %v864_v37  ;;  %868 = vst.msk [vmem:[#allocation3 + $0x3] ss:$8 sm:$0x70] %vm6689_vm1, %v864_v37 }
 0x1f0   : > { %v2477_v46 = vrot.slane %v2476_v20, 1  ;;  %v3134_v62 = vcombine.low %v3126_v26, %v3133_v30  ;;  %3268 = vst.msk [vmem:[#allocation3 + $0x77] ss:$8 sm:$0xf] %vm6689_vm1, %v3265_v57  ;;  %vm9991_vm12 = vcmp.ge.s32.totalorder %v7224_v61, 1  ;;  %vm9047_vm3 = vmpackc.low %vm9994_vm5, %vm9994_vm5  ;;  %vm9997_vm2 = vcmp.ge.s32.totalorder %v7220_v11, 1 }
 0x1f1   : > { %3269 = vst.msk [vmem:[#allocation3 + $0x77] ss:$8 sm:$0x70] %vm6689_vm1, %v3265_v57  ;;  %vm9026_vm4 = vmpackc.low %vm9991_vm12, %vm9991_vm12  ;;  %vm10011_vm14 = vcmp.lt.s32.totalorder %v7232_v6, 27  ;;  %vm10015_vm5 = vcmp.lt.s32.totalorder %v7224_v61, 27 }
 0x1f2   : > { %v2479_v2 = vsel %vm2478_vm15, %v2476_v20, %v2477_v46  ;;  %3137 = vst.msk [vmem:[#allocation3 + $0x76] ss:$8 sm:$0xf] %vm6689_vm1, %v3134_v62  ;;  %3138 = vst.msk [vmem:[#allocation3 + $0x76] ss:$8 sm:$0x70] %vm6689_vm1, %v3134_v62 }
 0x1f3   : > { %2482 = vst.msk [vmem:[#allocation3 + $0x71] ss:$8 sm:$0xf] %vm6689_vm1, %v2479_v2  ;;  %2483 = vst.msk [vmem:[#allocation3 + $0x71] ss:$8 sm:$0x70] %vm6689_vm1, %v2479_v2 }
 0x1f4   : > { %vm9173_vm12 = vmpackc.low %vm10011_vm14, %vm10011_vm14  ;;  %vm10020_vm14 = vcmp.lt.s32.totalorder %v7218_v19, 27 }
 0x1f5   : > { %v3282_v51 = vld [vmem:[#allocation3 + $0x40] sm:$0xff]  ;;  %v3284_v48 = vld [vmem:[#allocation3 + $0x50] sm:$0xff]  ;;  %v3281_v17 = vld [vmem:[#allocation3 + $0x38] sm:$0xff] }
 0x1f6   : > { %v3275_v25 = vld [vmem:[#allocation3 + $0x8] sm:$0xff]  ;;  %v3277_v32 = vld [vmem:[#allocation3 + $0x18] sm:$0xff]  ;;  %v3274_v14 = vld [vmem:[#allocation3] sm:$0xff] }
 0x1f7   : > { %v5950_v39 = vpack.c.bf16 %v3282_v51, %v3275_v25  ;;  %v5954_v21 = vpack.c.bf16 %v3284_v48, %v3277_v32  ;;  %v5952_v36 = vpack.c.bf16 %v3281_v17, %v3274_v14  ;;  %v3276_v59 = vld [vmem:[#allocation3 + $0x10] sm:$0xff]  ;;  %v3283_v24 = vld [vmem:[#allocation3 + $0x48] sm:$0xff]  ;;  %v3286_v44 = vld [vmem:[#allocation3 + $0x60] sm:$0xff] }
 0x1f8   : > { %v5956_v13 = vpack.c.bf16 %v3283_v24, %v3276_v59  ;;  %v3279_v29 = vld [vmem:[#allocation3 + $0x28] sm:$0xff]  ;;  %v3280_v40 = vld [vmem:[#allocation3 + $0x30] sm:$0xff]  ;;  %v3278_v43 = vld [vmem:[#allocation3 + $0x20] sm:$0xff] }
 0x1f9   : > { %5951 = vmatprep.subr.bf16.mxu0 %v5950_v39  ;;  %5955 = vmatprep.subr.bf16.mxu1 %v5954_v21  ;;  %v3287_v50 = vld [vmem:[#allocation3 + $0x68] sm:$0xff]  ;;  %v3285_v0 = vld [vmem:[#allocation3 + $0x58] sm:$0xff]  ;;  %v5958_v60 = vpack.c.bf16 %v3286_v44, %v3279_v29 }
 0x1fa   : > { %v3289_v38 = vld [vmem:[#allocation3 + $0x78] sm:$0xff]  ;;  %v3291_v47 = vld [vmem:[#allocation3 + $0x88] sm:$0xff]  ;;  %5953 = vmatpush1.bf16.msra.mxu0 %v5952_v36  ;;  %5957 = vmatpush1.bf16.msra.mxu1 %v5956_v13  ;;  %v3288_v18 = vld [vmem:[#allocation3 + $0x70] sm:$0xff]  ;;  %v5962_v9 = vpack.c.bf16 %v3287_v50, %v3280_v40  ;;  %v5960_v41 = vpack.c.bf16 %v3285_v0, %v3278_v43  ;;  %v8716_v58 = vpop.permute.xlu1 %3301 }
 0x1fb   : > { %3336 = vmatprep.subr.mxu0 %v3289_v38  ;;  %3425 = vmatprep.subr.mxu1 %v3291_v47  ;;  %v3290_v22 = vld [vmem:[#allocation3 + $0x80] sm:$0xff]  ;;  %v3293_v12 = vld [vmem:[#allocation3 + $0x98] sm:$0xff]  ;;  %v3292_v55 = vld [vmem:[#allocation3 + $0x90] sm:$0xff] }
 0x1fc   : > { %v3294_v1 = vld [vmem:[#allocation3 + $0xa0] sm:$0xff] }
 0x1fd   : > { %v8726_v4 = vpop.permute.xlu0 %3306 }
 0x1fe   : > { %3337 = vmatpush1.msra.mxu0 %v3288_v18  ;;  %3426 = vmatpush1.msra.mxu1 %v3290_v22 }
 0x1ff   : > { %5785 = vmatmul.mubr.msk.f32.vlgmr.msra.gmra.mrb[0].mxu0 %vm3319_vm9, %v3270_v52  ;;  %5789 = vmatmul.mubr.msk.f32.vlgmr.msra.gmra.mrb[0].mxu1 %vm3319_vm9, %v3270_v52  ;;  %v8728_v45 = vpop.permute.xlu1 %3311 }
 0x200   : > { %5959 = vmatprep.subr.bf16.mxu0 %v5958_v60  ;;  %5963 = vmatprep.subr.bf16.mxu1 %v5962_v9 }
 0x201   : > { %5961 = vmatpush1.bf16.msra.mxu0 %v5960_v41  ;;  %5965 = vmatpush3.bf16.msra.mxu1 %v5962_v9 }
 0x202   : > { %3514 = vmatprep.subr.mxu0 %v3293_v12  ;;  %5931 = vmatprep.subr.mxu1 %v3294_v1 }
 0x203   : > { %3402 = vmatprep.mubr.f32.mxu0 %v9941_v54  ;;  %3491 = vmatprep.mubr.f32.mxu1 %v9941_v54  ;;  %v8778_v43 = vpop.permute.xlu1 %3316 }
 0x204   : > { %5786 = vmatmul.mubr.msk.f32.gmra.mrb[2].mxu0 %vm3319_vm9, %v3271_v8  ;;  %5790 = vmatmul.mubr.msk.f32.gmra.mrb[2].mxu1 %vm3319_vm9, %v3271_v8 }
 0x205   : > { %3515 = vmatpush1.msra.mxu0 %v3292_v55  ;;  %5932 = vmatpush3.msra.mxu1 %v3294_v1 }
 0x206   : > { %3408 = vmatprep.mubr.f32.mxu0 %v9941_v54  ;;  %3497 = vmatprep.mubr.f32.mxu1 %v9941_v54 }
 0x208   : > { %5787 = vmatmul.mubr.msk.f32.gmra.mrb[4].mxu0 %vm3319_vm9, %v3272_v63  ;;  %5791 = vmatmul.mubr.msk.f32.gmra.mrb[4].mxu1 %vm3319_vm9, %v3272_v63 }
 0x209   : > { %3414 = vmatprep.mubr.f32.mxu0 %v9941_v54  ;;  %3503 = vmatprep.mubr.f32.mxu1 %v9941_v54 }
 0x20c   : > { %5788 = vmatmul.mubr.msk.f32.gmra.mrb[6].mxu0 %vm3319_vm9, %v3273_v3  ;;  %5792 = vmatmul.mubr.msk.f32.gmra.mrb[6].mxu1 %vm3319_vm9, %v3273_v3 }
 0x20d   : > { %3574 = vmatprep.mubr.f32.mxu0 %v9941_v54  ;;  %5933 = vmatprep.mubr.msk.f32.mxu1 %vm3319_vm9, %v3270_v52 }
 0x210   : > { %5793 = vmatmul.mubr.msk.f32.vlgmr.msra.gmra.mrb[8].mxu0 %vm3319_vm9, %v3270_v52  ;;  %5934 = vmatmul.mubr.msk.f32.vlgmr.msra.gmra.mrb[8].mxu1 %vm3319_vm9, %v3271_v8 }
 0x211   : > { %3580 = vmatprep.mubr.f32.mxu0 %v9941_v54  ;;  %5936 = vmatprep.mubr.msk.f32.mxu1 %vm3319_vm9, %v3272_v63 }
 0x214   : > { %5794 = vmatmul.mubr.msk.f32.gmra.mrb[10].mxu0 %vm3319_vm9, %v3271_v8  ;;  %5937 = vmatmul.mubr.msk.f32.gmra.mrb[10].mxu1 %vm3319_vm9, %v3273_v3 }
 0x215   : > { %3586 = vmatprep.mubr.f32.mxu0 %v9941_v54 }
 0x218   : > { %5795 = vmatmul.mubr.msk.f32.gmra.mrb[12].mxu0 %vm3319_vm9, %v3272_v63 }
 0x219   : > { %3592 = vmatprep.mubr.f32.mxu0 %v9941_v54 }
 0x21c   : > { %5796 = vmatmul.mubr.msk.f32.gmra.mrb[14].mxu0 %vm3319_vm9, %v3273_v3  ;;  %vm9058_vm9 = vmpackc.low %vm9997_vm2, %vm9997_vm2 }
 0x21d   : > { %vm9192_vm2 = vmpackc.low %vm10015_vm5, %vm10015_vm5 }
 0x21e   : > { %vm9225_vm5 = vmpackc.low %vm10020_vm14, %vm10020_vm14  ;;  %vm10048_vm14 = vcmp.lt.s32.totalorder %v7629_v27, 27 }
 0x2d2   : > { %v3398_v10 = vpop.f32.mrb[0].mxu0  ;;  %v3487_v42 = vpop.f32.mrb[0].mxu1 }
 0x2d3   : > { %v3399_v33 = vadd.f32 %v3398_v10, %v8716_v58  ;;  %v3488_v7 = vadd.f32 %v3487_v42, %v8716_v58  ;;  %v3400_v49 = vpop.f32.mrb[1].mxu0  ;;  %v3489_v31 = vpop.f32.mrb[1].mxu1 }
 0x2d4   : > { %v8721_v34 = vadd.f32 %v3400_v49, %v8716_v58  ;;  %v8724_v56 = vadd.f32 %v3489_v31, %v8716_v58 }
 0x2d5   : > { %v3684_v35 = vmax.f32 %v3399_v33, 0.0  ;;  %v3686_v5 = vmax.f32 %v3488_v7, 0.0 }
 0x2d6   : > { %v3685_v28 = vmax.f32 %v8721_v34, 0.0  ;;  %v3687_v26 = vmax.f32 %v8724_v56, 0.0 }
 0x2d7   : > { %v3404_v30 = vpop.f32.mrb[2].mxu0  ;;  %v3493_v37 = vpop.f32.mrb[2].mxu1 }
 0x2d8   : > { %v3405_v20 = vadd.f32 %v3404_v30, %v8726_v4  ;;  %v3494_v57 = vadd.f32 %v3493_v37, %v8726_v4  ;;  %v3406_v46 = vpop.f32.mrb[3].mxu0  ;;  %v3495_v62 = vpop.f32.mrb[3].mxu1  ;;  %v8736_v2 = vpack.i.bf16 %v3687_v26, %v3686_v5  ;;  %v8740_v51 = vpack.i.bf16 %v3685_v28, %v3684_v35 }
 0x2d9   : > { %v8743_v48 = vadd.f32 %v3406_v46, %v8726_v4  ;;  %v8746_v17 = vadd.f32 %v3495_v62, %v8726_v4 }
 0x2da   : > { %v3691_v25 = vmax.f32 %v3405_v20, 0.0  ;;  %v3693_v32 = vmax.f32 %v3494_v57, 0.0  ;;  %6268 = vrot.lane.b32.xlu1 %v8736_v2, %s6615_s22  ;;  %6263 = vrot.lane.b32.xlu0 %v8740_v51, %s6615_s22 }
 0x2db   : > { %v3692_v14 = vmax.f32 %v8743_v48, 0.0  ;;  %v3694_v39 = vmax.f32 %v8746_v17, 0.0  ;;  %v3499_v21 = vpop.f32.mrb[4].mxu1  ;;  %v3410_v36 = vpop.f32.mrb[4].mxu0 }
 0x2dc   : > { %v8755_v59 = vadd.f32 %v3499_v21, %v8728_v45  ;;  %v8758_v24 = vadd.f32 %v3410_v36, %v8728_v45  ;;  %v3412_v13 = vpop.f32.mrb[5].mxu0  ;;  %v3501_v38 = vpop.f32.mrb[5].mxu1  ;;  %v8760_v47 = vpack.c.bf16 %v3691_v25, %v3684_v35  ;;  %v8762_v29 = vpack.c.bf16 %v3693_v32, %v3686_v5 }
 0x2dd   : > { %v8765_v44 = vadd.f32 %v3412_v13, %v8728_v45  ;;  %v8768_v40 = vadd.f32 %v3501_v38, %v8728_v45  ;;  %v8772_v50 = vpack.i.bf16 %v3692_v14, %v3691_v25  ;;  %v8776_v52 = vpack.i.bf16 %v3694_v39, %v3693_v32 }
 0x2de   : > { %v3700_v0 = vmax.f32 %v8755_v59, 0.0  ;;  %v3698_v18 = vmax.f32 %v8758_v24, 0.0  ;;  %6278 = vrot.lane.b32.xlu1 %v8736_v2, %s6625_s10  ;;  %6273 = vrot.lane.b32.xlu0 %v8740_v51, %s6625_s10 }
 0x2df   : > { %v3699_v22 = vmax.f32 %v8765_v44, 0.0  ;;  %v3701_v60 = vmax.f32 %v8768_v40, 0.0  ;;  %v3505_v9 = vpop.f32.mrb[6].mxu1  ;;  %v3416_v41 = vpop.f32.mrb[6].mxu0 }
 0x2e0   : > { %v8789_v12 = vadd.f32 %v3505_v9, %v8778_v43  ;;  %v3417_v1 = vadd.f32 %v3416_v41, %v8778_v43  ;;  %v3418_v8 = vpop.f32.mrb[7].mxu0  ;;  %v3507_v55 = vpop.f32.mrb[7].mxu1 }
 0x2e1   : > { %v3419_v63 = vadd.f32 %v3418_v8, %v8778_v43  ;;  %v3508_v3 = vadd.f32 %v3507_v55, %v8778_v43  ;;  %v8798_v10 = vpack.i.bf16 %v3701_v60, %v3700_v0  ;;  %v8802_v42 = vpack.i.bf16 %v3699_v22, %v3698_v18 }
 0x2e2   : > { %v3707_v33 = vmax.f32 %v8789_v12, 0.0  ;;  %v3705_v7 = vmax.f32 %v3417_v1, 0.0  ;;  %6283 = vrot.lane.b32.xlu0 %v8740_v51, %s6617_s23  ;;  %6288 = vrot.lane.b32.xlu1 %v8772_v50, %s6615_s22 }
 0x2e3   : > { %v3706_v49 = vmax.f32 %v3419_v63, 0.0  ;;  %v3708_v31 = vmax.f32 %v3508_v3, 0.0  ;;  %v3576_v35 = vpop.f32.mrb[8].mxu0  ;;  %v5935_v5 = vpop.f32.mrb[8].mxu1 }
 0x2e4   : > { %v3577_v30 = vadd.f32 %v3576_v35, %v8716_v58  ;;  %v3671_v37 = vadd.f32 %v5935_v5, %v8726_v4  ;;  %v3578_v20 = vpop.f32.mrb[9].mxu0  ;;  %v3665_v57 = vpop.f32.mrb[9].mxu1  ;;  %v8873_v56 = vpack.c.bf16 %v3707_v33, %v3700_v0 }
 0x2e5   : > { %v3579_v46 = vadd.f32 %v3578_v20, %v8716_v58  ;;  %v3666_v62 = vadd.f32 %v3665_v57, %v8716_v58  ;;  %v8813_v25 = vpack.i.bf16 %v3706_v49, %v3705_v7  ;;  %v8819_v36 = vpack.i.bf16 %v3708_v31, %v3707_v33  ;;  %v4909_v33 = vld [vmem:[%s9666_s4 + $0x8] sm:$0xff] }
 0x2e6   : > { %v3688_v32 = vmax.f32 %v3577_v30, 0.0  ;;  %v3697_v21 = vmax.f32 %v3671_v37, 0.0  ;;  %6293 = vrot.lane.b32.xlu0 %v8776_v52, %s6615_s22  ;;  %6298 = vrot.lane.b32.xlu1 %v8772_v50, %s6625_s10  ;;  %v8849_v34 = vpack.c.bf16 %v3706_v49, %v3699_v22 }
 0x2e7   : > { %v3689_v13 = vmax.f32 %v3579_v46, 0.0  ;;  %v3690_v38 = vmax.f32 %v3666_v62, 0.0  ;;  %v3582_v44 = vpop.f32.mrb[10].mxu0  ;;  %v5938_v9 = vpop.f32.mrb[10].mxu1  ;;  %v8838_v46 = vpack.c.bf16 %v3692_v14, %v3685_v28  ;;  %v8860_v14 = vpack.c.bf16 %v3705_v7, %v3698_v18 }
 0x2e8   : > { %v3583_v41 = vadd.f32 %v3582_v44, %v8726_v4  ;;  %v3681_v58 = vadd.f32 %v5938_v9, %v8778_v43  ;;  %v3584_v12 = vpop.f32.mrb[11].mxu0  ;;  %v3675_v1 = vpop.f32.mrb[11].mxu1 }
 0x2e9   : > { %v3585_v8 = vadd.f32 %v3584_v12, %v8726_v4  ;;  %v3676_v55 = vadd.f32 %v3675_v1, %v8728_v45  ;;  %v8825_v63 = vpack.i.bf16 %v3689_v13, %v3688_v32  ;;  %v8827_v3 = vpack.i.bf16 %v3697_v21, %v3690_v38 }
 0x2ea   : > { %v3695_v35 = vmax.f32 %v3583_v41, 0.0  ;;  %v3711_v5 = vmax.f32 %v3681_v58, 0.0  ;;  %6303 = vrot.lane.b32.xlu0 %v8776_v52, %s6625_s10  ;;  %6308 = vrot.lane.b32.xlu1 %v8772_v50, %s6617_s23  ;;  %v8864_v1 = vpack.c.bf16 %v3708_v31, %v3701_v60  ;;  %v8879_v24 = vpack.c.bf16 %v3697_v21, %v3690_v38  ;;  %v4910_v21 = vld [vmem:[%s9666_s4 + $0x10] sm:$0xff] }
 0x2eb   : > { %v3696_v30 = vmax.f32 %v3585_v8, 0.0  ;;  %v3704_v37 = vmax.f32 %v3676_v55, 0.0  ;;  %v3588_v20 = vpop.f32.mrb[12].mxu0 }
 0x2ec   : > { %v3589_v57 = vadd.f32 %v3588_v20, %v8728_v45  ;;  %v3590_v4 = vpop.f32.mrb[13].mxu0 }
 0x2ed   : > { %v3591_v62 = vadd.f32 %v3590_v4, %v8728_v45  ;;  %v8841_v44 = vpack.i.bf16 %v3696_v30, %v3695_v35  ;;  %v8843_v9 = vpack.i.bf16 %v3711_v5, %v3704_v37  ;;  %v8856_v45 = vpack.c.bf16 %v3694_v39, %v3687_v26 }
 0x2ee   : > { %v3702_v41 = vmax.f32 %v3589_v57, 0.0  ;;  %6318 = vrot.lane.b32.xlu0 %v8798_v10, %s6615_s22  ;;  %6313 = vrot.lane.b32.xlu1 %v8802_v42, %s6615_s22  ;;  %v8875_v26 = vpack.c.bf16 %v3696_v30, %v3689_v13  ;;  %v8877_v39 = vpack.c.bf16 %v3695_v35, %v3688_v32  ;;  %v8881_v40 = vpack.c.bf16 %v3711_v5, %v3704_v37 }
 0x2ef   : > { %v3703_v58 = vmax.f32 %v3591_v62, 0.0  ;;  %v3594_v12 = vpop.f32.mrb[14].mxu0 }
 0x2f0   : > { %v3595_v28 = vadd.f32 %v3594_v12, %v8778_v43  ;;  %v3596_v48 = vpop.f32.mrb[15].mxu0  ;;  %9987 = vst [vmem:[#allocation21_spill] sm:$0xff] %v8881_v40 }
 0x2f1   : > { %v3597_v22 = vadd.f32 %v3596_v48, %v8778_v43  ;;  %v6452_v49 = vpack.i.bf16 %v3703_v58, %v3702_v41 }
 0x2f2   : > { %v3709_v8 = vmax.f32 %v3595_v28, 0.0  ;;  %6328 = vrot.lane.b32.xlu0 %v8813_v25, %s6615_s22  ;;  %6323 = vrot.lane.b32.xlu1 %v8802_v42, %s6625_s10 }
 0x2f3   : > { %v3710_v17 = vmax.f32 %v3597_v22, 0.0 }
 0x2f4   : > { %v8883_v43 = vpack.c.bf16 %v3709_v8, %v3702_v41 }
 0x2f5   : > { %v6457_v18 = vpack.i.bf16 %v3710_v17, %v3709_v8  ;;  %v8889_v59 = vpack.c.bf16 %v3710_v17, %v3703_v58 }
 0x2f6   : > { %6338 = vrot.lane.b32.xlu0 %v8813_v25, %s6625_s10  ;;  %6333 = vrot.lane.b32.xlu1 %v8819_v36, %s6615_s22 }
 0x2fa   : > { %6343 = vrot.lane.b32.xlu0 %v8798_v10, %s6625_s10  ;;  %6348 = vrot.lane.b32.xlu1 %v8819_v36, %s6625_s10 }
 0x2fe   : > { %6353 = vrot.lane.b32.xlu0 %v9941_v54, %s6617_s23  ;;  %6358 = vrot.lane.b32.xlu1 %v8802_v42, %s6617_s23 }
 0x302   : > { %6363 = vrot.lane.b32.xlu0 %v8813_v25, %s6617_s23  ;;  %6368 = vrot.lane.b32.xlu1 %v8736_v2, %s6617_s23 }
 0x306   : > { %6373 = vrot.lane.b32.xlu0 %v8776_v52, %s6617_s23  ;;  %6378 = vrot.lane.b32.xlu1 %v9941_v54, %s6617_s23 }
 0x30a   : > { %6383 = vrot.lane.b32.xlu0 %v8740_v51, %s6622_s30  ;;  %6388 = vrot.lane.b32.xlu1 %v8772_v50, %s6622_s30  ;;  %v8930_v51 = vld [vmem:[%s9665_s3 + $0x8] sm:$0xff]  ;;  %v6244_v50 = vpop.permute.xlu0 %6243 }
 0x30b   : > { %5801 = vmatprep.mubr.msk.f32.mxu0 %vm4932_vm10, %v8930_v51  ;;  %5805 = vmatprep.mubr.msk.f32.mxu1 %vm4932_vm10, %v8930_v51  ;;  %v6246_v55 = vunpack.i.h.bf16 %v6244_v50 }
 0x30e   : > { %6393 = vrot.lane.b32.xlu0 %v8798_v10, %s6617_s23  ;;  %6398 = vrot.lane.b32.xlu1 %v8819_v36, %s6617_s23  ;;  %v8978_v0 = vpop.permute.xlu0 %6253 }
 0x312   : > { %6403 = vrot.lane.b32.xlu0 %v9941_v54, %s6622_s30  ;;  %6408 = vrot.lane.b32.xlu1 %v8802_v42, %s6622_s30  ;;  %v4908_v42 = vld [vmem:[%s9666_s4] sm:$0xff] }
 0x316   : > { %6413 = vrot.lane.b32.xlu0 %v8813_v25, %s6622_s30  ;;  %6418 = vrot.lane.b32.xlu1 %v8736_v2, %s6622_s30  ;;  %v8966_v2 = vpop.permute.xlu1 %6248 }
 0x31a   : > { %6423 = vrot.lane.b32.xlu0 %v8776_v52, %s6622_s30  ;;  %6428 = vrot.lane.b32.xlu1 %v9941_v54, %s6622_s30  ;;  %v8976_v52 = vpop.permute.xlu1 %6258 }
 0x31e   : > { %6433 = vrot.lane.b32.xlu0 %v8798_v10, %s6622_s30  ;;  %6438 = vrot.lane.b32.xlu1 %v8819_v36, %s6622_s30  ;;  %v4911_v36 = vld [vmem:[%s9666_s4 + $0x18] sm:$0xff] }
 0x322   : > { %6443 = vrot.lane.b32.xlu0 %v8825_v63, %s6615_s22  ;;  %6448 = vrot.lane.b32.xlu1 %v8841_v44, %s6615_s22 }
 0x326   : > { %6453 = vrot.lane.b32.xlu0 %v6452_v49, %s6615_s22  ;;  %6458 = vrot.lane.b32.xlu1 %v6457_v18, %s6615_s22 }
 0x32a   : > { %6463 = vrot.lane.b32.xlu0 %v8827_v3, %s6615_s22  ;;  %6468 = vrot.lane.b32.xlu1 %v8825_v63, %s6625_s10 }
 0x32e   : > { %6473 = vrot.lane.b32.xlu0 %v8841_v44, %s6625_s10  ;;  %6478 = vrot.lane.b32.xlu1 %v8843_v9, %s6615_s22 }
 0x332   : > { %6483 = vrot.lane.b32.xlu0 %v6452_v49, %s6625_s10  ;;  %6488 = vrot.lane.b32.xlu1 %v6457_v18, %s6625_s10 }
 0x336   : > { %6493 = vrot.lane.b32.xlu0 %v8827_v3, %s6625_s10  ;;  %6498 = vrot.lane.b32.xlu1 %v8825_v63, %s6617_s23 }
 0x33a   : > { %6503 = vrot.lane.b32.xlu0 %v8841_v44, %s6617_s23  ;;  %6508 = vrot.lane.b32.xlu1 %v8843_v9, %s6625_s10 }
 0x33e   : > { %6513 = vrot.lane.b32.xlu0 %v6452_v49, %s6617_s23  ;;  %6518 = vrot.lane.b32.xlu1 %v6457_v18, %s6617_s23 }
 0x342   : > { %6523 = vrot.lane.b32.xlu0 %v8827_v3, %s6617_s23  ;;  %6528 = vrot.lane.b32.xlu1 %v8825_v63, %s6622_s30  ;;  %v6245_v63 = vunpack.i.l.bf16 %v6244_v50 }
 0x346   : > { %6533 = vrot.lane.b32.xlu0 %v8841_v44, %s6622_s30  ;;  %6538 = vrot.lane.b32.xlu1 %v8843_v9, %s6617_s23 }
 0x34a   : > { %6543 = vrot.lane.b32.xlu0 %v6452_v49, %s6622_s30  ;;  %6548 = vrot.lane.b32.xlu1 %v6457_v18, %s6622_s30 }
 0x34c   : > { %v8982_v60 = vpop.permute.xlu1 %6268  ;;  %v6264_v10 = vpop.permute.xlu0 %6263 }
 0x34d   : > { %v6266_v25 = vunpack.i.h.bf16 %v6264_v10  ;;  %v6265_v32 = vunpack.i.l.bf16 %v6264_v10  ;;  %v9755_v5 = vunpack.i.h.bf16 %v8982_v60  ;;  %v6270_v30 = vunpack.i.l.bf16 %v8982_v60 }
 0x34e   : > { %6553 = vrot.lane.b32.xlu0 %v8827_v3, %s6622_s30  ;;  %6558 = vrot.lane.b32.xlu1 %v8843_v9, %s6622_s30  ;;  %s294_s30 = scalar_lea.vmem %s9669_s7, %s6188_s6 }
 0x34f   : > { %v3886_v37 = vsel %vm2392_vm0, %v6245_v63, %v6265_v32  ;;  %v3887_v20 = vsel %vm2392_vm0, %v6265_v32, %v6266_v25  ;;  %v3889_v22 = vsel %vm2392_vm0, %v6270_v30, %v9755_v5  ;;  %v3888_v49 = vsel %vm2392_vm0, %v6266_v25, %v6270_v30 }
 0x350   : > { %v8994_v7 = vpop.permute.xlu1 %6278  ;;  %v8996_v31 = vpop.permute.xlu0 %6273  ;;  %v6251_v30 = vunpack.i.h.bf16 %v8966_v2 }
 0x351   : > { %v9758_v63 = vunpack.i.h.bf16 %v8996_v31 }
 0x352   : > { %4914 = vperm.xlu0 %6241, %v4908_v42   ;;  %4919 = vperm.xlu1 %6240, %v4909_v33  }
 0x354   : > { %v6289_v13 = vpop.permute.xlu1 %6288  ;;  %v9004_v38 = vpop.permute.xlu0 %6283 }
 0x355   : > { %v6291_v3 = vunpack.i.h.bf16 %v6289_v13  ;;  %v6290_v35 = vunpack.i.l.bf16 %v6289_v13  ;;  %v9760_v13 = vunpack.i.h.bf16 %v8994_v7 }
 0x356   : > { %4924 = vperm.xlu0 %6241, %v4910_v21   ;;  %4929 = vperm.xlu1 %6240, %v4911_v36   ;;  %v6275_v36 = vunpack.i.l.bf16 %v8996_v31 }
 0x357   : > { %v3893_v57 = vsel %vm2392_vm0, %v6246_v55, %v6290_v35  ;;  %v3894_v4 = vsel %vm2392_vm0, %v6290_v35, %v6291_v3  ;;  %v9761_v55 = vunpack.i.l.bf16 %v8994_v7 }
 0x358   : > { %v5966_v44 = vpack.c.bf16 %v3894_v4, %v3887_v20  ;;  %v5969_v9 = vpack.c.bf16 %v3893_v57, %v3886_v37  ;;  %v9019_v41 = vpop.permute.xlu1 %6298  ;;  %v9021_v58 = vpop.permute.xlu0 %6293  ;;  %v6255_v37 = vunpack.i.l.bf16 %v8978_v0  ;;  %v6250_v20 = vunpack.i.l.bf16 %v8966_v2 }
 0x359   : > { %v9756_v28 = vunpack.i.h.bf16 %v9021_v58  ;;  %v6295_v48 = vunpack.i.l.bf16 %v9021_v58  ;;  %v9757_v32 = vunpack.i.h.bf16 %v9019_v41  ;;  %v6300_v21 = vunpack.i.l.bf16 %v9019_v41 }
 0x35a   : > { %5968 = vmatprep.subr.msk.bf16.mxu0 %vm9015_vm6, %v5966_v44  ;;  %v6261_v57 = vunpack.i.h.bf16 %v8976_v52 }
 0x35b   : > { %v3895_v8 = vsel %vm2392_vm0, %v6291_v3, %v6295_v48  ;;  %v3896_v17 = vsel %vm2392_vm0, %v6295_v48, %v9756_v28  ;;  %5971 = vmatpush1.bf16.msk.msra.mxu0 %vm9026_vm4, %v5969_v9  ;;  %v4134_v44 = vsel %vm2478_vm15, %v6300_v21, %v9757_v32  ;;  %v6256_v9 = vunpack.i.h.bf16 %v8978_v0 }
 0x35c   : > { %v6018_v50 = vpack.c.bf16 %v3896_v17, %v3889_v22  ;;  %v6021_v10 = vpack.c.bf16 %v3895_v8, %v3888_v49  ;;  %v9051_v42 = vpop.permute.xlu1 %6308  ;;  %v9053_v33 = vpop.permute.xlu0 %6303  ;;  %v4126_v48 = vsel %vm2478_vm15, %v6255_v37, %v6275_v36  ;;  %v4129_v0 = vsel %vm2478_vm15, %v9761_v55, %v9760_v13 }
 0x35d   : > { %v4133_v37 = vsel %vm2478_vm15, %v6256_v9, %v6300_v21  ;;  %v6305_v17 = vunpack.i.l.bf16 %v9053_v33 }
 0x35e   : > { %6020 = vmatprep.subr.msk.bf16.mxu1 %vm9047_vm3, %v6018_v50 }
 0x35f   : > { %6023 = vmatpush1.bf16.msk.msra.mxu1 %vm9058_vm9, %v6021_v10  ;;  %v4127_v10 = vsel %vm2478_vm15, %v6275_v36, %v9758_v63 }
 0x360   : > { %v6314_v3 = vpop.permute.xlu1 %6313  ;;  %v9072_v35 = vpop.permute.xlu0 %6318  ;;  %v5978_v28 = vpack.c.bf16 %v4134_v44, %v4127_v10 }
 0x361   : > { %v6316_v22 = vunpack.i.h.bf16 %v6314_v3  ;;  %v6315_v49 = vunpack.i.l.bf16 %v6314_v3  ;;  %v6320_v32 = vunpack.i.l.bf16 %v9072_v35 }
 0x363   : > { %v3900_v36 = vsel %vm2392_vm0, %v6250_v20, %v6315_v49  ;;  %v3901_v63 = vsel %vm2392_vm0, %v6315_v49, %v6316_v22 }
 0x364   : > { %v9086_v50 = vpop.permute.xlu1 %6323  ;;  %v6329_v2 = vpop.permute.xlu0 %6328 }
 0x365   : > { %v6331_v3 = vunpack.i.h.bf16 %v6329_v2  ;;  %v6330_v5 = vunpack.i.l.bf16 %v6329_v2  ;;  %v6326_v21 = vunpack.i.h.bf16 %v9086_v50  ;;  %v6325_v44 = vunpack.i.l.bf16 %v9086_v50 }
 0x367   : > { %v3907_v53 = vsel %vm2392_vm0, %v6251_v30, %v6330_v5  ;;  %v3908_v13 = vsel %vm2392_vm0, %v6330_v5, %v6331_v3  ;;  %v6310_v30 = vunpack.i.l.bf16 %v9051_v42  ;;  %v3902_v5 = vsel %vm2392_vm0, %v6316_v22, %v6320_v32 }
 0x368   : > { %v5972_v9 = vpack.c.bf16 %v3908_v13, %v3901_v63  ;;  %v5975_v2 = vpack.c.bf16 %v3907_v53, %v3900_v36  ;;  %v9107_v10 = vpop.permute.xlu1 %6333  ;;  %v6339_v55 = vpop.permute.xlu0 %6338  ;;  %v10000_v53 = vunpack.i.h.bf16 %v9053_v33  ;;  %v10001_v63 = vunpack.i.h.bf16 %v9072_v35 }
 0x369   : > { %v9765_v8 = vunpack.i.h.bf16 %v9107_v10  ;;  %v6335_v4 = vunpack.i.l.bf16 %v9107_v10  ;;  %v6341_v20 = vunpack.i.h.bf16 %v6339_v55  ;;  %v6340_v16 = vunpack.i.l.bf16 %v6339_v55 }
 0x36a   : > { %5974 = vmatprep.subr.msk.bf16.mxu0 %vm9015_vm6, %v5972_v9  ;;  %v4136_v13 = vsel %vm2478_vm15, %v6305_v17, %v10000_v53  ;;  %v3903_v50 = vsel %vm2392_vm0, %v6320_v32, %v10001_v63  ;;  %v5980_v9 = vpack.c.bf16 %v4133_v37, %v4126_v48  ;;  %v4141_v32 = vsel %vm2478_vm15, %v6325_v44, %v6326_v21 }
 0x36b   : > { %v3909_v36 = vsel %vm2392_vm0, %v6331_v3, %v6335_v4  ;;  %v3910_v55 = vsel %vm2392_vm0, %v6335_v4, %v9765_v8  ;;  %5977 = vmatpush1.bf16.msk.msra.mxu0 %vm9026_vm4, %v5975_v2  ;;  %v4148_v22 = vsel %vm2478_vm15, %v6340_v16, %v6341_v20  ;;  %v10002_v8 = vunpack.i.h.bf16 %v9019_v41 }
 0x36c   : > { %v6024_v49 = vpack.c.bf16 %v3910_v55, %v3903_v50  ;;  %v6027_v54 = vpack.c.bf16 %v3909_v36, %v3902_v5  ;;  %v9129_v40 = vpop.permute.xlu1 %6348  ;;  %v9131_v53 = vpop.permute.xlu0 %6343  ;;  %5979 = vmatprep.subr.bf16.mxu0 %v5978_v28  ;;  %v4147_v37 = vsel %vm2478_vm15, %v6261_v57, %v6340_v16  ;;  %v5982_v28 = vpack.c.bf16 %v4148_v22, %v4141_v32 }
 0x36d   : > { %v6350_v63 = vunpack.i.l.bf16 %v9129_v40  ;;  %v6345_v2 = vunpack.i.l.bf16 %v9131_v53  ;;  %v4135_v48 = vsel %vm2478_vm15, %v10002_v8, %v6305_v17  ;;  %v6030_v5 = vpack.c.bf16 %v4136_v13, %v4129_v0 }
 0x36e   : > { %6026 = vmatprep.subr.msk.bf16.mxu1 %vm9047_vm3, %v6024_v49  ;;  %v10003_v50 = vunpack.i.l.bf16 %v8994_v7  ;;  %v10004_v36 = vunpack.i.h.bf16 %v8996_v31  ;;  %v10005_v3 = vunpack.i.h.bf16 %v9051_v42  ;;  %v10006_v16 = vunpack.i.h.bf16 %v9131_v53 }
 0x36f   : > { %5981 = vmatpush1.bf16.msra.mxu0 %v5980_v9  ;;  %6029 = vmatpush1.bf16.msk.msra.mxu1 %vm9058_vm9, %v6027_v54  ;;  %v10007_v57 = vunpack.i.h.bf16 %v9004_v38  ;;  %v10008_v8 = vunpack.i.l.bf16 %v9004_v38  ;;  %v10009_v17 = vunpack.i.l.bf16 %v8976_v52  ;;  %v10010_v54 = vunpack.i.h.bf16 %v9129_v40 }
 0x370   : > { %v4128_v55 = vsel %vm2478_vm15, %v10004_v36, %v10003_v50  ;;  %v4360_v4 = vsel %vm2534_vm13, %v6310_v30, %v10005_v3  ;;  %v4143_v41 = vsel %vm2478_vm15, %v6345_v2, %v10006_v16  ;;  %v9165_v49 = vpop.permute.xlu1 %6358  ;;  %v6354_v13 = vpop.permute.xlu0 %6353  ;;  %5983 = vmatprep.subr.bf16.mxu0 %v5982_v28  ;;  %6031 = vmatprep.subr.bf16.mxu1 %v6030_v5 }
 0x371   : > { %v4353_v31 = vsel %vm2534_vm13, %v10008_v8, %v10007_v57  ;;  %v4140_v0 = vsel %vm2478_vm15, %v10009_v17, %v6325_v44  ;;  %v4150_v22 = vsel %vm2478_vm15, %v6350_v63, %v10010_v54  ;;  %v6032_v9 = vpack.c.bf16 %v4135_v48, %v4128_v55 }
 0x372   : > { %v5984_v32 = vpack.c.bf16 %v4147_v37, %v4140_v0  ;;  %v6356_v3 = vunpack.i.h.bf16 %v6354_v13  ;;  %v6355_v50 = vunpack.i.l.bf16 %v6354_v13  ;;  %v5986_v44 = vpack.c.bf16 %v4360_v4, %v4353_v31 }
 0x373   : > { %v4149_v36 = vsel %vm2478_vm15, %v6341_v20, %v6350_v63  ;;  %v4142_v28 = vsel %vm2478_vm15, %v6326_v21, %v6345_v2  ;;  %v6034_v5 = vpack.c.bf16 %v4150_v22, %v4143_v41  ;;  %v6361_v16 = vunpack.i.h.bf16 %v9165_v49  ;;  %6033 = vmatpush1.bf16.msra.mxu1 %v6032_v9 }
 0x374   : > { %v6360_v48 = vunpack.i.l.bf16 %v9165_v49  ;;  %v4359_v37 = vsel %vm2534_vm13, %v6356_v3, %v6310_v30  ;;  %v10014_v55 = vmov %v10008_v8  ;;  %5985 = vmatpush1.bf16.msra.mxu0 %v5984_v32  ;;  %v9185_v8 = vpop.permute.xlu1 %6368  ;;  %v6364_v4 = vpop.permute.xlu0 %6363  ;;  %v6036_v20 = vpack.c.bf16 %v4149_v36, %v4142_v28 }
 0x375   : > { %v4352_v6 = vsel %vm2534_vm13, %v6355_v50, %v10014_v55  ;;  %5988 = vmatprep.subr.msk.bf16.mxu0 %vm9173_vm12, %v5986_v44  ;;  %6035 = vmatprep.subr.bf16.mxu1 %v6034_v5  ;;  %v6366_v30 = vunpack.i.h.bf16 %v6364_v4  ;;  %v6365_v63 = vunpack.i.l.bf16 %v6364_v4  ;;  %v6371_v2 = vunpack.i.h.bf16 %v9185_v8 }
 0x376   : > { %v5989_v57 = vpack.c.bf16 %v4359_v37, %v4352_v6  ;;  %v6370_v41 = vunpack.i.l.bf16 %v9185_v8  ;;  %v4367_v31 = vsel %vm2534_vm13, %v6360_v48, %v6361_v16  ;;  %v10018_v32 = vunpack.i.h.bf16 %v9004_v38 }
 0x377   : > { %v4374_v17 = vsel %vm2534_vm13, %v6365_v63, %v6366_v30  ;;  %6037 = vmatpush1.bf16.msra.mxu1 %v6036_v20  ;;  %v10019_v28 = vunpack.i.h.bf16 %v9051_v42 }
 0x378   : > { %5991 = vmatpush1.bf16.msk.msra.mxu0 %vm9192_vm2, %v5989_v57  ;;  %v5992_v61 = vpack.c.bf16 %v4374_v17, %v4367_v31  ;;  %v6379_v0 = vpop.permute.xlu1 %6378  ;;  %v9202_v49 = vpop.permute.xlu0 %6373  ;;  %v4354_v3 = vsel %vm2534_vm13, %v10018_v32, %v6370_v41  ;;  %v4355_v50 = vsel %vm2534_vm13, %v6370_v41, %v6371_v2 }
 0x379   : > { %v6381_v13 = vunpack.i.h.bf16 %v6379_v0  ;;  %v6380_v54 = vunpack.i.l.bf16 %v6379_v0  ;;  %v6376_v22 = vunpack.i.h.bf16 %v9202_v49  ;;  %v6375_v9 = vunpack.i.l.bf16 %v9202_v49 }
 0x37a   : > { %5994 = vmatprep.subr.msk.bf16.mxu0 %vm9173_vm12, %v5992_v61  ;;  %vm10023_vm12 = vcmp.lt.s32.totalorder %v7220_v11, 27 }
 0x37b   : > { %v4366_v44 = vsel %vm2534_vm13, %v6380_v54, %v6360_v48  ;;  %v4373_v36 = vsel %vm2534_vm13, %v6381_v13, %v6365_v63  ;;  %v4361_v5 = vsel %vm2534_vm13, %v10019_v28, %v6375_v9  ;;  %v4362_v38 = vsel %vm2534_vm13, %v6375_v9, %v6376_v22  ;;  %vm9232_vm8 = vmpackc.low %vm10023_vm12, %vm10023_vm12 }
 0x37c   : > { %v5995_v52 = vpack.c.bf16 %v4373_v36, %v4366_v44  ;;  %v6038_v55 = vpack.c.bf16 %v4362_v38, %v4355_v50  ;;  %v6041_v48 = vpack.c.bf16 %v4361_v5, %v4354_v3  ;;  %v6389_v6 = vpop.permute.xlu1 %6388  ;;  %v6384_v57 = vpop.permute.xlu0 %6383 }
 0x37d   : > { %v6391_v4 = vunpack.i.h.bf16 %v6389_v6  ;;  %v6390_v20 = vunpack.i.l.bf16 %v6389_v6  ;;  %v6386_v19 = vunpack.i.h.bf16 %v6384_v57  ;;  %v6385_v63 = vunpack.i.l.bf16 %v6384_v57 }
 0x37e   : > { %5997 = vmatpush1.bf16.msk.msra.mxu0 %vm9192_vm2, %v5995_v52  ;;  %6040 = vmatprep.subr.msk.bf16.mxu1 %vm9225_vm5, %v6038_v55 }
 0x37f   : > { %v4600_v41 = vsel %vm3189_vm11, %v6390_v20, %v6391_v4  ;;  %v4593_v31 = vsel %vm3189_vm11, %v6385_v63, %v6386_v19  ;;  %6043 = vmatpush1.bf16.msk.msra.mxu1 %vm9232_vm8, %v6041_v48 }
 0x380   : > { %v5998_v11 = vpack.c.bf16 %v4600_v41, %v4593_v31  ;;  %v9244_v17 = vpop.permute.xlu1 %6398  ;;  %v9246_v61 = vpop.permute.xlu0 %6393 }
 0x381   : > { %v6401_v0 = vunpack.i.h.bf16 %v9244_v17  ;;  %v6400_v21 = vunpack.i.l.bf16 %v9244_v17  ;;  %v6396_v13 = vunpack.i.h.bf16 %v9246_v61  ;;  %v6395_v54 = vunpack.i.l.bf16 %v9246_v61 }
 0x382   : > { %6000 = vmatprep.subr.msk.bf16.mxu0 %vm9015_vm6, %v5998_v11 }
 0x383   : > { %v4375_v9 = vsel %vm2534_vm13, %v6366_v30, %v6400_v21  ;;  %v4376_v32 = vsel %vm2534_vm13, %v6400_v21, %v6401_v0  ;;  %v4368_v3 = vsel %vm2534_vm13, %v6361_v16, %v6395_v54  ;;  %v4369_v50 = vsel %vm2534_vm13, %v6395_v54, %v6396_v13 }
 0x384   : > { %v6044_v44 = vpack.c.bf16 %v4376_v32, %v4369_v50  ;;  %v6047_v36 = vpack.c.bf16 %v4375_v9, %v4368_v3  ;;  %v6409_v28 = vpop.permute.xlu1 %6408  ;;  %v6404_v5 = vpop.permute.xlu0 %6403 }
 0x385   : > { %v6406_v38 = vunpack.i.h.bf16 %v6404_v5  ;;  %v6405_v52 = vunpack.i.l.bf16 %v6404_v5  ;;  %v6411_v30 = vunpack.i.h.bf16 %v6409_v28  ;;  %v6410_v55 = vunpack.i.l.bf16 %v6409_v28 }
 0x386   : > { %6046 = vmatprep.subr.msk.bf16.mxu1 %vm9225_vm5, %v6044_v44  ;;  %vm9518_vm5 = vmpackc.low %vm10048_vm14, %vm10048_vm14 }
 0x387   : > { %v4599_v48 = vsel %vm3189_vm11, %v6406_v38, %v6390_v20  ;;  %v4592_v6 = vsel %vm3189_vm11, %v6405_v52, %v6385_v63  ;;  %6049 = vmatpush1.bf16.msk.msra.mxu1 %vm9232_vm8, %v6047_v36  ;;  %v4607_v20 = vsel %vm3189_vm11, %v6410_v55, %v6411_v30  ;;  %vm10028_vm8 = vcmp.ge.s32.totalorder %v7270_v15, 1 }
 0x388   : > { %v6001_v16 = vpack.c.bf16 %v4599_v48, %v4592_v6  ;;  %v9268_v57 = vpop.permute.xlu1 %6418  ;;  %v6414_v41 = vpop.permute.xlu0 %6413 }
 0x389   : > { %v6416_v31 = vunpack.i.h.bf16 %v6414_v41  ;;  %v6415_v11 = vunpack.i.l.bf16 %v6414_v41  ;;  %v6421_v21 = vunpack.i.h.bf16 %v9268_v57  ;;  %v6420_v37 = vunpack.i.l.bf16 %v9268_v57 }
 0x38a   : > { %6003 = vmatpush1.bf16.msk.msra.mxu0 %vm9026_vm4, %v6001_v16 }
 0x38b   : > { %v4614_v63 = vsel %vm3189_vm11, %v6415_v11, %v6416_v31  ;;  %v4594_v36 = vsel %vm3189_vm11, %v6386_v19, %v6420_v37  ;;  %v4595_v28 = vsel %vm3189_vm11, %v6420_v37, %v6421_v21 }
 0x38c   : > { %v6004_v54 = vpack.c.bf16 %v4614_v63, %v4607_v20  ;;  %v6429_v42 = vpop.permute.xlu1 %6428  ;;  %v9276_v9 = vpop.permute.xlu0 %6423 }
 0x38d   : > { %v6431_v32 = vunpack.i.h.bf16 %v6429_v42  ;;  %v6430_v3 = vunpack.i.l.bf16 %v6429_v42  ;;  %v6426_v50 = vunpack.i.h.bf16 %v9276_v9  ;;  %v6425_v44 = vunpack.i.l.bf16 %v9276_v9 }
 0x38e   : > { %6006 = vmatprep.subr.msk.bf16.mxu0 %vm9015_vm6, %v6004_v54  ;;  %vm9332_vm6 = vmpackc.low %vm10028_vm8, %vm10028_vm8 }
 0x38f   : > { %v4606_v5 = vsel %vm3189_vm11, %v6430_v3, %v6410_v55  ;;  %v4613_v38 = vsel %vm3189_vm11, %v6431_v32, %v6415_v11  ;;  %v4601_v52 = vsel %vm3189_vm11, %v6391_v4, %v6425_v44  ;;  %v4602_v48 = vsel %vm3189_vm11, %v6425_v44, %v6426_v50 }
 0x390   : > { %v6007_v6 = vpack.c.bf16 %v4613_v38, %v4606_v5  ;;  %v6050_v16 = vpack.c.bf16 %v4602_v48, %v4595_v28  ;;  %v6053_v19 = vpack.c.bf16 %v4601_v52, %v4594_v36  ;;  %v9292_v41 = vpop.permute.xlu1 %6438  ;;  %v9294_v20 = vpop.permute.xlu0 %6433  ;;  %v10027_v52 = vunpack.i.h.bf16 %v8982_v60 }
 0x391   : > { %v6441_v62 = vunpack.i.h.bf16 %v9292_v41  ;;  %v6440_v37 = vunpack.i.l.bf16 %v9292_v41  ;;  %v6436_v55 = vunpack.i.h.bf16 %v9294_v20  ;;  %v6435_v11 = vunpack.i.l.bf16 %v9294_v20 }
 0x392   : > { %6009 = vmatpush1.bf16.msk.msra.mxu0 %vm9026_vm4, %v6007_v6  ;;  %6052 = vmatprep.subr.msk.bf16.mxu1 %vm9047_vm3, %v6050_v16  ;;  %vm10031_vm4 = vcmp.ge.s32.totalorder %v7268_v23, 1 }
 0x393   : > { %v4615_v4 = vsel %vm3189_vm11, %v6416_v31, %v6440_v37  ;;  %v4616_v63 = vsel %vm3189_vm11, %v6440_v37, %v6441_v62  ;;  %v4608_v54 = vsel %vm3189_vm11, %v6411_v30, %v6435_v11  ;;  %v4609_v42 = vsel %vm3189_vm11, %v6435_v11, %v6436_v55  ;;  %6011 = vmatprep.subr.bf16.mxu0 %v8838_v46 }
 0x394   : > { %v6056_v32 = vpack.c.bf16 %v4616_v63, %v4609_v42  ;;  %v6059_v12 = vpack.c.bf16 %v4615_v4, %v4608_v54  ;;  %6055 = vmatpush1.bf16.msk.msra.mxu1 %vm9058_vm9, %v6053_v19  ;;  %v6449_v3 = vpop.permute.xlu1 %6448  ;;  %v6444_v44 = vpop.permute.xlu0 %6443  ;;  %v10026_v30 = vunpack.i.h.bf16 %v9021_v58 }
 0x395   : > { %v6451_v31 = vunpack.i.h.bf16 %v6449_v3  ;;  %v6450_v36 = vunpack.i.l.bf16 %v6449_v3  ;;  %v6446_v28 = vunpack.i.h.bf16 %v6444_v44  ;;  %v6445_v5 = vunpack.i.l.bf16 %v6444_v44 }
 0x396   : > { %6013 = vmatpush1.bf16.msra.mxu0 %v8760_v47  ;;  %6058 = vmatprep.subr.msk.bf16.mxu1 %vm9047_vm3, %v6056_v32  ;;  %vm9350_vm3 = vmpackc.low %vm10031_vm4, %vm10031_vm4  ;;  %v10035_v44 = vunpack.i.h.bf16 %v9072_v35  ;;  %v9379_v35 = vld [vmem:[%s9665_s3 + $0x10] sm:$0xff] }
 0x397   : > { %v3897_v46 = vsel %vm2392_vm0, %v10026_v30, %v6450_v36  ;;  %v3898_v38 = vsel %vm2392_vm0, %v6450_v36, %v6451_v31  ;;  %v3890_v48 = vsel %vm2392_vm0, %v10027_v52, %v6445_v5  ;;  %v3891_v6 = vsel %vm2392_vm0, %v6445_v5, %v6446_v28  ;;  %6015 = vmatprep.subr.bf16.mxu0 %v8849_v34  ;;  %v9341_v34 = vld [vmem:[%s9665_s3] sm:$0xff] }
 0x398   : > { %v6070_v16 = vpack.c.bf16 %v3898_v38, %v3891_v6  ;;  %v6073_v19 = vpack.c.bf16 %v3897_v46, %v3890_v48  ;;  %6061 = vmatpush1.bf16.msk.msra.mxu1 %vm9058_vm9, %v6059_v12  ;;  %v6459_v47 = vpop.permute.xlu1 %6458  ;;  %v6454_v18 = vpop.permute.xlu0 %6453  ;;  %v10034_v12 = vunpack.i.h.bf16 %v9107_v10  ;;  %v9388_v38 = vld [vmem:[%s9665_s3 + $0x28] sm:$0xff]  ;;  %vm9396_vm9 = vmpackc.low %vm727_vm7, %vm727_vm7  ;;  %vm10042_vm7 = vcmp.lt.s32.totalorder %v7270_v15, 27 }
 0x399   : > { %v6461_v60 = vunpack.i.h.bf16 %v6459_v47  ;;  %v6460_v37 = vunpack.i.l.bf16 %v6459_v47  ;;  %v6456_v11 = vunpack.i.h.bf16 %v6454_v18  ;;  %v6455_v4 = vunpack.i.l.bf16 %v6454_v18  ;;  %6063 = vmatprep.subr.bf16.mxu1 %v8856_v45  ;;  %v9357_v45 = vld [vmem:[%s9665_s3 + $0x18] sm:$0xff] }
 0x39a   : > { %6017 = vmatpush1.bf16.msra.mxu0 %v8860_v14 }
 0x39b   : > { %v3912_v25 = vsel %vm2392_vm0, %v6460_v37, %v6461_v60  ;;  %v3905_v63 = vsel %vm2392_vm0, %v6455_v4, %v6456_v11  ;;  %6072 = vmatprep.subr.msk.bf16.mxu0 %vm9332_vm6, %v6070_v16  ;;  %v3911_v3 = vsel %vm2392_vm0, %v10034_v12, %v6460_v37  ;;  %v3904_v36 = vsel %vm2392_vm0, %v10035_v44, %v6455_v4  ;;  %v9425_v44 = vld [vmem:[%s9665_s3 + $0x38] sm:$0xff] }
 0x39c   : > { %v6076_v14 = vpack.c.bf16 %v3912_v25, %v3905_v63  ;;  %6065 = vmatpush1.bf16.msra.mxu1 %v8762_v29  ;;  %v9360_v42 = vpop.permute.xlu1 %6468  ;;  %v6464_v32 = vpop.permute.xlu0 %6463  ;;  %v6079_v52 = vpack.c.bf16 %v3911_v3, %v3904_v36  ;;  %v9410_v25 = vld [vmem:[%s9665_s3 + $0x20] sm:$0xff] }
 0x39d   : > { %v6466_v5 = vunpack.i.h.bf16 %v6464_v32  ;;  %v6465_v30 = vunpack.i.l.bf16 %v6464_v32  ;;  %6067 = vmatprep.subr.bf16.mxu1 %v8864_v1  ;;  %5010 = vmatmul.mubr.f32.vlgmr.msra.gmra.mrb[16].mxu0 %v9341_v34  ;;  %v6471_v46 = vunpack.i.h.bf16 %v9360_v42  ;;  %v6470_v29 = vunpack.i.l.bf16 %v9360_v42 }
 0x39e   : > { %6075 = vmatpush1.bf16.msk.msra.mxu0 %vm9350_vm3, %v6073_v19  ;;  %5802 = vmatprep.mubr.msk.f32.mxu0 %vm4932_vm10, %v9357_v45  ;;  %v10039_v32 = vunpack.i.h.bf16 %v9053_v33 }
 0x39f   : > { %v3899_v10 = vsel %vm2392_vm0, %v6451_v31, %v6466_v5  ;;  %v3892_v1 = vsel %vm2392_vm0, %v6446_v28, %v6465_v30  ;;  %6078 = vmatprep.subr.msk.bf16.mxu0 %vm9332_vm6, %v6076_v14  ;;  %v6626_v28 = vmov 0.0|0.0   ;;  %v4131_v63 = vsel %vm2478_vm15, %v6470_v29, %v6471_v46 }
 0x3a0   : > { %v6123_v48 = vpack.c.bf16 %v3899_v10, %v3892_v1  ;;  %6069 = vmatpush1.bf16.msra.mxu1 %v8873_v56  ;;  %v6479_v6 = vpop.permute.xlu1 %6478  ;;  %v6474_v16 = vpop.permute.xlu0 %6473  ;;  %v10038_v56 = vunpack.i.h.bf16 %v8994_v7 }
 0x3a1   : > { %v6481_v19 = vunpack.i.h.bf16 %v6479_v6  ;;  %v6480_v47 = vunpack.i.l.bf16 %v6479_v6  ;;  %v6476_v18 = vunpack.i.h.bf16 %v6474_v16  ;;  %v6475_v31 = vunpack.i.l.bf16 %v6474_v16  ;;  %5016 = vmatmul.mubr.f32.gmra.mrb[18].mxu0 %v9379_v35  ;;  %6122 = vmatprep.subr.bf16.mxu1 %v6626_v28 }
 0x3a2   : > { %v4130_v4 = vsel %vm2478_vm15, %v10038_v56, %v6470_v29  ;;  %6081 = vmatpush1.bf16.msk.msra.mxu0 %vm9350_vm3, %v6079_v52  ;;  %5803 = vmatprep.mubr.msk.f32.mxu0 %vm4932_vm10, %v9388_v38  ;;  %v9438_v52 = vld [vmem:[%s9665_s3 + $0x30] sm:$0xff]  ;;  %v10041_v16 = vunpack.i.h.bf16 %v9131_v53 }
 0x3a3   : > { %v3906_v14 = vsel %vm2392_vm0, %v6456_v11, %v6480_v47  ;;  %v3913_v7 = vsel %vm2392_vm0, %v6461_v60, %v6481_v19  ;;  %v4137_v12 = vsel %vm2478_vm15, %v10039_v32, %v6475_v31  ;;  %5099 = vmatmul.mubr.f32.vlgmr.msra.gmra.mrb[12].mxu1 %v9341_v34  ;;  %v4138_v3 = vsel %vm2478_vm15, %v6475_v31, %v6476_v18  ;;  %vm9482_vm0 = vmpackc.low %vm10042_vm7, %vm10042_vm7 }
 0x3a4   : > { %v6127_v36 = vpack.c.bf16 %v3913_v7, %v3906_v14  ;;  %v6084_v5 = vpack.c.bf16 %v4137_v12, %v4130_v4  ;;  %6125 = vmatpush1.bf16.msk.msra.mxu1 %vm9396_vm9, %v6123_v48  ;;  %v6489_v11 = vpop.permute.xlu1 %6488  ;;  %v6484_v60 = vpop.permute.xlu0 %6483  ;;  %5806 = vmatprep.mubr.msk.f32.mxu1 %vm4932_vm10, %v9357_v45  ;;  %v6082_v33 = vpack.c.bf16 %v4138_v3, %v4131_v63  ;;  %v10040_v48 = vunpack.i.h.bf16 %v9129_v40 }
 0x3a5   : > { %v6491_v30 = vunpack.i.h.bf16 %v6489_v11  ;;  %v6490_v29 = vunpack.i.l.bf16 %v6489_v11  ;;  %v6486_v10 = vunpack.i.h.bf16 %v6484_v60  ;;  %v6485_v1 = vunpack.i.l.bf16 %v6484_v60  ;;  %5022 = vmatmul.mubr.f32.gmra.mrb[20].mxu0 %v9410_v25  ;;  %6126 = vmatprep.subr.bf16.mxu1 %v6626_v28 }
 0x3a6   : > { %6083 = vmatprep.subr.bf16.mxu0 %v6082_v33  ;;  %5804 = vmatprep.mubr.msk.f32.mxu0 %vm4932_vm10, %v9425_v44 }
 0x3a7   : > { %v4151_v6 = vsel %vm2478_vm15, %v10040_v48, %v6490_v29  ;;  %v4144_v19 = vsel %vm2478_vm15, %v10041_v16, %v6485_v1  ;;  %5105 = vmatmul.mubr.f32.gmra.mrb[14].mxu1 %v9379_v35  ;;  %6085 = vmatpush1.bf16.msra.mxu0 %v6084_v5  ;;  %v4145_v47 = vsel %vm2478_vm15, %v6485_v1, %v6486_v10 }
 0x3a8   : > { %6129 = vmatpush1.bf16.msk.msra.mxu1 %vm9396_vm9, %v6127_v36  ;;  %v9450_v31 = vpop.permute.xlu1 %6498  ;;  %v6494_v56 = vpop.permute.xlu0 %6493  ;;  %5807 = vmatprep.mubr.msk.f32.mxu1 %vm4932_vm10, %v9388_v38  ;;  %v4152_v40 = vsel %vm2478_vm15, %v6490_v29, %v6491_v30  ;;  %v6088_v4 = vpack.c.bf16 %v4151_v6, %v4144_v19 }
 0x3a9   : > { %v6496_v53 = vunpack.i.h.bf16 %v6494_v56  ;;  %v6495_v63 = vunpack.i.l.bf16 %v6494_v56  ;;  %5028 = vmatmul.mubr.f32.gmra.mrb[22].mxu0 %v9438_v52  ;;  %6130 = vmatprep.subr.bf16.mxu1 %v6626_v28  ;;  %v6501_v14 = vunpack.i.h.bf16 %v9450_v31  ;;  %v6500_v7 = vunpack.i.l.bf16 %v9450_v31 }
 0x3aa   : > { %v6086_v32 = vpack.c.bf16 %v4152_v40, %v4145_v47  ;;  %5809 = vmatprep.mubr.msk.f32.mxu0 %vm4932_vm10, %v8930_v51 }
 0x3ab   : > { %v4132_v12 = vsel %vm2478_vm15, %v6471_v46, %v6495_v63  ;;  %v4139_v3 = vsel %vm2478_vm15, %v6476_v18, %v6496_v53  ;;  %5111 = vmatmul.mubr.f32.gmra.mrb[16].mxu1 %v9410_v25  ;;  %v4356_v42 = vsel %vm2534_vm13, %v6371_v2, %v6500_v7  ;;  %v4357_v46 = vsel %vm2534_vm13, %v6500_v7, %v6501_v14 }
 0x3ac   : > { %v6131_v36 = vpack.c.bf16 %v4139_v3, %v4132_v12  ;;  %6087 = vmatprep.subr.bf16.mxu0 %v6086_v32  ;;  %v6509_v5 = vpop.permute.xlu1 %6508  ;;  %v6504_v11 = vpop.permute.xlu0 %6503  ;;  %5808 = vmatprep.mubr.msk.f32.mxu1 %vm4932_vm10, %v9425_v44 }
 0x3ad   : > { %6089 = vmatpush1.bf16.msra.mxu0 %v6088_v4  ;;  %v6511_v60 = vunpack.i.h.bf16 %v6509_v5  ;;  %v6510_v33 = vunpack.i.l.bf16 %v6509_v5  ;;  %v6506_v29 = vunpack.i.h.bf16 %v6504_v11  ;;  %v6505_v1 = vunpack.i.l.bf16 %v6504_v11 }
 0x3ae   : > { %6132 = vmatpush1.bf16.msra.mxu1 %v6131_v36 }
 0x3af   : > { %v4146_v18 = vsel %vm2478_vm15, %v6486_v10, %v6510_v33  ;;  %v4153_v48 = vsel %vm2478_vm15, %v6491_v30, %v6511_v60  ;;  %v4363_v6 = vsel %vm2534_vm13, %v6376_v22, %v6505_v1  ;;  %v4364_v16 = vsel %vm2534_vm13, %v6505_v1, %v6506_v29  ;;  %5117 = vmatmul.mubr.f32.gmra.mrb[18].mxu1 %v9438_v52 }
 0x3b0   : > { %v6134_v2 = vpack.c.bf16 %v4153_v48, %v4146_v18  ;;  %v6090_v19 = vpack.c.bf16 %v4364_v16, %v4357_v46  ;;  %v6093_v10 = vpack.c.bf16 %v4363_v6, %v4356_v42  ;;  %v6519_v47 = vpop.permute.xlu1 %6518  ;;  %v6514_v30 = vpop.permute.xlu0 %6513  ;;  %6133 = vmatprep.subr.bf16.mxu1 %v6626_v28  ;;  %vm10045_vm15 = vcmp.lt.s32.totalorder %v7268_v23, 27  ;;  %5813 = vmatprep.mubr.msk.f32.mxu1 %vm4932_vm10, %v8930_v51 }
 0x3b1   : > { %vm9490_vm2 = vmpackc.low %vm10045_vm15, %vm10045_vm15  ;;  %v6521_v15 = vunpack.i.h.bf16 %v6519_v47  ;;  %v6520_v22 = vunpack.i.l.bf16 %v6519_v47  ;;  %v6516_v31 = vunpack.i.h.bf16 %v6514_v30  ;;  %v6515_v56 = vunpack.i.l.bf16 %v6514_v30 }
 0x3b2   : > { %6092 = vmatprep.subr.msk.bf16.mxu0 %vm9482_vm0, %v6090_v19  ;;  %6135 = vmatpush1.bf16.msra.mxu1 %v6134_v2 }
 0x3b3   : > { %v4377_v23 = vsel %vm2534_vm13, %v6401_v0, %v6520_v22  ;;  %v4378_v40 = vsel %vm2534_vm13, %v6520_v22, %v6521_v15  ;;  %v4370_v4 = vsel %vm2534_vm13, %v6396_v13, %v6515_v56  ;;  %v4371_v51 = vsel %vm2534_vm13, %v6515_v56, %v6516_v31  ;;  %6095 = vmatpush1.bf16.msk.msra.mxu0 %vm9490_vm2, %v6093_v10 }
 0x3b4   : > { %v6096_v53 = vpack.c.bf16 %v4378_v40, %v4371_v51  ;;  %v6099_v63 = vpack.c.bf16 %v4377_v23, %v4370_v4  ;;  %v6529_v7 = vpop.permute.xlu1 %6528  ;;  %v6524_v32 = vpop.permute.xlu0 %6523  ;;  %6136 = vmatprep.subr.bf16.mxu1 %v6626_v28 }
 0x3b5   : > { %v6526_v17 = vunpack.i.h.bf16 %v6524_v32  ;;  %v6525_v12 = vunpack.i.l.bf16 %v6524_v32  ;;  %v6531_v0 = vunpack.i.h.bf16 %v6529_v7  ;;  %v6530_v3 = vunpack.i.l.bf16 %v6529_v7 }
 0x3b6   : > { %6098 = vmatprep.subr.msk.bf16.mxu0 %vm9482_vm0, %v6096_v53 }
 0x3b7   : > { %v4358_v61 = vsel %vm2534_vm13, %v6501_v14, %v6525_v12  ;;  %v4365_v13 = vsel %vm2534_vm13, %v6506_v29, %v6526_v17  ;;  %6101 = vmatpush1.bf16.msk.msra.mxu0 %vm9490_vm2, %v6099_v63  ;;  %v4596_v14 = vsel %vm3189_vm11, %v6421_v21, %v6530_v3  ;;  %v4597_v29 = vsel %vm3189_vm11, %v6530_v3, %v6531_v0 }
 0x3b8   : > { %v6137_v5 = vpack.c.bf16 %v4365_v13, %v4358_v61  ;;  %v6539_v11 = vpop.permute.xlu1 %6538  ;;  %v6534_v60 = vpop.permute.xlu0 %6533 }
 0x3b9   : > { %v6541_v33 = vunpack.i.h.bf16 %v6539_v11  ;;  %v6540_v1 = vunpack.i.l.bf16 %v6539_v11  ;;  %v6536_v42 = vunpack.i.h.bf16 %v6534_v60  ;;  %v6535_v46 = vunpack.i.l.bf16 %v6534_v60 }
 0x3ba   : > { %6139 = vmatpush1.bf16.msk.msra.mxu1 %vm9518_vm5, %v6137_v5 }
 0x3bb   : > { %v4372_v27 = vsel %vm2534_vm13, %v6516_v31, %v6540_v1  ;;  %v4379_v18 = vsel %vm2534_vm13, %v6521_v15, %v6541_v33  ;;  %v4603_v48 = vsel %vm3189_vm11, %v6426_v50, %v6535_v46  ;;  %v4604_v6 = vsel %vm3189_vm11, %v6535_v46, %v6536_v42  ;;  %6140 = vmatprep.subr.bf16.mxu1 %v6626_v28 }
 0x3bc   : > { %v6141_v57 = vpack.c.bf16 %v4379_v18, %v4372_v27  ;;  %v6102_v16 = vpack.c.bf16 %v4604_v6, %v4597_v29  ;;  %v6105_v21 = vpack.c.bf16 %v4603_v48, %v4596_v14  ;;  %v6549_v8 = vpop.permute.xlu1 %6548  ;;  %v6544_v2 = vpop.permute.xlu0 %6543  ;;  %vm6627_vm13 = vmmov 0  }
 0x3bd   : > { %v6551_v19 = vunpack.i.h.bf16 %v6549_v8  ;;  %v6550_v10 = vunpack.i.l.bf16 %v6549_v8  ;;  %v6546_v47 = vunpack.i.h.bf16 %v6544_v2  ;;  %v6545_v30 = vunpack.i.l.bf16 %v6544_v2 }
 0x3be   : > { %6104 = vmatprep.subr.msk.bf16.mxu0 %vm9332_vm6, %v6102_v16  ;;  %6143 = vmatpush1.bf16.msk.msra.mxu1 %vm9518_vm5, %v6141_v57 }
 0x3bf   : > { %v4617_v9 = vsel %vm3189_vm11, %v6441_v62, %v6550_v10  ;;  %v4618_v50 = vsel %vm3189_vm11, %v6550_v10, %v6551_v19  ;;  %v4610_v49 = vsel %vm3189_vm11, %v6436_v55, %v6545_v30  ;;  %v4611_v15 = vsel %vm3189_vm11, %v6545_v30, %v6546_v47  ;;  %6107 = vmatpush1.bf16.msk.msra.mxu0 %vm9350_vm3, %v6105_v21 }
 0x3c0   : > { %v6108_v22 = vpack.c.bf16 %v4618_v50, %v4611_v15  ;;  %v6111_v31 = vpack.c.bf16 %v4617_v9, %v4610_v49  ;;  %v6559_v56 = vpop.permute.xlu1 %6558  ;;  %v6554_v23 = vpop.permute.xlu0 %6553  ;;  %6144 = vmatprep.subr.bf16.mxu1 %v6626_v28 }
 0x3c1   : > { %v6561_v41 = vunpack.i.h.bf16 %v6559_v56  ;;  %v6560_v40 = vunpack.i.l.bf16 %v6559_v56  ;;  %v6556_v62 = vunpack.i.h.bf16 %v6554_v23  ;;  %v6555_v4 = vunpack.i.l.bf16 %v6554_v23 }
 0x3c2   : > { %6110 = vmatprep.subr.msk.bf16.mxu0 %vm9332_vm6, %v6108_v22 }
 0x3c3   : > { %v4598_v20 = vsel %vm3189_vm11, %v6531_v0, %v6555_v4  ;;  %v4605_v55 = vsel %vm3189_vm11, %v6536_v42, %v6556_v62  ;;  %6113 = vmatpush1.bf16.msk.msra.mxu0 %vm9350_vm3, %v6111_v31  ;;  %v4612_v53 = vsel %vm3189_vm11, %v6546_v47, %v6560_v40  ;;  %v4619_v63 = vsel %vm3189_vm11, %v6551_v19, %v6561_v41 }
 0x3c4   : > { %v6145_v51 = vpack.c.bf16 %v4605_v55, %v4598_v20  ;;  %6115 = vmatprep.subr.bf16.mxu0 %v8875_v26  ;;  %v6149_v58 = vpack.c.bf16 %v4619_v63, %v4612_v53  ;;  %v10051_v26 = vld [vmem:[#allocation21_spill] sm:$0xff] }
 0x3c5   : > { %v9620_v55 = vld [vmem:[%s9667_s5] sm:$0x1] }
 0x3c6   : > { %6147 = vmatpush1.bf16.msk.msra.mxu1 %vm9396_vm9, %v6145_v51 }
 0x3c7   : > { %6117 = vmatpush1.bf16.msra.mxu0 %v8877_v39  ;;  %6148 = vmatprep.subr.bf16.mxu1 %v6626_v28  ;;  %v10052_v39 = vmov 0.0  }
 0x3c8   : > { %6119 = vmatprep.subr.bf16.mxu0 %v8889_v59 }
 0x3ca   : > { %6151 = vmatpush1.bf16.msk.msra.mxu1 %vm9396_vm9, %v6149_v58 }
 0x3cb   : > { %6121 = vmatpush1.bf16.msra.mxu0 %v8883_v43  ;;  %6152 = vmatprep.subr.bf16.mxu1 %v6626_v28 }
 0x3ce   : > { %5188 = vmatmul.mubr.f32.vlgmr.msra.gmra.mrb[24].mxu0 %v9341_v34  ;;  %6154 = vmatpush1.bf16.msra.mxu1 %v8879_v24 }
 0x3cf   : > { %5810 = vmatprep.mubr.msk.f32.mxu0 %vm4932_vm10, %v9357_v45  ;;  %6155 = vmatprep.subr.bf16.mxu1 %v6626_v28 }
 0x3d1   : > { %v9593_v59 = vpop.permute.xlu0 %4914  ;;  %v9596_v54 = vpop.permute.xlu1 %4919 }
 0x3d2   : > { %5194 = vmatmul.mubr.f32.gmra.mrb[26].mxu0 %v9379_v35  ;;  %6157 = vmatpush1.bf16.msra.mxu1 %v10051_v26 }
 0x3d3   : > { %5811 = vmatprep.mubr.msk.f32.mxu0 %vm4932_vm10, %v9388_v38 }
 0x3d5   : > { %5277 = vmatmul.mubr.f32.vlgmr.msra.gmra.mrb[20].mxu1 %v9341_v34  ;;  %v9602_v36 = vpop.permute.xlu0 %4924  ;;  %v9607_v46 = vpop.permute.xlu1 %4929 }
 0x3d6   : > { %5200 = vmatmul.mubr.f32.gmra.mrb[28].mxu0 %v9410_v25  ;;  %5814 = vmatprep.mubr.msk.f32.mxu1 %vm4932_vm10, %v9357_v45 }
 0x3d7   : > { %5812 = vmatprep.mubr.msk.f32.mxu0 %vm4932_vm10, %v9425_v44 }
 0x3d9   : > { %5282 = vmatmul.mubr.f32.gmra.mrb[22].mxu1 %v9379_v35 }
 0x3da   : > { %5206 = vmatmul.mubr.f32.gmra.mrb[30].mxu0 %v9438_v52  ;;  %5815 = vmatprep.mubr.msk.f32.mxu1 %vm4932_vm10, %v9388_v38 }
 0x3db   : > { %5395 = vmatprep.mubr.f32.mxu0 %v10052_v39 }
 0x3dd   : > { %5287 = vmatmul.mubr.f32.gmra.mrb[24].mxu1 %v9410_v25 }
 0x3de   : > { %5816 = vmatprep.mubr.msk.f32.mxu1 %vm4932_vm10, %v9425_v44 }
 0x3e1   : > { %5292 = vmatmul.mubr.f32.gmra.mrb[26].mxu1 %v9438_v52 }
 0x3e2   : > { %5466 = vmatprep.mubr.f32.mxu1 %v10052_v39 }
 0x470   : > { %v5011_v24 = vpop.f32.mrb[16].mxu0 }
 0x471   : > { %v5013_v43 = vpop.f32.mrb[17].mxu0  ;;  %v5012_v34 = vadd.f32 %v5011_v24, %v9593_v59 }
 0x472   : > { %v5014_v45 = vadd.f32 %v5013_v43, %v9593_v59 }
 0x473   : > { %v5297_v52 = vmax.f32 %v5012_v34, 0.0 }
 0x474   : > { %v5017_v35 = vpop.f32.mrb[18].mxu0  ;;  %v5298_v17 = vmax.f32 %v5014_v45, 0.0 }
 0x475   : > { %v5018_v38 = vadd.f32 %v5017_v35, %v9596_v54  ;;  %v5019_v37 = vpop.f32.mrb[19].mxu0 }
 0x476   : > { %v5020_v25 = vadd.f32 %v5019_v37, %v9596_v54  ;;  %v5100_v44 = vpop.f32.mrb[12].mxu1 }
 0x477   : > { %v5304_v7 = vmax.f32 %v5018_v38, 0.0  ;;  %v5102_v32 = vpop.f32.mrb[13].mxu1  ;;  %v5101_v61 = vadd.f32 %v5100_v44, %v9593_v59 }
 0x478   : > { %v5305_v12 = vmax.f32 %v5020_v25, 0.0  ;;  %v5023_v0 = vpop.f32.mrb[20].mxu0  ;;  %v5103_v11 = vadd.f32 %v5102_v32, %v9593_v59 }
 0x479   : > { %v6160_v3 = vpack.c.bf16 %v5304_v7, %v5297_v52  ;;  %v5025_v13 = vpop.f32.mrb[21].mxu0  ;;  %v5024_v33 = vadd.f32 %v5023_v0, %v9602_v36  ;;  %v5299_v18 = vmax.f32 %v5101_v61, 0.0 }
 0x47a   : > { %v6158_v5 = vpack.c.bf16 %v5305_v12, %v5298_v17  ;;  %v5106_v60 = vpop.f32.mrb[14].mxu1  ;;  %v5026_v14 = vadd.f32 %v5025_v13, %v9602_v36  ;;  %v5300_v16 = vmax.f32 %v5103_v11, 0.0 }
 0x47b   : > { %v5107_v1 = vadd.f32 %v5106_v60, %v9596_v54  ;;  %v5108_v42 = vpop.f32.mrb[15].mxu1  ;;  %v5311_v19 = vmax.f32 %v5024_v33, 0.0 }
 0x47c   : > { %v5109_v29 = vadd.f32 %v5108_v42, %v9596_v54  ;;  %v5029_v27 = vpop.f32.mrb[22].mxu0  ;;  %6159 = vmatprep.subr.bf16.mxu0 %v6158_v5  ;;  %v5312_v9 = vmax.f32 %v5026_v14, 0.0 }
 0x47d   : > { %v5306_v48 = vmax.f32 %v5107_v1, 0.0  ;;  %v5030_v6 = vadd.f32 %v5029_v27, %v9607_v46  ;;  %v5031_v57 = vpop.f32.mrb[23].mxu0  ;;  %6161 = vmatpush1.bf16.msra.mxu0 %v6160_v3 }
 0x47e   : > { %v5307_v21 = vmax.f32 %v5109_v29, 0.0  ;;  %v5032_v8 = vadd.f32 %v5031_v57, %v9607_v46  ;;  %v5112_v2 = vpop.f32.mrb[16].mxu1 }
 0x47f   : > { %v6168_v10 = vpack.c.bf16 %v5306_v48, %v5299_v18  ;;  %v5318_v47 = vmax.f32 %v5030_v6, 0.0  ;;  %v5114_v30 = vpop.f32.mrb[17].mxu1  ;;  %v5113_v22 = vadd.f32 %v5112_v2, %v9602_v36 }
 0x480   : > { %v6166_v50 = vpack.c.bf16 %v5307_v21, %v5300_v16  ;;  %v5319_v49 = vmax.f32 %v5032_v8, 0.0  ;;  %v5115_v56 = vadd.f32 %v5114_v30, %v9602_v36 }
 0x481   : > { %v6164_v15 = vpack.c.bf16 %v5318_v47, %v5311_v19  ;;  %v5313_v4 = vmax.f32 %v5113_v22, 0.0 }
 0x482   : > { %v6162_v31 = vpack.c.bf16 %v5319_v49, %v5312_v9  ;;  %v5118_v23 = vpop.f32.mrb[18].mxu1  ;;  %6167 = vmatprep.subr.bf16.mxu1 %v6166_v50  ;;  %v5314_v51 = vmax.f32 %v5115_v56, 0.0 }
 0x483   : > { %v5119_v41 = vadd.f32 %v5118_v23, %v9607_v46  ;;  %v5120_v40 = vpop.f32.mrb[19].mxu1  ;;  %6169 = vmatpush1.bf16.msra.mxu1 %v6168_v10 }
 0x484   : > { %v5121_v62 = vadd.f32 %v5120_v40, %v9607_v46  ;;  %6163 = vmatprep.subr.bf16.mxu0 %v6162_v31 }
 0x485   : > { %v5320_v20 = vmax.f32 %v5119_v41, 0.0  ;;  %6165 = vmatpush1.bf16.msra.mxu0 %v6164_v15 }
 0x486   : > { %v5321_v53 = vmax.f32 %v5121_v62, 0.0 }
 0x487   : > { %v6172_v63 = vpack.c.bf16 %v5320_v20, %v5313_v4 }
 0x488   : > { %v6170_v58 = vpack.c.bf16 %v5321_v53, %v5314_v51  ;;  %5817 = vmatmul.mubr.msk.f32.vlgmr.msra.gmra.mrb[32].mxu0 %vm4932_vm10, %v9620_v55 }
 0x489   : > { %5537 = vmatprep.mubr.f32.mxu0 %v10052_v39 }
 0x48a   : > { %6171 = vmatprep.subr.bf16.mxu1 %v6170_v58 }
 0x48b   : > { %6173 = vmatpush1.bf16.msra.mxu1 %v6172_v63 }
 0x48c   : > { %6182 = vmatprep.subr.bf16.mxu1 %v6626_v28 }
 0x48e   : > { %5818 = vmatmul.mubr.msk.f32.vlgmr.msra.gmra.mrb[28].mxu1 %vm4932_vm10, %v9620_v55 }
 0x48f   : > { %5947 = vmatprep.mubr.msk.f32.mxu1 %vm6627_vm13, %v10052_v39 }
 0x4a1   : > { %v5189_v26 = vpop.f32.mrb[24].mxu0 }
 0x4a2   : > { %v5191_v24 = vpop.f32.mrb[25].mxu0  ;;  %v5190_v43 = vadd.f32 %v5189_v26, %v9593_v59 }
 0x4a3   : > { %v5192_v34 = vadd.f32 %v5191_v24, %v9593_v59 }
 0x4a4   : > { %v5301_v25 = vmax.f32 %v5190_v43, 0.0 }
 0x4a5   : > { %v5195_v45 = vpop.f32.mrb[26].mxu0  ;;  %v5302_v7 = vmax.f32 %v5192_v34, 0.0 }
 0x4a6   : > { %v5196_v35 = vadd.f32 %v5195_v45, %v9596_v54  ;;  %v5197_v38 = vpop.f32.mrb[27].mxu0 }
 0x4a7   : > { %v5198_v37 = vadd.f32 %v5197_v38, %v9596_v54 }
 0x4a8   : > { %v5308_v44 = vmax.f32 %v5196_v35, 0.0  ;;  %v5278_v52 = vpop.f32.mrb[20].mxu1 }
 0x4a9   : > { %v5309_v32 = vmax.f32 %v5198_v37, 0.0  ;;  %v5201_v17 = vpop.f32.mrb[28].mxu0  ;;  %v5280_v12 = vpop.f32.mrb[21].mxu1  ;;  %v5279_v61 = vadd.f32 %v5278_v52, %v9593_v59 }
 0x4aa   : > { %v6176_v39 = vpack.c.bf16 %v5308_v44, %v5301_v25  ;;  %v5203_v0 = vpop.f32.mrb[29].mxu0  ;;  %v5202_v13 = vadd.f32 %v5201_v17, %v9602_v36  ;;  %v10053_v25 = vld [vmem:[#allocation40_spill] sm:$0xff] }
 0x4ab   : > { %v6174_v3 = vpack.c.bf16 %v5309_v32, %v5302_v7  ;;  %v5204_v11 = vadd.f32 %v5203_v0, %v9602_v36  ;;  %v5303_v29 = vmax.f32 %v5279_v61, 0.0 }
 0x4ac   : > { %v5283_v5 = vpop.f32.mrb[22].mxu1  ;;  %v5315_v48 = vmax.f32 %v5202_v13, 0.0 }
 0x4ad   : > { %v5284_v60 = vadd.f32 %v5283_v5, %v9596_v54  ;;  %v5207_v33 = vpop.f32.mrb[30].mxu0  ;;  %v5285_v1 = vpop.f32.mrb[23].mxu1  ;;  %6175 = vmatprep.subr.bf16.mxu0 %v6174_v3  ;;  %v5316_v57 = vmax.f32 %v5204_v11, 0.0 }
 0x4ae   : > { %v5208_v42 = vadd.f32 %v5207_v33, %v9607_v46  ;;  %v5209_v14 = vpop.f32.mrb[31].mxu0  ;;  %6177 = vmatpush1.bf16.msra.mxu0 %v6176_v39 }
 0x4af   : > { %v5310_v27 = vmax.f32 %v5284_v60, 0.0  ;;  %v5210_v18 = vadd.f32 %v5209_v14, %v9607_v46 }
 0x4b0   : > { %v5322_v59 = vmax.f32 %v5208_v42, 0.0  ;;  %v5288_v6 = vpop.f32.mrb[24].mxu1 }
 0x4b1   : > { %v6183_v16 = vpack.c.bf16 %v5310_v27, %v5303_v29  ;;  %v5323_v21 = vmax.f32 %v5210_v18, 0.0  ;;  %v5290_v8 = vpop.f32.mrb[25].mxu1  ;;  %v5289_v19 = vadd.f32 %v5288_v6, %v9602_v36  ;;  %v5327_v36 = vstv %s5326_s8 }
 0x4b2   : > { %v6180_v2 = vpack.c.bf16 %v5322_v59, %v5315_v48 }
 0x4b3   : > { %v6178_v54 = vpack.c.bf16 %v5323_v21, %v5316_v57  ;;  %6184 = vmatpush3.bf16.msra.mxu1 %v6183_v16  ;;  %v5317_v9 = vmax.f32 %v5289_v19, 0.0 }
 0x4b4   : > { %v5293_v10 = vpop.f32.mrb[26].mxu1  ;;  %6185 = vmatprep.subr.bf16.mxu1 %v6626_v28 }
 0x4b5   : > { %v5294_v47 = vadd.f32 %v5293_v10, %v9607_v46  ;;  %v5295_v30 = vpop.f32.mrb[27].mxu1  ;;  %6179 = vmatprep.subr.bf16.mxu0 %v6178_v54 }
 0x4b6   : > { %6181 = vmatpush1.bf16.msra.mxu0 %v6180_v2 }
 0x4b7   : > { %v5324_v50 = vmax.f32 %v5294_v47, 0.0 }
 0x4b9   : > { %v6186_v49 = vpack.c.bf16 %v5324_v50, %v5317_v9  ;;  %5819 = vmatmul.mubr.msk.f32.vlgmr.msra.gmra.mrb[34].mxu0 %vm4932_vm10, %v9620_v55 }
 0x4bb   : > { %6187 = vmatpush3.bf16.msra.mxu1 %v6186_v49 }
 0x4be   : > { %5948 = vmatmul.mubr.msk.f32.vlgmr.msra.gmra.mrb[30].mxu1 %vm4932_vm10, %v9620_v55 }
 0x55b   : > { %v5397_v15 = vpop.f32.mrb[32].mxu0 }
 0x55c   : > { %v5398_v22 = vadd.f32 %v5397_v15, %v5327_v36  ;;  %v5399_v28 = vpop.f32.mrb[33].mxu0 }
 0x55d   : > { %v5400_v31 = vadd.f32 %v5399_v28, %v5327_v36 }
 0x55e   : > { %v5821_v46 = vmul.f32 -1.442695, %v5398_v22 }
 0x55f   : > { %v5822_v56 = vmul.f32 -1.442695, %v5400_v31 }
 0x560   : > { %6562 = vpow2.f32 %v5821_v46 }
 0x561   : > { %v5468_v23 = vpop.f32.mrb[28].mxu1  ;;  %6564 = vpow2.f32 %v5822_v56 }
 0x562   : > { %v5469_v41 = vadd.f32 %v5468_v23, %v5327_v36  ;;  %v5470_v40 = vpop.f32.mrb[29].mxu1 }
 0x563   : > { %v5471_v62 = vadd.f32 %v5470_v40, %v5327_v36 }
 0x564   : > { %v5823_v4 = vmul.f32 -1.442695, %v5469_v41 }
 0x565   : > { %v5824_v20 = vmul.f32 -1.442695, %v5471_v62 }
 0x566   : > { %6566 = vpow2.f32 %v5823_v4 }
 0x567   : > { %6568 = vpow2.f32 %v5824_v20 }
 0x56a   : > { %v6563_v51 = vpop.eup %6562 }
 0x56b   : > { %v6565_v55 = vpop.eup %6564  ;;  %v5635_v53 = vadd.f32 1.0, %v6563_v51 }
 0x56c   : > { %v5636_v63 = vadd.f32 1.0, %v6565_v55 }
 0x56d   : > { %6570 = vrcp.f32 %v5635_v53 }
 0x56e   : > { %6572 = vrcp.f32 %v5636_v63 }
 0x570   : > { %v6567_v58 = vpop.eup %6566 }
 0x571   : > { %v6569_v26 = vpop.eup %6568  ;;  %v5637_v24 = vadd.f32 1.0, %v6567_v58 }
 0x572   : > { %v5638_v43 = vadd.f32 1.0, %v6569_v26 }
 0x573   : > { %6574 = vrcp.f32 %v5637_v24 }
 0x574   : > { %6576 = vrcp.f32 %v5638_v43 }
 0x577   : > { %v6571_v34 = vpop.eup %6570 }
 0x578   : > { %v6573_v45 = vpop.eup %6572 }
 0x579   : > { %v5663_v35 = vcombine.low %v6571_v34, %v6573_v45 }
 0x57b   : > { %v5672_v44 = vrot.slane %v5663_v35, %v10053_v25 }
 0x57d   : > { %v6575_v38 = vpop.eup %6574 }
 0x57e   : > { %v6577_v37 = vpop.eup %6576 }
 0x57f   : > { %v5664_v52 = vcombine.low %v6575_v38, %v6577_v37 }
 0x581   : > { %v5679_v7 = vrot.slane %v5664_v52, %v10053_v25 }
 0x583   : > { %v5694_v32 = vcombine.low %v5672_v44, %v5679_v7 }
 0x585   : > { %v5702_v8 = vrot.slane %v5694_v32, %v10053_v25 }
 0x58c   : > { %v5539_v17 = vpop.f32.mrb[34].mxu0 }
 0x58d   : > { %v5540_v12 = vadd.f32 %v5539_v17, %v5327_v36  ;;  %v5541_v39 = vpop.f32.mrb[35].mxu0 }
 0x58e   : > { %v5542_v0 = vadd.f32 %v5541_v39, %v5327_v36 }
 0x58f   : > { %v5825_v3 = vmul.f32 -1.442695, %v5540_v12 }
 0x590   : > { %v5826_v61 = vmul.f32 -1.442695, %v5542_v0 }
 0x591   : > { %6578 = vpow2.f32 %v5825_v3  ;;  %v5610_v13 = vpop.f32.mrb[30].mxu1 }
 0x592   : > { %6580 = vpow2.f32 %v5826_v61  ;;  %v5611_v5 = vadd.f32 %v5610_v13, %v5327_v36  ;;  %v5949_v11 = vpop.f32.mrb[31].mxu1 }
 0x594   : > { %v5827_v60 = vmul.f32 -1.442695, %v5611_v5 }
 0x596   : > { %6582 = vpow2.f32 %v5827_v60 }
 0x59b   : > { %v6579_v33 = vpop.eup %6578 }
 0x59c   : > { %v6581_v1 = vpop.eup %6580  ;;  %v5639_v42 = vadd.f32 1.0, %v6579_v33 }
 0x59d   : > { %v5640_v14 = vadd.f32 1.0, %v6581_v1 }
 0x59e   : > { %6584 = vrcp.f32 %v5639_v42 }
 0x59f   : > { %6586 = vrcp.f32 %v5640_v14 }
 0x5a0   : > { %v6583_v29 = vpop.eup %6582 }
 0x5a1   : > { %v5641_v27 = vadd.f32 1.0, %v6583_v29 }
 0x5a3   : > { %6588 = vrcp.f32 %v5641_v27 }
 0x5a8   : > { %v6585_v18 = vpop.eup %6584 }
 0x5a9   : > { %v6587_v48 = vpop.eup %6586 }
 0x5aa   : > { %v5665_v59 = vcombine.low %v6585_v18, %v6587_v48 }
 0x5ac   : > { %v5686_v6 = vrot.slane %v5665_v59, %v10053_v25 }
 0x5ad   : > { %v6589_v57 = vpop.eup %6588 }
 0x5ae   : > { %v5693_v16 = vrot.slane %v6589_v57, %v10053_v25 }
 0x5b0   : > { %v5695_v21 = vcombine.low %v5686_v6, %v5693_v16 }
 0x5b2   : > { %v5709_v2 = vrot.slane %v5695_v21, %v10053_v25 }
 0x5b4   : > { %v5710_v54 = vcombine.low %v5702_v8, %v5709_v2 }
 0x5b6   : > { %5712 = vst.msk [vmem:[%s294_s30] sm:$0x7f] %vm6689_vm1, %v5710_v54 }
 0x5b7 PF: > { %s18_s26 = sadd.s32 1, %s6597_s26  }
 0x5b8   : > { %p15_p4 = scmp.ge.s32.totalorder %s18_s26, 4  }
 0x5ba   :  { %17 = sbr.rel (!%p15_p4) target bundleno = 2 (0x2), region = 104 }

</bundles_post_ra>
